<compile_context>
chip_gen: v7x
topology: tpu7x:2x2x1
jax: 0.10.0
libtpu: 0.0.40
codegen_flags: <defaults>
</compile_context>

<pallas_src>
import jax
import jax.numpy as jnp
from jax.experimental import pallas as pl
from jax.experimental.pallas import tpu as pltpu

jax.config.update("jax_default_matmul_precision", "highest")


# --------------------------------------------------------------------------
# Fused Pallas kernel: all LSTM layers + linear/ReLU head
# --------------------------------------------------------------------------
def _make_decoder_kernel(num_layers, T, Bp, H, E, C, V):
    H4 = 4 * H

    def kernel(*refs):
        it = iter(refs)
        # ----- inputs -----
        emb_ref = next(it)      # (T, Bp, E)   time-major embeddings
        ctx_ref = next(it)      # (Bp, C)      image context
        w_emb_ref = next(it)    # (E, 4H)      layer-0 W_ih (embedding part), transposed
        w_ctx_ref = next(it)    # (C, 4H)      layer-0 W_ih (context part), transposed
        whh0_ref = next(it)     # (H, 4H)      layer-0 W_hh transposed
        b0_ref = next(it)       # (1, 4H)      layer-0 b_ih + b_hh
        rest = []
        for _ in range(num_layers - 1):
            rest.append((next(it), next(it), next(it)))   # (w_ih_t, whh_t, b)
        lin_w_ref = next(it)    # (H, V)
        lin_b_ref = next(it)    # (1, V)
        # ----- outputs -----
        out_ref = next(it)      # (T, Bp, V)
        hN_ref = next(it)       # (L, Bp, H)
        cN_ref = next(it)       # (L, Bp, H)
        # ----- scratch -----
        gx_scr = next(it)       # (T, Bp, 4H)  precomputed input projection
        seq_scr = next(it)      # (T, Bp, H)   inter-layer activations (VMEM resident)
        h_scr = next(it)        # (Bp, H)
        c_scr = next(it)        # (Bp, H)

        def run_layer(layer_idx, whh_ref):
            whh = whh_ref[...]                      # hoisted out of the time loop
            h_scr[...] = jnp.zeros_like(h_scr)
            c_scr[...] = jnp.zeros_like(c_scr)

            def step(t, carry):
                h = h_scr[...]
                c = c_scr[...]
                # Only the recurrent matmul stays on the serial critical path.
                gates = gx_scr[t] + jnp.dot(
                    h, whh, preferred_element_type=jnp.float32)   # (Bp, 4H)
                i_g = jax.nn.sigmoid(gates[:, 0 * H:1 * H])
                f_g = jax.nn.sigmoid(gates[:, 1 * H:2 * H])
                g_g = jnp.tanh(gates[:, 2 * H:3 * H])
                o_g = jax.nn.sigmoid(gates[:, 3 * H:4 * H])
                c_new = f_g * c + i_g * g_g
                h_new = o_g * jnp.tanh(c_new)
                h_scr[...] = h_new
                c_scr[...] = c_new
                seq_scr[t] = h_new
                return carry

            # Short fixed trip-count: fully unroll for LLO scheduling visibility.
            jax.lax.fori_loop(0, T, step, 0, unroll=True)
            hN_ref[layer_idx] = h_scr[...]
            cN_ref[layer_idx] = c_scr[...]

        # ---- Layer 0: hoisted input projection -----------------------------
        emb_flat = emb_ref[...].reshape(T * Bp, E)
        gx = jnp.dot(emb_flat, w_emb_ref[...],
                     preferred_element_type=jnp.float32)          # (T*Bp, 4H)
        # Time-invariant context projection, folded into the bias (done once).
        ctx_gate = (jnp.dot(ctx_ref[...], w_ctx_ref[...],
                            preferred_element_type=jnp.float32)
                    + b0_ref[...])                                # (Bp, 4H)
        gx_scr[...] = gx.reshape(T, Bp, H4) + ctx_gate[None, :, :]
        run_layer(0, whh0_ref)

        # ---- Layers 1 .. L-1 -------------------------------------------------
        for l, (w_ih_ref, whh_ref, b_ref) in enumerate(rest, start=1):
            x_flat = seq_scr[...].reshape(T * Bp, H)
            gx = (jnp.dot(x_flat, w_ih_ref[...],
                          preferred_element_type=jnp.float32)
                  + b_ref[...])                                   # (T*Bp, 4H)
            gx_scr[...] = gx.reshape(T, Bp, H4)
            run_layer(l, whh_ref)

        # ---- Linear + ReLU head (fused, activations never leave VMEM) -------
        flat = seq_scr[...].reshape(T * Bp, H)
        logits = jnp.maximum(
            jnp.dot(flat, lin_w_ref[...], preferred_element_type=jnp.float32)
            + lin_b_ref[...],
            0.0)
        out_ref[...] = logits.reshape(T, Bp, V)

    return kernel


def decoder_fused_pallas(emb_tm, ctx, layer0, rest_layers, lin_w, lin_b):
    T, Bp, E = emb_tm.shape
    C = ctx.shape[1]
    H = layer0["whh_t"].shape[0]
    V = lin_w.shape[1]
    L = 1 + len(rest_layers)

    inputs = [emb_tm, ctx, layer0["w_emb_t"], layer0["w_ctx_t"],
              layer0["whh_t"], layer0["b"]]
    in_specs = [
        pl.BlockSpec((T, Bp, E), lambda i: (0, 0, 0)),
        pl.BlockSpec((Bp, C), lambda i: (0, 0)),
        pl.BlockSpec((E, 4 * H), lambda i: (0, 0)),
        pl.BlockSpec((C, 4 * H), lambda i: (0, 0)),
        pl.BlockSpec((H, 4 * H), lambda i: (0, 0)),
        pl.BlockSpec((1, 4 * H), lambda i: (0, 0)),
    ]
    for layer in rest_layers:
        inputs += [layer["w_ih_t"], layer["whh_t"], layer["b"]]
        in_specs += [pl.BlockSpec((H, 4 * H), lambda i: (0, 0)),
                     pl.BlockSpec((H, 4 * H), lambda i: (0, 0)),
                     pl.BlockSpec((1, 4 * H), lambda i: (0, 0))]
    inputs += [lin_w, lin_b]
    in_specs += [pl.BlockSpec((H, V), lambda i: (0, 0)),
                 pl.BlockSpec((1, V), lambda i: (0, 0))]

    out_shape = (jax.ShapeDtypeStruct((T, Bp, V), jnp.float32),
                 jax.ShapeDtypeStruct((L, Bp, H), jnp.float32),
                 jax.ShapeDtypeStruct((L, Bp, H), jnp.float32))
    out_specs = (pl.BlockSpec((T, Bp, V), lambda i: (0, 0, 0)),
                 pl.BlockSpec((L, Bp, H), lambda i: (0, 0, 0)),
                 pl.BlockSpec((L, Bp, H), lambda i: (0, 0, 0)))

    kernel = _make_decoder_kernel(L, T, Bp, H, E, C, V)
    return pl.pallas_call(
        kernel,
        grid=(1,),
        out_shape=out_shape,
        in_specs=in_specs,
        out_specs=out_specs,
        scratch_shapes=[pltpu.VMEM((T, Bp, 4 * H), jnp.float32),
                        pltpu.VMEM((T, Bp, H), jnp.float32),
                        pltpu.VMEM((Bp, H), jnp.float32),
                        pltpu.VMEM((Bp, H), jnp.float32)],
        compiler_params=pltpu.CompilerParams(
            dimension_semantics=("arbitrary",),
            vmem_limit_bytes=64 * 1024 * 1024),
    )(*inputs)


# --------------------------------------------------------------------------
# Decoder_Vanilla forward (matches PyTorch module semantics)
# --------------------------------------------------------------------------
@jax.jit
def decoder_vanilla_forward(params, caption, img_ctx):
    """caption: (B, T) int32 ids; img_ctx: (B, C) f32.

    Returns (output, (h_n, c_n)): output (B, T, V); h_n/c_n (num_layers, B, H)
    (zero initial state, like the PyTorch forward which ignores `hidden`).
    """
    B, T = caption.shape

    # Pad batch to a multiple of 8 for full sublane/MXU-row occupancy.
    Bp = ((B + 7) // 8) * 8
    pad = Bp - B

    # Embedding gather directly in time-major layout (glue; padding_idx=0 row
    # of the table is zero).
    emb_tm = params["embed"][caption.T].astype(jnp.float32)       # (T, B, E)
    ctx = img_ctx.astype(jnp.float32)                             # (B, C)
    if pad:
        emb_tm = jnp.pad(emb_tm, ((0, 0), (0, pad), (0, 0)))
        ctx = jnp.pad(ctx, ((0, pad), (0, 0)))

    out_tm, h_n, c_n = decoder_fused_pallas(
        emb_tm, ctx, params["lstm"][0], params["lstm"][1:],
        params["lin_w"], params["lin_b"])

    output = jnp.transpose(out_tm[:, :B, :], (1, 0, 2))           # (B, T, V)
    return output, (h_n[:, :B, :], c_n[:, :B, :])


# --------------------------------------------------------------------------
# Pure-JAX reference (correctness check)
# --------------------------------------------------------------------------
def decoder_vanilla_ref(params, caption, img_ctx):
    B, T = caption.shape
    emb = params["embed"][caption]
    ctx = jnp.broadcast_to(img_ctx[:, None, :], (B, T, img_ctx.shape[-1]))
    x = jnp.concatenate([emb, ctx], axis=-1)                      # (B, T, I)

    h_finals, c_finals = [], []
    for li, layer in enumerate(params["lstm"]):
        H = layer["whh_t"].shape[0]
        if li == 0:
            w_ih_t = jnp.concatenate([layer["w_emb_t"], layer["w_ctx_t"]], 0)
        else:
            w_ih_t = layer["w_ih_t"]

        def cell(carry, x_t, w_ih_t=w_ih_t, layer=layer, H=H):
            h, c = carry
            gates = x_t @ w_ih_t + h @ layer["whh_t"] + layer["b"]
            i_g = jax.nn.sigmoid(gates[:, 0 * H:1 * H])
            f_g = jax.nn.sigmoid(gates[:, 1 * H:2 * H])
            g_g = jnp.tanh(gates[:, 2 * H:3 * H])
            o_g = jax.nn.sigmoid(gates[:, 3 * H:4 * H])
            c = f_g * c + i_g * g_g
            h = o_g * jnp.tanh(c)
            return (h, c), h

        init = (jnp.zeros((B, H), jnp.float32), jnp.zeros((B, H), jnp.float32))
        (h_n, c_n), ys = jax.lax.scan(cell, init, jnp.transpose(x, (1, 0, 2)))
        x = jnp.transpose(ys, (1, 0, 2))
        h_finals.append(h_n)
        c_finals.append(c_n)

    out = jax.nn.relu(x @ params["lin_w"] + params["lin_b"])
    return out, (jnp.stack(h_finals, 0), jnp.stack(c_finals, 0))


# --------------------------------------------------------------------------
# Deterministic parameter construction
# --------------------------------------------------------------------------
def init_params(context_dim, embedding_dim, hidden_dim, vocab_size, num_layers,
                seed=0):
    key = jax.random.PRNGKey(seed)
    ks = jax.random.split(key, 3 + 4 * num_layers)
    k_iter = iter(ks)

    # nn.Embedding(vocab, E, padding_idx=0): row 0 zeroed.
    embed = jax.random.normal(next(k_iter), (vocab_size, embedding_dim),
                              jnp.float32)
    embed = embed.at[0].set(0.0)

    scale = 1.0 / jnp.sqrt(jnp.float32(hidden_dim))
    lstm = []
    for layer in range(num_layers):
        in_dim = (context_dim + embedding_dim) if layer == 0 else hidden_dim
        w_ih = jax.random.uniform(next(k_iter), (4 * hidden_dim, in_dim),
                                  jnp.float32, -scale, scale)
        w_hh = jax.random.uniform(next(k_iter), (4 * hidden_dim, hidden_dim),
                                  jnp.float32, -scale, scale)
        b_ih = jax.random.uniform(next(k_iter), (4 * hidden_dim,),
                                  jnp.float32, -scale, scale)
        b_hh = jax.random.uniform(next(k_iter), (4 * hidden_dim,),
                                  jnp.float32, -scale, scale)
        b = (b_ih + b_hh)[None, :]
        w_ih_t = w_ih.T                                   # (in_dim, 4H)
        if layer == 0:
            # Input is cat([emb, ctx], -1): split rows of W_ih^T accordingly.
            lstm.append(dict(w_emb_t=w_ih_t[:embedding_dim],
                             w_ctx_t=w_ih_t[embedding_dim:],
                             whh_t=w_hh.T, b=b))
        else:
            lstm.append(dict(w_ih_t=w_ih_t, whh_t=w_hh.T, b=b))

    lin_w = jax.random.uniform(next(k_iter), (vocab_size, hidden_dim),
                               jnp.float32, -scale, scale)
    lin_b = jax.random.uniform(next(k_iter), (vocab_size,),
                               jnp.float32, -scale, scale)

    return dict(embed=embed, lstm=lstm, lin_w=lin_w.T, lin_b=lin_b[None, :])


# --------------------------------------------------------------------------
if __name__ == "__main__":
    # Small shapes consistent with the module's forward.
    B, T = 2, 8
    context_dim, embedding_dim = 16, 16
    hidden_dim, vocab_size, num_layers = 32, 32, 2

    params = init_params(context_dim, embedding_dim, hidden_dim, vocab_size,
                         num_layers, seed=0)

    key = jax.random.PRNGKey(0)
    k_cap, k_ctx = jax.random.split(key)
    caption = jax.random.randint(k_cap, (B, T), 0, vocab_size, jnp.int32)
    img_ctx = jax.random.normal(k_ctx, (B, context_dim), jnp.float32)

    out, (h_n, c_n) = decoder_vanilla_forward(params, caption, img_ctx)
    out = jax.block_until_ready(out)
    h_n = jax.block_until_ready(h_n)
    c_n = jax.block_until_ready(c_n)

    # Sanity check against a pure-JAX reference.
    ref_out, (ref_h, ref_c) = decoder_vanilla_ref(params, caption, img_ctx)
    assert out.shape == (B, T, vocab_size)
    assert h_n.shape == (num_layers, B, hidden_dim)
    assert c_n.shape == (num_layers, B, hidden_dim)
    assert jnp.allclose(out, ref_out, atol=1e-4, rtol=1e-4)
    assert jnp.allclose(h_n, ref_h, atol=1e-4, rtol=1e-4)
    assert jnp.allclose(c_n, ref_c, atol=1e-4, rtol=1e-4)

    print("KERNEL_OK")
</pallas_src>

<mosaic_0001>
module attributes {stable_mosaic.version = 11 : i64} {
  func.func @kernel(%arg0: i32, %arg1: memref<8x8x16xf32, #tpu.memory_space<vmem>>, %arg2: memref<8x16xf32, #tpu.memory_space<vmem>>, %arg3: memref<16x128xf32, #tpu.memory_space<vmem>>, %arg4: memref<16x128xf32, #tpu.memory_space<vmem>>, %arg5: memref<32x128xf32, #tpu.memory_space<vmem>>, %arg6: memref<1x128xf32, #tpu.memory_space<vmem>>, %arg7: memref<32x128xf32, #tpu.memory_space<vmem>>, %arg8: memref<32x128xf32, #tpu.memory_space<vmem>>, %arg9: memref<1x128xf32, #tpu.memory_space<vmem>>, %arg10: memref<32x32xf32, #tpu.memory_space<vmem>>, %arg11: memref<1x32xf32, #tpu.memory_space<vmem>>, %arg12: memref<8x8x32xf32, #tpu.memory_space<vmem>>, %arg13: memref<2x8x32xf32, #tpu.memory_space<vmem>>, %arg14: memref<2x8x32xf32, #tpu.memory_space<vmem>>, %arg15: memref<8x8x128xf32, #tpu.memory_space<vmem>>, %arg16: memref<8x8x32xf32, #tpu.memory_space<vmem>>, %arg17: memref<8x32xf32, #tpu.memory_space<vmem>>, %arg18: memref<8x32xf32, #tpu.memory_space<vmem>>) attributes {dimension_semantics = [#tpu.dimension_semantics<arbitrary>], iteration_bounds = array<i64: 1>, scalar_prefetch = 0 : i64, scratch_operands = 4 : i64, tpu.core_type = #tpu.core_type<tc>, window_params = [{pipeline_mode = #tpu.pipeline_mode<synchronous>, transform_indices = @transform_0, window_bounds = array<i64: 8, 8, 16>}, {pipeline_mode = #tpu.pipeline_mode<synchronous>, transform_indices = @transform_1, window_bounds = array<i64: 8, 16>}, {pipeline_mode = #tpu.pipeline_mode<synchronous>, transform_indices = @transform_2, window_bounds = array<i64: 16, 128>}, {pipeline_mode = #tpu.pipeline_mode<synchronous>, transform_indices = @transform_3, window_bounds = array<i64: 16, 128>}, {pipeline_mode = #tpu.pipeline_mode<synchronous>, transform_indices = @transform_4, window_bounds = array<i64: 32, 128>}, {pipeline_mode = #tpu.pipeline_mode<synchronous>, transform_indices = @transform_5, window_bounds = array<i64: 1, 128>}, {pipeline_mode = #tpu.pipeline_mode<synchronous>, transform_indices = @transform_6, window_bounds = array<i64: 32, 128>}, {pipeline_mode = #tpu.pipeline_mode<synchronous>, transform_indices = @transform_7, window_bounds = array<i64: 32, 128>}, {pipeline_mode = #tpu.pipeline_mode<synchronous>, transform_indices = @transform_8, window_bounds = array<i64: 1, 128>}, {pipeline_mode = #tpu.pipeline_mode<synchronous>, transform_indices = @transform_9, window_bounds = array<i64: 32, 32>}, {pipeline_mode = #tpu.pipeline_mode<synchronous>, transform_indices = @transform_10, window_bounds = array<i64: 1, 32>}, {pipeline_mode = #tpu.pipeline_mode<synchronous>, transform_indices = @transform_11, window_bounds = array<i64: 8, 8, 32>}, {pipeline_mode = #tpu.pipeline_mode<synchronous>, transform_indices = @transform_12, window_bounds = array<i64: 2, 8, 32>}, {pipeline_mode = #tpu.pipeline_mode<synchronous>, transform_indices = @transform_13, window_bounds = array<i64: 2, 8, 32>}]} {
    %c0 = arith.constant 0 : index
    %c0_0 = arith.constant 0 : index
    %c0_1 = arith.constant 0 : index
    %0 = vector.load %arg1[%c0, %c0_0, %c0_1] : memref<8x8x16xf32, #tpu.memory_space<vmem>>, vector<8x8x16xf32>
    %1 = vector.shape_cast %0 : vector<8x8x16xf32> to vector<64x16xf32>
    %c0_2 = arith.constant 0 : index
    %c0_3 = arith.constant 0 : index
    %2 = vector.load %arg3[%c0_2, %c0_3] : memref<16x128xf32, #tpu.memory_space<vmem>>, vector<16x128xf32>
    %cst = arith.constant dense<0.000000e+00> : vector<64x128xf32>
    %3 = tpu.matmul %1, %2, %cst {dimension_numbers = #tpu.dot_dimension_numbers<[1], [0], [0], [1], [0, 0, 1, 1], [], []>, precision = #tpu.contract_precision<fp32>} : vector<64x16xf32>, vector<16x128xf32>, vector<64x128xf32> -> vector<64x128xf32>
    %c0_4 = arith.constant 0 : index
    %c0_5 = arith.constant 0 : index
    %4 = vector.load %arg2[%c0_4, %c0_5] : memref<8x16xf32, #tpu.memory_space<vmem>>, vector<8x16xf32>
    %c0_6 = arith.constant 0 : index
    %c0_7 = arith.constant 0 : index
    %5 = vector.load %arg4[%c0_6, %c0_7] : memref<16x128xf32, #tpu.memory_space<vmem>>, vector<16x128xf32>
    %cst_8 = arith.constant dense<0.000000e+00> : vector<8x128xf32>
    %6 = tpu.matmul %4, %5, %cst_8 {dimension_numbers = #tpu.dot_dimension_numbers<[1], [0], [0], [1], [0, 0, 1, 1], [], []>, precision = #tpu.contract_precision<fp32>} : vector<8x16xf32>, vector<16x128xf32>, vector<8x128xf32> -> vector<8x128xf32>
    %c0_9 = arith.constant 0 : index
    %c0_10 = arith.constant 0 : index
    %7 = vector.load %arg6[%c0_9, %c0_10] : memref<1x128xf32, #tpu.memory_space<vmem>>, vector<1x128xf32>
    %8 = vector.broadcast %7 : vector<1x128xf32> to vector<8x128xf32>
    %9 = arith.addf %6, %8 : vector<8x128xf32>
    %10 = vector.shape_cast %3 : vector<64x128xf32> to vector<8x8x128xf32>
    %11 = vector.shape_cast %9 : vector<8x128xf32> to vector<1x8x128xf32>
    %12 = vector.broadcast %11 : vector<1x8x128xf32> to vector<8x8x128xf32>
    %13 = arith.addf %10, %12 : vector<8x8x128xf32>
    %c0_11 = arith.constant 0 : index
    %c0_12 = arith.constant 0 : index
    %c0_13 = arith.constant 0 : index
    %14 = vector.load %arg15[%c0_11, %c0_12, %c0_13] : memref<8x8x128xf32, #tpu.memory_space<vmem>>, vector<8x8x128xf32>
    tpu.vector_store %arg15[%c0_11, %c0_12, %c0_13], %13 {strides = array<i32>} : memref<8x8x128xf32, #tpu.memory_space<vmem>>, vector<8x8x128xf32>,
    %c0_14 = arith.constant 0 : index
    %c0_15 = arith.constant 0 : index
    %15 = vector.load %arg5[%c0_14, %c0_15] : memref<32x128xf32, #tpu.memory_space<vmem>>, vector<32x128xf32>
    %cst_16 = arith.constant 0.000000e+00 : f32
    %16 = vector.broadcast %cst_16 : f32 to vector<8x32xf32>
    %c0_17 = arith.constant 0 : index
    %c0_18 = arith.constant 0 : index
    %17 = vector.load %arg17[%c0_17, %c0_18] : memref<8x32xf32, #tpu.memory_space<vmem>>, vector<8x32xf32>
    tpu.vector_store %arg17[%c0_17, %c0_18], %16 {strides = array<i32>} : memref<8x32xf32, #tpu.memory_space<vmem>>, vector<8x32xf32>,
    %cst_19 = arith.constant 0.000000e+00 : f32
    %18 = vector.broadcast %cst_19 : f32 to vector<8x32xf32>
    %c0_20 = arith.constant 0 : index
    %c0_21 = arith.constant 0 : index
    %19 = vector.load %arg18[%c0_20, %c0_21] : memref<8x32xf32, #tpu.memory_space<vmem>>, vector<8x32xf32>
    tpu.vector_store %arg18[%c0_20, %c0_21], %18 {strides = array<i32>} : memref<8x32xf32, #tpu.memory_space<vmem>>, vector<8x32xf32>,
    %c0_i32 = arith.constant 0 : i32
    %c0_22 = arith.constant 0 : index
    %c0_23 = arith.constant 0 : index
    %20 = vector.load %arg17[%c0_22, %c0_23] : memref<8x32xf32, #tpu.memory_space<vmem>>, vector<8x32xf32>
    %c0_24 = arith.constant 0 : index
    %c0_25 = arith.constant 0 : index
    %21 = vector.load %arg18[%c0_24, %c0_25] : memref<8x32xf32, #tpu.memory_space<vmem>>, vector<8x32xf32>
    %22 = arith.index_cast %c0_i32 : i32 to index
    %c0_26 = arith.constant 0 : index
    %c0_27 = arith.constant 0 : index
    %23 = vector.load %arg15[%22, %c0_26, %c0_27] : memref<8x8x128xf32, #tpu.memory_space<vmem>>, vector<1x8x128xf32>
    %24 = vector.shape_cast %23 : vector<1x8x128xf32> to vector<8x128xf32>
    %cst_28 = arith.constant dense<0.000000e+00> : vector<8x128xf32>
    %25 = tpu.matmul %20, %15, %cst_28 {dimension_numbers = #tpu.dot_dimension_numbers<[1], [0], [0], [1], [0, 0, 1, 1], [], []>, precision = #tpu.contract_precision<fp32>} : vector<8x32xf32>, vector<32x128xf32>, vector<8x128xf32> -> vector<8x128xf32>
    %26 = arith.addf %24, %25 : vector<8x128xf32>
    %27 = vector.extract_strided_slice %26 {offsets = [0, 0], sizes = [8, 32], strides = [1, 1]} : vector<8x128xf32> to vector<8x32xf32>
    %28 = arith.negf %27 : vector<8x32xf32>
    %29 = math.exp %28 : vector<8x32xf32>
    %cst_29 = arith.constant 1.000000e+00 : f32
    %30 = vector.broadcast %cst_29 : f32 to vector<8x32xf32>
    %31 = arith.addf %30, %29 : vector<8x32xf32>
    %32 = arith.divf %30, %31 : vector<8x32xf32>
    %33 = vector.extract_strided_slice %26 {offsets = [0, 32], sizes = [8, 32], strides = [1, 1]} : vector<8x128xf32> to vector<8x32xf32>
    %34 = arith.negf %33 : vector<8x32xf32>
    %35 = math.exp %34 : vector<8x32xf32>
    %cst_30 = arith.constant 1.000000e+00 : f32
    %36 = vector.broadcast %cst_30 : f32 to vector<8x32xf32>
    %37 = arith.addf %36, %35 : vector<8x32xf32>
    %38 = arith.divf %36, %37 : vector<8x32xf32>
    %39 = vector.extract_strided_slice %26 {offsets = [0, 64], sizes = [8, 32], strides = [1, 1]} : vector<8x128xf32> to vector<8x32xf32>
    %40 = math.tanh %39 : vector<8x32xf32>
    %41 = vector.extract_strided_slice %26 {offsets = [0, 96], sizes = [8, 32], strides = [1, 1]} : vector<8x128xf32> to vector<8x32xf32>
    %42 = arith.negf %41 : vector<8x32xf32>
    %43 = math.exp %42 : vector<8x32xf32>
    %cst_31 = arith.constant 1.000000e+00 : f32
    %44 = vector.broadcast %cst_31 : f32 to vector<8x32xf32>
    %45 = arith.addf %44, %43 : vector<8x32xf32>
    %46 = arith.divf %44, %45 : vector<8x32xf32>
    %47 = arith.mulf %38, %21 : vector<8x32xf32>
    %48 = arith.mulf %32, %40 : vector<8x32xf32>
    %49 = arith.addf %47, %48 : vector<8x32xf32>
    %50 = math.tanh %49 : vector<8x32xf32>
    %51 = arith.mulf %46, %50 : vector<8x32xf32>
    %c0_32 = arith.constant 0 : index
    %c0_33 = arith.constant 0 : index
    %52 = vector.load %arg17[%c0_32, %c0_33] : memref<8x32xf32, #tpu.memory_space<vmem>>, vector<8x32xf32>
    tpu.vector_store %arg17[%c0_32, %c0_33], %51 {strides = array<i32>} : memref<8x32xf32, #tpu.memory_space<vmem>>, vector<8x32xf32>,
    %c0_34 = arith.constant 0 : index
    %c0_35 = arith.constant 0 : index
    %53 = vector.load %arg18[%c0_34, %c0_35] : memref<8x32xf32, #tpu.memory_space<vmem>>, vector<8x32xf32>
    tpu.vector_store %arg18[%c0_34, %c0_35], %49 {strides = array<i32>} : memref<8x32xf32, #tpu.memory_space<vmem>>, vector<8x32xf32>,
    %54 = arith.index_cast %c0_i32 : i32 to index
    %c0_36 = arith.constant 0 : index
    %c0_37 = arith.constant 0 : index
    %55 = vector.load %arg16[%54, %c0_36, %c0_37] : memref<8x8x32xf32, #tpu.memory_space<vmem>>, vector<1x8x32xf32>
    %56 = vector.shape_cast %55 : vector<1x8x32xf32> to vector<8x32xf32>
    %57 = vector.shape_cast %51 : vector<8x32xf32> to vector<1x8x32xf32>
    tpu.vector_store %arg16[%54, %c0_36, %c0_37], %57 {strides = array<i32>} : memref<8x8x32xf32, #tpu.memory_space<vmem>>, vector<1x8x32xf32>,
    %c1_i32 = arith.constant 1 : i32
    %c0_38 = arith.constant 0 : index
    %c0_39 = arith.constant 0 : index
    %58 = vector.load %arg17[%c0_38, %c0_39] : memref<8x32xf32, #tpu.memory_space<vmem>>, vector<8x32xf32>
    %c0_40 = arith.constant 0 : index
    %c0_41 = arith.constant 0 : index
    %59 = vector.load %arg18[%c0_40, %c0_41] : memref<8x32xf32, #tpu.memory_space<vmem>>, vector<8x32xf32>
    %60 = arith.index_cast %c1_i32 : i32 to index
    %c0_42 = arith.constant 0 : index
    %c0_43 = arith.constant 0 : index
    %61 = vector.load %arg15[%60, %c0_42, %c0_43] : memref<8x8x128xf32, #tpu.memory_space<vmem>>, vector<1x8x128xf32>
    %62 = vector.shape_cast %61 : vector<1x8x128xf32> to vector<8x128xf32>
    %cst_44 = arith.constant dense<0.000000e+00> : vector<8x128xf32>
    %63 = tpu.matmul %58, %15, %cst_44 {dimension_numbers = #tpu.dot_dimension_numbers<[1], [0], [0], [1], [0, 0, 1, 1], [], []>, precision = #tpu.contract_precision<fp32>} : vector<8x32xf32>, vector<32x128xf32>, vector<8x128xf32> -> vector<8x128xf32>
    %64 = arith.addf %62, %63 : vector<8x128xf32>
    %65 = vector.extract_strided_slice %64 {offsets = [0, 0], sizes = [8, 32], strides = [1, 1]} : vector<8x128xf32> to vector<8x32xf32>
    %66 = arith.negf %65 : vector<8x32xf32>
    %67 = math.exp %66 : vector<8x32xf32>
    %cst_45 = arith.constant 1.000000e+00 : f32
    %68 = vector.broadcast %cst_45 : f32 to vector<8x32xf32>
    %69 = arith.addf %68, %67 : vector<8x32xf32>
    %70 = arith.divf %68, %69 : vector<8x32xf32>
    %71 = vector.extract_strided_slice %64 {offsets = [0, 32], sizes = [8, 32], strides = [1, 1]} : vector<8x128xf32> to vector<8x32xf32>
    %72 = arith.negf %71 : vector<8x32xf32>
    %73 = math.exp %72 : vector<8x32xf32>
    %cst_46 = arith.constant 1.000000e+00 : f32
    %74 = vector.broadcast %cst_46 : f32 to vector<8x32xf32>
    %75 = arith.addf %74, %73 : vector<8x32xf32>
    %76 = arith.divf %74, %75 : vector<8x32xf32>
    %77 = vector.extract_strided_slice %64 {offsets = [0, 64], sizes = [8, 32], strides = [1, 1]} : vector<8x128xf32> to vector<8x32xf32>
    %78 = math.tanh %77 : vector<8x32xf32>
    %79 = vector.extract_strided_slice %64 {offsets = [0, 96], sizes = [8, 32], strides = [1, 1]} : vector<8x128xf32> to vector<8x32xf32>
    %80 = arith.negf %79 : vector<8x32xf32>
    %81 = math.exp %80 : vector<8x32xf32>
    %cst_47 = arith.constant 1.000000e+00 : f32
    %82 = vector.broadcast %cst_47 : f32 to vector<8x32xf32>
    %83 = arith.addf %82, %81 : vector<8x32xf32>
    %84 = arith.divf %82, %83 : vector<8x32xf32>
    %85 = arith.mulf %76, %59 : vector<8x32xf32>
    %86 = arith.mulf %70, %78 : vector<8x32xf32>
    %87 = arith.addf %85, %86 : vector<8x32xf32>
    %88 = math.tanh %87 : vector<8x32xf32>
    %89 = arith.mulf %84, %88 : vector<8x32xf32>
    %c0_48 = arith.constant 0 : index
    %c0_49 = arith.constant 0 : index
    %90 = vector.load %arg17[%c0_48, %c0_49] : memref<8x32xf32, #tpu.memory_space<vmem>>, vector<8x32xf32>
    tpu.vector_store %arg17[%c0_48, %c0_49], %89 {strides = array<i32>} : memref<8x32xf32, #tpu.memory_space<vmem>>, vector<8x32xf32>,
    %c0_50 = arith.constant 0 : index
    %c0_51 = arith.constant 0 : index
    %91 = vector.load %arg18[%c0_50, %c0_51] : memref<8x32xf32, #tpu.memory_space<vmem>>, vector<8x32xf32>
    tpu.vector_store %arg18[%c0_50, %c0_51], %87 {strides = array<i32>} : memref<8x32xf32, #tpu.memory_space<vmem>>, vector<8x32xf32>,
    %92 = arith.index_cast %c1_i32 : i32 to index
    %c0_52 = arith.constant 0 : index
    %c0_53 = arith.constant 0 : index
    %93 = vector.load %arg16[%92, %c0_52, %c0_53] : memref<8x8x32xf32, #tpu.memory_space<vmem>>, vector<1x8x32xf32>
    %94 = vector.shape_cast %93 : vector<1x8x32xf32> to vector<8x32xf32>
    %95 = vector.shape_cast %89 : vector<8x32xf32> to vector<1x8x32xf32>
    tpu.vector_store %arg16[%92, %c0_52, %c0_53], %95 {strides = array<i32>} : memref<8x8x32xf32, #tpu.memory_space<vmem>>, vector<1x8x32xf32>,
    %c2_i32 = arith.constant 2 : i32
    %c0_54 = arith.constant 0 : index
    %c0_55 = arith.constant 0 : index
    %96 = vector.load %arg17[%c0_54, %c0_55] : memref<8x32xf32, #tpu.memory_space<vmem>>, vector<8x32xf32>
    %c0_56 = arith.constant 0 : index
    %c0_57 = arith.constant 0 : index
    %97 = vector.load %arg18[%c0_56, %c0_57] : memref<8x32xf32, #tpu.memory_space<vmem>>, vector<8x32xf32>
    %98 = arith.index_cast %c2_i32 : i32 to index
    %c0_58 = arith.constant 0 : index
    %c0_59 = arith.constant 0 : index
    %99 = vector.load %arg15[%98, %c0_58, %c0_59] : memref<8x8x128xf32, #tpu.memory_space<vmem>>, vector<1x8x128xf32>
    %100 = vector.shape_cast %99 : vector<1x8x128xf32> to vector<8x128xf32>
    %cst_60 = arith.constant dense<0.000000e+00> : vector<8x128xf32>
    %101 = tpu.matmul %96, %15, %cst_60 {dimension_numbers = #tpu.dot_dimension_numbers<[1], [0], [0], [1], [0, 0, 1, 1], [], []>, precision = #tpu.contract_precision<fp32>} : vector<8x32xf32>, vector<32x128xf32>, vector<8x128xf32> -> vector<8x128xf32>
    %102 = arith.addf %100, %101 : vector<8x128xf32>
    %103 = vector.extract_strided_slice %102 {offsets = [0, 0], sizes = [8, 32], strides = [1, 1]} : vector<8x128xf32> to vector<8x32xf32>
    %104 = arith.negf %103 : vector<8x32xf32>
    %105 = math.exp %104 : vector<8x32xf32>
    %cst_61 = arith.constant 1.000000e+00 : f32
    %106 = vector.broadcast %cst_61 : f32 to vector<8x32xf32>
    %107 = arith.addf %106, %105 : vector<8x32xf32>
    %108 = arith.divf %106, %107 : vector<8x32xf32>
    %109 = vector.extract_strided_slice %102 {offsets = [0, 32], sizes = [8, 32], strides = [1, 1]} : vector<8x128xf32> to vector<8x32xf32>
    %110 = arith.negf %109 : vector<8x32xf32>
    %111 = math.exp %110 : vector<8x32xf32>
    %cst_62 = arith.constant 1.000000e+00 : f32
    %112 = vector.broadcast %cst_62 : f32 to vector<8x32xf32>
    %113 = arith.addf %112, %111 : vector<8x32xf32>
    %114 = arith.divf %112, %113 : vector<8x32xf32>
    %115 = vector.extract_strided_slice %102 {offsets = [0, 64], sizes = [8, 32], strides = [1, 1]} : vector<8x128xf32> to vector<8x32xf32>
    %116 = math.tanh %115 : vector<8x32xf32>
    %117 = vector.extract_strided_slice %102 {offsets = [0, 96], sizes = [8, 32], strides = [1, 1]} : vector<8x128xf32> to vector<8x32xf32>
    %118 = arith.negf %117 : vector<8x32xf32>
    %119 = math.exp %118 : vector<8x32xf32>
    %cst_63 = arith.constant 1.000000e+00 : f32
    %120 = vector.broadcast %cst_63 : f32 to vector<8x32xf32>
    %121 = arith.addf %120, %119 : vector<8x32xf32>
    %122 = arith.divf %120, %121 : vector<8x32xf32>
    %123 = arith.mulf %114, %97 : vector<8x32xf32>
    %124 = arith.mulf %108, %116 : vector<8x32xf32>
    %125 = arith.addf %123, %124 : vector<8x32xf32>
    %126 = math.tanh %125 : vector<8x32xf32>
    %127 = arith.mulf %122, %126 : vector<8x32xf32>
    %c0_64 = arith.constant 0 : index
    %c0_65 = arith.constant 0 : index
    %128 = vector.load %arg17[%c0_64, %c0_65] : memref<8x32xf32, #tpu.memory_space<vmem>>, vector<8x32xf32>
    tpu.vector_store %arg17[%c0_64, %c0_65], %127 {strides = array<i32>} : memref<8x32xf32, #tpu.memory_space<vmem>>, vector<8x32xf32>,
    %c0_66 = arith.constant 0 : index
    %c0_67 = arith.constant 0 : index
    %129 = vector.load %arg18[%c0_66, %c0_67] : memref<8x32xf32, #tpu.memory_space<vmem>>, vector<8x32xf32>
    tpu.vector_store %arg18[%c0_66, %c0_67], %125 {strides = array<i32>} : memref<8x32xf32, #tpu.memory_space<vmem>>, vector<8x32xf32>,
    %130 = arith.index_cast %c2_i32 : i32 to index
    %c0_68 = arith.constant 0 : index
    %c0_69 = arith.constant 0 : index
    %131 = vector.load %arg16[%130, %c0_68, %c0_69] : memref<8x8x32xf32, #tpu.memory_space<vmem>>, vector<1x8x32xf32>
    %132 = vector.shape_cast %131 : vector<1x8x32xf32> to vector<8x32xf32>
    %133 = vector.shape_cast %127 : vector<8x32xf32> to vector<1x8x32xf32>
    tpu.vector_store %arg16[%130, %c0_68, %c0_69], %133 {strides = array<i32>} : memref<8x8x32xf32, #tpu.memory_space<vmem>>, vector<1x8x32xf32>,
    %c3_i32 = arith.constant 3 : i32
    %c0_70 = arith.constant 0 : index
    %c0_71 = arith.constant 0 : index
    %134 = vector.load %arg17[%c0_70, %c0_71] : memref<8x32xf32, #tpu.memory_space<vmem>>, vector<8x32xf32>
    %c0_72 = arith.constant 0 : index
    %c0_73 = arith.constant 0 : index
    %135 = vector.load %arg18[%c0_72, %c0_73] : memref<8x32xf32, #tpu.memory_space<vmem>>, vector<8x32xf32>
    %136 = arith.index_cast %c3_i32 : i32 to index
    %c0_74 = arith.constant 0 : index
    %c0_75 = arith.constant 0 : index
    %137 = vector.load %arg15[%136, %c0_74, %c0_75] : memref<8x8x128xf32, #tpu.memory_space<vmem>>, vector<1x8x128xf32>
    %138 = vector.shape_cast %137 : vector<1x8x128xf32> to vector<8x128xf32>
    %cst_76 = arith.constant dense<0.000000e+00> : vector<8x128xf32>
    %139 = tpu.matmul %134, %15, %cst_76 {dimension_numbers = #tpu.dot_dimension_numbers<[1], [0], [0], [1], [0, 0, 1, 1], [], []>, precision = #tpu.contract_precision<fp32>} : vector<8x32xf32>, vector<32x128xf32>, vector<8x128xf32> -> vector<8x128xf32>
    %140 = arith.addf %138, %139 : vector<8x128xf32>
    %141 = vector.extract_strided_slice %140 {offsets = [0, 0], sizes = [8, 32], strides = [1, 1]} : vector<8x128xf32> to vector<8x32xf32>
    %142 = arith.negf %141 : vector<8x32xf32>
    %143 = math.exp %142 : vector<8x32xf32>
    %cst_77 = arith.constant 1.000000e+00 : f32
    %144 = vector.broadcast %cst_77 : f32 to vector<8x32xf32>
    %145 = arith.addf %144, %143 : vector<8x32xf32>
    %146 = arith.divf %144, %145 : vector<8x32xf32>
    %147 = vector.extract_strided_slice %140 {offsets = [0, 32], sizes = [8, 32], strides = [1, 1]} : vector<8x128xf32> to vector<8x32xf32>
    %148 = arith.negf %147 : vector<8x32xf32>
    %149 = math.exp %148 : vector<8x32xf32>
    %cst_78 = arith.constant 1.000000e+00 : f32
    %150 = vector.broadcast %cst_78 : f32 to vector<8x32xf32>
    %151 = arith.addf %150, %149 : vector<8x32xf32>
    %152 = arith.divf %150, %151 : vector<8x32xf32>
    %153 = vector.extract_strided_slice %140 {offsets = [0, 64], sizes = [8, 32], strides = [1, 1]} : vector<8x128xf32> to vector<8x32xf32>
    %154 = math.tanh %153 : vector<8x32xf32>
    %155 = vector.extract_strided_slice %140 {offsets = [0, 96], sizes = [8, 32], strides = [1, 1]} : vector<8x128xf32> to vector<8x32xf32>
    %156 = arith.negf %155 : vector<8x32xf32>
    %157 = math.exp %156 : vector<8x32xf32>
    %cst_79 = arith.constant 1.000000e+00 : f32
    %158 = vector.broadcast %cst_79 : f32 to vector<8x32xf32>
    %159 = arith.addf %158, %157 : vector<8x32xf32>
    %160 = arith.divf %158, %159 : vector<8x32xf32>
    %161 = arith.mulf %152, %135 : vector<8x32xf32>
    %162 = arith.mulf %146, %154 : vector<8x32xf32>
    %163 = arith.addf %161, %162 : vector<8x32xf32>
    %164 = math.tanh %163 : vector<8x32xf32>
    %165 = arith.mulf %160, %164 : vector<8x32xf32>
    %c0_80 = arith.constant 0 : index
    %c0_81 = arith.constant 0 : index
    %166 = vector.load %arg17[%c0_80, %c0_81] : memref<8x32xf32, #tpu.memory_space<vmem>>, vector<8x32xf32>
    tpu.vector_store %arg17[%c0_80, %c0_81], %165 {strides = array<i32>} : memref<8x32xf32, #tpu.memory_space<vmem>>, vector<8x32xf32>,
    %c0_82 = arith.constant 0 : index
    %c0_83 = arith.constant 0 : index
    %167 = vector.load %arg18[%c0_82, %c0_83] : memref<8x32xf32, #tpu.memory_space<vmem>>, vector<8x32xf32>
    tpu.vector_store %arg18[%c0_82, %c0_83], %163 {strides = array<i32>} : memref<8x32xf32, #tpu.memory_space<vmem>>, vector<8x32xf32>,
    %168 = arith.index_cast %c3_i32 : i32 to index
    %c0_84 = arith.constant 0 : index
    %c0_85 = arith.constant 0 : index
    %169 = vector.load %arg16[%168, %c0_84, %c0_85] : memref<8x8x32xf32, #tpu.memory_space<vmem>>, vector<1x8x32xf32>
    %170 = vector.shape_cast %169 : vector<1x8x32xf32> to vector<8x32xf32>
    %171 = vector.shape_cast %165 : vector<8x32xf32> to vector<1x8x32xf32>
    tpu.vector_store %arg16[%168, %c0_84, %c0_85], %171 {strides = array<i32>} : memref<8x8x32xf32, #tpu.memory_space<vmem>>, vector<1x8x32xf32>,
    %c4_i32 = arith.constant 4 : i32
    %c0_86 = arith.constant 0 : index
    %c0_87 = arith.constant 0 : index
    %172 = vector.load %arg17[%c0_86, %c0_87] : memref<8x32xf32, #tpu.memory_space<vmem>>, vector<8x32xf32>
    %c0_88 = arith.constant 0 : index
    %c0_89 = arith.constant 0 : index
    %173 = vector.load %arg18[%c0_88, %c0_89] : memref<8x32xf32, #tpu.memory_space<vmem>>, vector<8x32xf32>
    %174 = arith.index_cast %c4_i32 : i32 to index
    %c0_90 = arith.constant 0 : index
    %c0_91 = arith.constant 0 : index
    %175 = vector.load %arg15[%174, %c0_90, %c0_91] : memref<8x8x128xf32, #tpu.memory_space<vmem>>, vector<1x8x128xf32>
    %176 = vector.shape_cast %175 : vector<1x8x128xf32> to vector<8x128xf32>
    %cst_92 = arith.constant dense<0.000000e+00> : vector<8x128xf32>
    %177 = tpu.matmul %172, %15, %cst_92 {dimension_numbers = #tpu.dot_dimension_numbers<[1], [0], [0], [1], [0, 0, 1, 1], [], []>, precision = #tpu.contract_precision<fp32>} : vector<8x32xf32>, vector<32x128xf32>, vector<8x128xf32> -> vector<8x128xf32>
    %178 = arith.addf %176, %177 : vector<8x128xf32>
    %179 = vector.extract_strided_slice %178 {offsets = [0, 0], sizes = [8, 32], strides = [1, 1]} : vector<8x128xf32> to vector<8x32xf32>
    %180 = arith.negf %179 : vector<8x32xf32>
    %181 = math.exp %180 : vector<8x32xf32>
    %cst_93 = arith.constant 1.000000e+00 : f32
    %182 = vector.broadcast %cst_93 : f32 to vector<8x32xf32>
    %183 = arith.addf %182, %181 : vector<8x32xf32>
    %184 = arith.divf %182, %183 : vector<8x32xf32>
    %185 = vector.extract_strided_slice %178 {offsets = [0, 32], sizes = [8, 32], strides = [1, 1]} : vector<8x128xf32> to vector<8x32xf32>
    %186 = arith.negf %185 : vector<8x32xf32>
    %187 = math.exp %186 : vector<8x32xf32>
    %cst_94 = arith.constant 1.000000e+00 : f32
    %188 = vector.broadcast %cst_94 : f32 to vector<8x32xf32>
    %189 = arith.addf %188, %187 : vector<8x32xf32>
    %190 = arith.divf %188, %189 : vector<8x32xf32>
    %191 = vector.extract_strided_slice %178 {offsets = [0, 64], sizes = [8, 32], strides = [1, 1]} : vector<8x128xf32> to vector<8x32xf32>
    %192 = math.tanh %191 : vector<8x32xf32>
    %193 = vector.extract_strided_slice %178 {offsets = [0, 96], sizes = [8, 32], strides = [1, 1]} : vector<8x128xf32> to vector<8x32xf32>
    %194 = arith.negf %193 : vector<8x32xf32>
    %195 = math.exp %194 : vector<8x32xf32>
    %cst_95 = arith.constant 1.000000e+00 : f32
    %196 = vector.broadcast %cst_95 : f32 to vector<8x32xf32>
    %197 = arith.addf %196, %195 : vector<8x32xf32>
    %198 = arith.divf %196, %197 : vector<8x32xf32>
    %199 = arith.mulf %190, %173 : vector<8x32xf32>
    %200 = arith.mulf %184, %192 : vector<8x32xf32>
    %201 = arith.addf %199, %200 : vector<8x32xf32>
    %202 = math.tanh %201 : vector<8x32xf32>
    %203 = arith.mulf %198, %202 : vector<8x32xf32>
    %c0_96 = arith.constant 0 : index
    %c0_97 = arith.constant 0 : index
    %204 = vector.load %arg17[%c0_96, %c0_97] : memref<8x32xf32, #tpu.memory_space<vmem>>, vector<8x32xf32>
    tpu.vector_store %arg17[%c0_96, %c0_97], %203 {strides = array<i32>} : memref<8x32xf32, #tpu.memory_space<vmem>>, vector<8x32xf32>,
    %c0_98 = arith.constant 0 : index
    %c0_99 = arith.constant 0 : index
    %205 = vector.load %arg18[%c0_98, %c0_99] : memref<8x32xf32, #tpu.memory_space<vmem>>, vector<8x32xf32>
    tpu.vector_store %arg18[%c0_98, %c0_99], %201 {strides = array<i32>} : memref<8x32xf32, #tpu.memory_space<vmem>>, vector<8x32xf32>,
    %206 = arith.index_cast %c4_i32 : i32 to index
    %c0_100 = arith.constant 0 : index
    %c0_101 = arith.constant 0 : index
    %207 = vector.load %arg16[%206, %c0_100, %c0_101] : memref<8x8x32xf32, #tpu.memory_space<vmem>>, vector<1x8x32xf32>
    %208 = vector.shape_cast %207 : vector<1x8x32xf32> to vector<8x32xf32>
    %209 = vector.shape_cast %203 : vector<8x32xf32> to vector<1x8x32xf32>
    tpu.vector_store %arg16[%206, %c0_100, %c0_101], %209 {strides = array<i32>} : memref<8x8x32xf32, #tpu.memory_space<vmem>>, vector<1x8x32xf32>,
    %c5_i32 = arith.constant 5 : i32
    %c0_102 = arith.constant 0 : index
    %c0_103 = arith.constant 0 : index
    %210 = vector.load %arg17[%c0_102, %c0_103] : memref<8x32xf32, #tpu.memory_space<vmem>>, vector<8x32xf32>
    %c0_104 = arith.constant 0 : index
    %c0_105 = arith.constant 0 : index
    %211 = vector.load %arg18[%c0_104, %c0_105] : memref<8x32xf32, #tpu.memory_space<vmem>>, vector<8x32xf32>
    %212 = arith.index_cast %c5_i32 : i32 to index
    %c0_106 = arith.constant 0 : index
    %c0_107 = arith.constant 0 : index
    %213 = vector.load %arg15[%212, %c0_106, %c0_107] : memref<8x8x128xf32, #tpu.memory_space<vmem>>, vector<1x8x128xf32>
    %214 = vector.shape_cast %213 : vector<1x8x128xf32> to vector<8x128xf32>
    %cst_108 = arith.constant dense<0.000000e+00> : vector<8x128xf32>
    %215 = tpu.matmul %210, %15, %cst_108 {dimension_numbers = #tpu.dot_dimension_numbers<[1], [0], [0], [1], [0, 0, 1, 1], [], []>, precision = #tpu.contract_precision<fp32>} : vector<8x32xf32>, vector<32x128xf32>, vector<8x128xf32> -> vector<8x128xf32>
    %216 = arith.addf %214, %215 : vector<8x128xf32>
    %217 = vector.extract_strided_slice %216 {offsets = [0, 0], sizes = [8, 32], strides = [1, 1]} : vector<8x128xf32> to vector<8x32xf32>
    %218 = arith.negf %217 : vector<8x32xf32>
    %219 = math.exp %218 : vector<8x32xf32>
    %cst_109 = arith.constant 1.000000e+00 : f32
    %220 = vector.broadcast %cst_109 : f32 to vector<8x32xf32>
    %221 = arith.addf %220, %219 : vector<8x32xf32>
    %222 = arith.divf %220, %221 : vector<8x32xf32>
    %223 = vector.extract_strided_slice %216 {offsets = [0, 32], sizes = [8, 32], strides = [1, 1]} : vector<8x128xf32> to vector<8x32xf32>
    %224 = arith.negf %223 : vector<8x32xf32>
    %225 = math.exp %224 : vector<8x32xf32>
    %cst_110 = arith.constant 1.000000e+00 : f32
    %226 = vector.broadcast %cst_110 : f32 to vector<8x32xf32>
    %227 = arith.addf %226, %225 : vector<8x32xf32>
    %228 = arith.divf %226, %227 : vector<8x32xf32>
    %229 = vector.extract_strided_slice %216 {offsets = [0, 64], sizes = [8, 32], strides = [1, 1]} : vector<8x128xf32> to vector<8x32xf32>
    %230 = math.tanh %229 : vector<8x32xf32>
    %231 = vector.extract_strided_slice %216 {offsets = [0, 96], sizes = [8, 32], strides = [1, 1]} : vector<8x128xf32> to vector<8x32xf32>
    %232 = arith.negf %231 : vector<8x32xf32>
    %233 = math.exp %232 : vector<8x32xf32>
    %cst_111 = arith.constant 1.000000e+00 : f32
    %234 = vector.broadcast %cst_111 : f32 to vector<8x32xf32>
    %235 = arith.addf %234, %233 : vector<8x32xf32>
    %236 = arith.divf %234, %235 : vector<8x32xf32>
    %237 = arith.mulf %228, %211 : vector<8x32xf32>
    %238 = arith.mulf %222, %230 : vector<8x32xf32>
    %239 = arith.addf %237, %238 : vector<8x32xf32>
    %240 = math.tanh %239 : vector<8x32xf32>
    %241 = arith.mulf %236, %240 : vector<8x32xf32>
    %c0_112 = arith.constant 0 : index
    %c0_113 = arith.constant 0 : index
    %242 = vector.load %arg17[%c0_112, %c0_113] : memref<8x32xf32, #tpu.memory_space<vmem>>, vector<8x32xf32>
    tpu.vector_store %arg17[%c0_112, %c0_113], %241 {strides = array<i32>} : memref<8x32xf32, #tpu.memory_space<vmem>>, vector<8x32xf32>,
    %c0_114 = arith.constant 0 : index
    %c0_115 = arith.constant 0 : index
    %243 = vector.load %arg18[%c0_114, %c0_115] : memref<8x32xf32, #tpu.memory_space<vmem>>, vector<8x32xf32>
    tpu.vector_store %arg18[%c0_114, %c0_115], %239 {strides = array<i32>} : memref<8x32xf32, #tpu.memory_space<vmem>>, vector<8x32xf32>,
    %244 = arith.index_cast %c5_i32 : i32 to index
    %c0_116 = arith.constant 0 : index
    %c0_117 = arith.constant 0 : index
    %245 = vector.load %arg16[%244, %c0_116, %c0_117] : memref<8x8x32xf32, #tpu.memory_space<vmem>>, vector<1x8x32xf32>
    %246 = vector.shape_cast %245 : vector<1x8x32xf32> to vector<8x32xf32>
    %247 = vector.shape_cast %241 : vector<8x32xf32> to vector<1x8x32xf32>
    tpu.vector_store %arg16[%244, %c0_116, %c0_117], %247 {strides = array<i32>} : memref<8x8x32xf32, #tpu.memory_space<vmem>>, vector<1x8x32xf32>,
    %c6_i32 = arith.constant 6 : i32
    %c0_118 = arith.constant 0 : index
    %c0_119 = arith.constant 0 : index
    %248 = vector.load %arg17[%c0_118, %c0_119] : memref<8x32xf32, #tpu.memory_space<vmem>>, vector<8x32xf32>
    %c0_120 = arith.constant 0 : index
    %c0_121 = arith.constant 0 : index
    %249 = vector.load %arg18[%c0_120, %c0_121] : memref<8x32xf32, #tpu.memory_space<vmem>>, vector<8x32xf32>
    %250 = arith.index_cast %c6_i32 : i32 to index
    %c0_122 = arith.constant 0 : index
    %c0_123 = arith.constant 0 : index
    %251 = vector.load %arg15[%250, %c0_122, %c0_123] : memref<8x8x128xf32, #tpu.memory_space<vmem>>, vector<1x8x128xf32>
    %252 = vector.shape_cast %251 : vector<1x8x128xf32> to vector<8x128xf32>
    %cst_124 = arith.constant dense<0.000000e+00> : vector<8x128xf32>
    %253 = tpu.matmul %248, %15, %cst_124 {dimension_numbers = #tpu.dot_dimension_numbers<[1], [0], [0], [1], [0, 0, 1, 1], [], []>, precision = #tpu.contract_precision<fp32>} : vector<8x32xf32>, vector<32x128xf32>, vector<8x128xf32> -> vector<8x128xf32>
    %254 = arith.addf %252, %253 : vector<8x128xf32>
    %255 = vector.extract_strided_slice %254 {offsets = [0, 0], sizes = [8, 32], strides = [1, 1]} : vector<8x128xf32> to vector<8x32xf32>
    %256 = arith.negf %255 : vector<8x32xf32>
    %257 = math.exp %256 : vector<8x32xf32>
    %cst_125 = arith.constant 1.000000e+00 : f32
    %258 = vector.broadcast %cst_125 : f32 to vector<8x32xf32>
    %259 = arith.addf %258, %257 : vector<8x32xf32>
    %260 = arith.divf %258, %259 : vector<8x32xf32>
    %261 = vector.extract_strided_slice %254 {offsets = [0, 32], sizes = [8, 32], strides = [1, 1]} : vector<8x128xf32> to vector<8x32xf32>
    %262 = arith.negf %261 : vector<8x32xf32>
    %263 = math.exp %262 : vector<8x32xf32>
    %cst_126 = arith.constant 1.000000e+00 : f32
    %264 = vector.broadcast %cst_126 : f32 to vector<8x32xf32>
    %265 = arith.addf %264, %263 : vector<8x32xf32>
    %266 = arith.divf %264, %265 : vector<8x32xf32>
    %267 = vector.extract_strided_slice %254 {offsets = [0, 64], sizes = [8, 32], strides = [1, 1]} : vector<8x128xf32> to vector<8x32xf32>
    %268 = math.tanh %267 : vector<8x32xf32>
    %269 = vector.extract_strided_slice %254 {offsets = [0, 96], sizes = [8, 32], strides = [1, 1]} : vector<8x128xf32> to vector<8x32xf32>
    %270 = arith.negf %269 : vector<8x32xf32>
    %271 = math.exp %270 : vector<8x32xf32>
    %cst_127 = arith.constant 1.000000e+00 : f32
    %272 = vector.broadcast %cst_127 : f32 to vector<8x32xf32>
    %273 = arith.addf %272, %271 : vector<8x32xf32>
    %274 = arith.divf %272, %273 : vector<8x32xf32>
    %275 = arith.mulf %266, %249 : vector<8x32xf32>
    %276 = arith.mulf %260, %268 : vector<8x32xf32>
    %277 = arith.addf %275, %276 : vector<8x32xf32>
    %278 = math.tanh %277 : vector<8x32xf32>
    %279 = arith.mulf %274, %278 : vector<8x32xf32>
    %c0_128 = arith.constant 0 : index
    %c0_129 = arith.constant 0 : index
    %280 = vector.load %arg17[%c0_128, %c0_129] : memref<8x32xf32, #tpu.memory_space<vmem>>, vector<8x32xf32>
    tpu.vector_store %arg17[%c0_128, %c0_129], %279 {strides = array<i32>} : memref<8x32xf32, #tpu.memory_space<vmem>>, vector<8x32xf32>,
    %c0_130 = arith.constant 0 : index
    %c0_131 = arith.constant 0 : index
    %281 = vector.load %arg18[%c0_130, %c0_131] : memref<8x32xf32, #tpu.memory_space<vmem>>, vector<8x32xf32>
    tpu.vector_store %arg18[%c0_130, %c0_131], %277 {strides = array<i32>} : memref<8x32xf32, #tpu.memory_space<vmem>>, vector<8x32xf32>,
    %282 = arith.index_cast %c6_i32 : i32 to index
    %c0_132 = arith.constant 0 : index
    %c0_133 = arith.constant 0 : index
    %283 = vector.load %arg16[%282, %c0_132, %c0_133] : memref<8x8x32xf32, #tpu.memory_space<vmem>>, vector<1x8x32xf32>
    %284 = vector.shape_cast %283 : vector<1x8x32xf32> to vector<8x32xf32>
    %285 = vector.shape_cast %279 : vector<8x32xf32> to vector<1x8x32xf32>
    tpu.vector_store %arg16[%282, %c0_132, %c0_133], %285 {strides = array<i32>} : memref<8x8x32xf32, #tpu.memory_space<vmem>>, vector<1x8x32xf32>,
    %c7_i32 = arith.constant 7 : i32
    %c0_134 = arith.constant 0 : index
    %c0_135 = arith.constant 0 : index
    %286 = vector.load %arg17[%c0_134, %c0_135] : memref<8x32xf32, #tpu.memory_space<vmem>>, vector<8x32xf32>
    %c0_136 = arith.constant 0 : index
    %c0_137 = arith.constant 0 : index
    %287 = vector.load %arg18[%c0_136, %c0_137] : memref<8x32xf32, #tpu.memory_space<vmem>>, vector<8x32xf32>
    %288 = arith.index_cast %c7_i32 : i32 to index
    %c0_138 = arith.constant 0 : index
    %c0_139 = arith.constant 0 : index
    %289 = vector.load %arg15[%288, %c0_138, %c0_139] : memref<8x8x128xf32, #tpu.memory_space<vmem>>, vector<1x8x128xf32>
    %290 = vector.shape_cast %289 : vector<1x8x128xf32> to vector<8x128xf32>
    %cst_140 = arith.constant dense<0.000000e+00> : vector<8x128xf32>
    %291 = tpu.matmul %286, %15, %cst_140 {dimension_numbers = #tpu.dot_dimension_numbers<[1], [0], [0], [1], [0, 0, 1, 1], [], []>, precision = #tpu.contract_precision<fp32>} : vector<8x32xf32>, vector<32x128xf32>, vector<8x128xf32> -> vector<8x128xf32>
    %292 = arith.addf %290, %291 : vector<8x128xf32>
    %293 = vector.extract_strided_slice %292 {offsets = [0, 0], sizes = [8, 32], strides = [1, 1]} : vector<8x128xf32> to vector<8x32xf32>
    %294 = arith.negf %293 : vector<8x32xf32>
    %295 = math.exp %294 : vector<8x32xf32>
    %cst_141 = arith.constant 1.000000e+00 : f32
    %296 = vector.broadcast %cst_141 : f32 to vector<8x32xf32>
    %297 = arith.addf %296, %295 : vector<8x32xf32>
    %298 = arith.divf %296, %297 : vector<8x32xf32>
    %299 = vector.extract_strided_slice %292 {offsets = [0, 32], sizes = [8, 32], strides = [1, 1]} : vector<8x128xf32> to vector<8x32xf32>
    %300 = arith.negf %299 : vector<8x32xf32>
    %301 = math.exp %300 : vector<8x32xf32>
    %cst_142 = arith.constant 1.000000e+00 : f32
    %302 = vector.broadcast %cst_142 : f32 to vector<8x32xf32>
    %303 = arith.addf %302, %301 : vector<8x32xf32>
    %304 = arith.divf %302, %303 : vector<8x32xf32>
    %305 = vector.extract_strided_slice %292 {offsets = [0, 64], sizes = [8, 32], strides = [1, 1]} : vector<8x128xf32> to vector<8x32xf32>
    %306 = math.tanh %305 : vector<8x32xf32>
    %307 = vector.extract_strided_slice %292 {offsets = [0, 96], sizes = [8, 32], strides = [1, 1]} : vector<8x128xf32> to vector<8x32xf32>
    %308 = arith.negf %307 : vector<8x32xf32>
    %309 = math.exp %308 : vector<8x32xf32>
    %cst_143 = arith.constant 1.000000e+00 : f32
    %310 = vector.broadcast %cst_143 : f32 to vector<8x32xf32>
    %311 = arith.addf %310, %309 : vector<8x32xf32>
    %312 = arith.divf %310, %311 : vector<8x32xf32>
    %313 = arith.mulf %304, %287 : vector<8x32xf32>
    %314 = arith.mulf %298, %306 : vector<8x32xf32>
    %315 = arith.addf %313, %314 : vector<8x32xf32>
    %316 = math.tanh %315 : vector<8x32xf32>
    %317 = arith.mulf %312, %316 : vector<8x32xf32>
    %c0_144 = arith.constant 0 : index
    %c0_145 = arith.constant 0 : index
    %318 = vector.load %arg17[%c0_144, %c0_145] : memref<8x32xf32, #tpu.memory_space<vmem>>, vector<8x32xf32>
    tpu.vector_store %arg17[%c0_144, %c0_145], %317 {strides = array<i32>} : memref<8x32xf32, #tpu.memory_space<vmem>>, vector<8x32xf32>,
    %c0_146 = arith.constant 0 : index
    %c0_147 = arith.constant 0 : index
    %319 = vector.load %arg18[%c0_146, %c0_147] : memref<8x32xf32, #tpu.memory_space<vmem>>, vector<8x32xf32>
    tpu.vector_store %arg18[%c0_146, %c0_147], %315 {strides = array<i32>} : memref<8x32xf32, #tpu.memory_space<vmem>>, vector<8x32xf32>,
    %320 = arith.index_cast %c7_i32 : i32 to index
    %c0_148 = arith.constant 0 : index
    %c0_149 = arith.constant 0 : index
    %321 = vector.load %arg16[%320, %c0_148, %c0_149] : memref<8x8x32xf32, #tpu.memory_space<vmem>>, vector<1x8x32xf32>
    %322 = vector.shape_cast %321 : vector<1x8x32xf32> to vector<8x32xf32>
    %323 = vector.shape_cast %317 : vector<8x32xf32> to vector<1x8x32xf32>
    tpu.vector_store %arg16[%320, %c0_148, %c0_149], %323 {strides = array<i32>} : memref<8x8x32xf32, #tpu.memory_space<vmem>>, vector<1x8x32xf32>,
    %c8_i32 = arith.constant 8 : i32
    %c0_150 = arith.constant 0 : index
    %c0_151 = arith.constant 0 : index
    %324 = vector.load %arg17[%c0_150, %c0_151] : memref<8x32xf32, #tpu.memory_space<vmem>>, vector<8x32xf32>
    %c0_152 = arith.constant 0 : index
    %c0_153 = arith.constant 0 : index
    %c0_154 = arith.constant 0 : index
    %325 = vector.load %arg13[%c0_152, %c0_153, %c0_154] : memref<2x8x32xf32, #tpu.memory_space<vmem>>, vector<1x8x32xf32>
    %326 = vector.shape_cast %325 : vector<1x8x32xf32> to vector<8x32xf32>
    %327 = vector.shape_cast %324 : vector<8x32xf32> to vector<1x8x32xf32>
    tpu.vector_store %arg13[%c0_152, %c0_153, %c0_154], %327 {strides = array<i32>} : memref<2x8x32xf32, #tpu.memory_space<vmem>>, vector<1x8x32xf32>,
    %c0_155 = arith.constant 0 : index
    %c0_156 = arith.constant 0 : index
    %328 = vector.load %arg18[%c0_155, %c0_156] : memref<8x32xf32, #tpu.memory_space<vmem>>, vector<8x32xf32>
    %c0_157 = arith.constant 0 : index
    %c0_158 = arith.constant 0 : index
    %c0_159 = arith.constant 0 : index
    %329 = vector.load %arg14[%c0_157, %c0_158, %c0_159] : memref<2x8x32xf32, #tpu.memory_space<vmem>>, vector<1x8x32xf32>
    %330 = vector.shape_cast %329 : vector<1x8x32xf32> to vector<8x32xf32>
    %331 = vector.shape_cast %328 : vector<8x32xf32> to vector<1x8x32xf32>
    tpu.vector_store %arg14[%c0_157, %c0_158, %c0_159], %331 {strides = array<i32>} : memref<2x8x32xf32, #tpu.memory_space<vmem>>, vector<1x8x32xf32>,
    %c0_160 = arith.constant 0 : index
    %c0_161 = arith.constant 0 : index
    %c0_162 = arith.constant 0 : index
    %332 = vector.load %arg16[%c0_160, %c0_161, %c0_162] : memref<8x8x32xf32, #tpu.memory_space<vmem>>, vector<8x8x32xf32>
    %333 = vector.shape_cast %332 : vector<8x8x32xf32> to vector<64x32xf32>
    %c0_163 = arith.constant 0 : index
    %c0_164 = arith.constant 0 : index
    %334 = vector.load %arg7[%c0_163, %c0_164] : memref<32x128xf32, #tpu.memory_space<vmem>>, vector<32x128xf32>
    %cst_165 = arith.constant dense<0.000000e+00> : vector<64x128xf32>
    %335 = tpu.matmul %333, %334, %cst_165 {dimension_numbers = #tpu.dot_dimension_numbers<[1], [0], [0], [1], [0, 0, 1, 1], [], []>, precision = #tpu.contract_precision<fp32>} : vector<64x32xf32>, vector<32x128xf32>, vector<64x128xf32> -> vector<64x128xf32>
    %c0_166 = arith.constant 0 : index
    %c0_167 = arith.constant 0 : index
    %336 = vector.load %arg9[%c0_166, %c0_167] : memref<1x128xf32, #tpu.memory_space<vmem>>, vector<1x128xf32>
    %337 = vector.broadcast %336 : vector<1x128xf32> to vector<64x128xf32>
    %338 = arith.addf %335, %337 : vector<64x128xf32>
    %339 = vector.shape_cast %338 : vector<64x128xf32> to vector<8x8x128xf32>
    %c0_168 = arith.constant 0 : index
    %c0_169 = arith.constant 0 : index
    %c0_170 = arith.constant 0 : index
    %340 = vector.load %arg15[%c0_168, %c0_169, %c0_170] : memref<8x8x128xf32, #tpu.memory_space<vmem>>, vector<8x8x128xf32>
    tpu.vector_store %arg15[%c0_168, %c0_169, %c0_170], %339 {strides = array<i32>} : memref<8x8x128xf32, #tpu.memory_space<vmem>>, vector<8x8x128xf32>,
    %c0_171 = arith.constant 0 : index
    %c0_172 = arith.constant 0 : index
    %341 = vector.load %arg8[%c0_171, %c0_172] : memref<32x128xf32, #tpu.memory_space<vmem>>, vector<32x128xf32>
    %cst_173 = arith.constant 0.000000e+00 : f32
    %342 = vector.broadcast %cst_173 : f32 to vector<8x32xf32>
    %c0_174 = arith.constant 0 : index
    %c0_175 = arith.constant 0 : index
    %343 = vector.load %arg17[%c0_174, %c0_175] : memref<8x32xf32, #tpu.memory_space<vmem>>, vector<8x32xf32>
    tpu.vector_store %arg17[%c0_174, %c0_175], %342 {strides = array<i32>} : memref<8x32xf32, #tpu.memory_space<vmem>>, vector<8x32xf32>,
    %cst_176 = arith.constant 0.000000e+00 : f32
    %344 = vector.broadcast %cst_176 : f32 to vector<8x32xf32>
    %c0_177 = arith.constant 0 : index
    %c0_178 = arith.constant 0 : index
    %345 = vector.load %arg18[%c0_177, %c0_178] : memref<8x32xf32, #tpu.memory_space<vmem>>, vector<8x32xf32>
    tpu.vector_store %arg18[%c0_177, %c0_178], %344 {strides = array<i32>} : memref<8x32xf32, #tpu.memory_space<vmem>>, vector<8x32xf32>,
    %c0_i32_179 = arith.constant 0 : i32
    %c0_180 = arith.constant 0 : index
    %c0_181 = arith.constant 0 : index
    %346 = vector.load %arg17[%c0_180, %c0_181] : memref<8x32xf32, #tpu.memory_space<vmem>>, vector<8x32xf32>
    %c0_182 = arith.constant 0 : index
    %c0_183 = arith.constant 0 : index
    %347 = vector.load %arg18[%c0_182, %c0_183] : memref<8x32xf32, #tpu.memory_space<vmem>>, vector<8x32xf32>
    %348 = arith.index_cast %c0_i32_179 : i32 to index
    %c0_184 = arith.constant 0 : index
    %c0_185 = arith.constant 0 : index
    %349 = vector.load %arg15[%348, %c0_184, %c0_185] : memref<8x8x128xf32, #tpu.memory_space<vmem>>, vector<1x8x128xf32>
    %350 = vector.shape_cast %349 : vector<1x8x128xf32> to vector<8x128xf32>
    %cst_186 = arith.constant dense<0.000000e+00> : vector<8x128xf32>
    %351 = tpu.matmul %346, %341, %cst_186 {dimension_numbers = #tpu.dot_dimension_numbers<[1], [0], [0], [1], [0, 0, 1, 1], [], []>, precision = #tpu.contract_precision<fp32>} : vector<8x32xf32>, vector<32x128xf32>, vector<8x128xf32> -> vector<8x128xf32>
    %352 = arith.addf %350, %351 : vector<8x128xf32>
    %353 = vector.extract_strided_slice %352 {offsets = [0, 0], sizes = [8, 32], strides = [1, 1]} : vector<8x128xf32> to vector<8x32xf32>
    %354 = arith.negf %353 : vector<8x32xf32>
    %355 = math.exp %354 : vector<8x32xf32>
    %cst_187 = arith.constant 1.000000e+00 : f32
    %356 = vector.broadcast %cst_187 : f32 to vector<8x32xf32>
    %357 = arith.addf %356, %355 : vector<8x32xf32>
    %358 = arith.divf %356, %357 : vector<8x32xf32>
    %359 = vector.extract_strided_slice %352 {offsets = [0, 32], sizes = [8, 32], strides = [1, 1]} : vector<8x128xf32> to vector<8x32xf32>
    %360 = arith.negf %359 : vector<8x32xf32>
    %361 = math.exp %360 : vector<8x32xf32>
    %cst_188 = arith.constant 1.000000e+00 : f32
    %362 = vector.broadcast %cst_188 : f32 to vector<8x32xf32>
    %363 = arith.addf %362, %361 : vector<8x32xf32>
    %364 = arith.divf %362, %363 : vector<8x32xf32>
    %365 = vector.extract_strided_slice %352 {offsets = [0, 64], sizes = [8, 32], strides = [1, 1]} : vector<8x128xf32> to vector<8x32xf32>
    %366 = math.tanh %365 : vector<8x32xf32>
    %367 = vector.extract_strided_slice %352 {offsets = [0, 96], sizes = [8, 32], strides = [1, 1]} : vector<8x128xf32> to vector<8x32xf32>
    %368 = arith.negf %367 : vector<8x32xf32>
    %369 = math.exp %368 : vector<8x32xf32>
    %cst_189 = arith.constant 1.000000e+00 : f32
    %370 = vector.broadcast %cst_189 : f32 to vector<8x32xf32>
    %371 = arith.addf %370, %369 : vector<8x32xf32>
    %372 = arith.divf %370, %371 : vector<8x32xf32>
    %373 = arith.mulf %364, %347 : vector<8x32xf32>
    %374 = arith.mulf %358, %366 : vector<8x32xf32>
    %375 = arith.addf %373, %374 : vector<8x32xf32>
    %376 = math.tanh %375 : vector<8x32xf32>
    %377 = arith.mulf %372, %376 : vector<8x32xf32>
    %c0_190 = arith.constant 0 : index
    %c0_191 = arith.constant 0 : index
    %378 = vector.load %arg17[%c0_190, %c0_191] : memref<8x32xf32, #tpu.memory_space<vmem>>, vector<8x32xf32>
    tpu.vector_store %arg17[%c0_190, %c0_191], %377 {strides = array<i32>} : memref<8x32xf32, #tpu.memory_space<vmem>>, vector<8x32xf32>,
    %c0_192 = arith.constant 0 : index
    %c0_193 = arith.constant 0 : index
    %379 = vector.load %arg18[%c0_192, %c0_193] : memref<8x32xf32, #tpu.memory_space<vmem>>, vector<8x32xf32>
    tpu.vector_store %arg18[%c0_192, %c0_193], %375 {strides = array<i32>} : memref<8x32xf32, #tpu.memory_space<vmem>>, vector<8x32xf32>,
    %380 = arith.index_cast %c0_i32_179 : i32 to index
    %c0_194 = arith.constant 0 : index
    %c0_195 = arith.constant 0 : index
    %381 = vector.load %arg16[%380, %c0_194, %c0_195] : memref<8x8x32xf32, #tpu.memory_space<vmem>>, vector<1x8x32xf32>
    %382 = vector.shape_cast %381 : vector<1x8x32xf32> to vector<8x32xf32>
    %383 = vector.shape_cast %377 : vector<8x32xf32> to vector<1x8x32xf32>
    tpu.vector_store %arg16[%380, %c0_194, %c0_195], %383 {strides = array<i32>} : memref<8x8x32xf32, #tpu.memory_space<vmem>>, vector<1x8x32xf32>,
    %c1_i32_196 = arith.constant 1 : i32
    %c0_197 = arith.constant 0 : index
    %c0_198 = arith.constant 0 : index
    %384 = vector.load %arg17[%c0_197, %c0_198] : memref<8x32xf32, #tpu.memory_space<vmem>>, vector<8x32xf32>
    %c0_199 = arith.constant 0 : index
    %c0_200 = arith.constant 0 : index
    %385 = vector.load %arg18[%c0_199, %c0_200] : memref<8x32xf32, #tpu.memory_space<vmem>>, vector<8x32xf32>
    %386 = arith.index_cast %c1_i32_196 : i32 to index
    %c0_201 = arith.constant 0 : index
    %c0_202 = arith.constant 0 : index
    %387 = vector.load %arg15[%386, %c0_201, %c0_202] : memref<8x8x128xf32, #tpu.memory_space<vmem>>, vector<1x8x128xf32>
    %388 = vector.shape_cast %387 : vector<1x8x128xf32> to vector<8x128xf32>
    %cst_203 = arith.constant dense<0.000000e+00> : vector<8x128xf32>
    %389 = tpu.matmul %384, %341, %cst_203 {dimension_numbers = #tpu.dot_dimension_numbers<[1], [0], [0], [1], [0, 0, 1, 1], [], []>, precision = #tpu.contract_precision<fp32>} : vector<8x32xf32>, vector<32x128xf32>, vector<8x128xf32> -> vector<8x128xf32>
    %390 = arith.addf %388, %389 : vector<8x128xf32>
    %391 = vector.extract_strided_slice %390 {offsets = [0, 0], sizes = [8, 32], strides = [1, 1]} : vector<8x128xf32> to vector<8x32xf32>
    %392 = arith.negf %391 : vector<8x32xf32>
    %393 = math.exp %392 : vector<8x32xf32>
    %cst_204 = arith.constant 1.000000e+00 : f32
    %394 = vector.broadcast %cst_204 : f32 to vector<8x32xf32>
    %395 = arith.addf %394, %393 : vector<8x32xf32>
    %396 = arith.divf %394, %395 : vector<8x32xf32>
    %397 = vector.extract_strided_slice %390 {offsets = [0, 32], sizes = [8, 32], strides = [1, 1]} : vector<8x128xf32> to vector<8x32xf32>
    %398 = arith.negf %397 : vector<8x32xf32>
    %399 = math.exp %398 : vector<8x32xf32>
    %cst_205 = arith.constant 1.000000e+00 : f32
    %400 = vector.broadcast %cst_205 : f32 to vector<8x32xf32>
    %401 = arith.addf %400, %399 : vector<8x32xf32>
    %402 = arith.divf %400, %401 : vector<8x32xf32>
    %403 = vector.extract_strided_slice %390 {offsets = [0, 64], sizes = [8, 32], strides = [1, 1]} : vector<8x128xf32> to vector<8x32xf32>
    %404 = math.tanh %403 : vector<8x32xf32>
    %405 = vector.extract_strided_slice %390 {offsets = [0, 96], sizes = [8, 32], strides = [1, 1]} : vector<8x128xf32> to vector<8x32xf32>
    %406 = arith.negf %405 : vector<8x32xf32>
    %407 = math.exp %406 : vector<8x32xf32>
    %cst_206 = arith.constant 1.000000e+00 : f32
    %408 = vector.broadcast %cst_206 : f32 to vector<8x32xf32>
    %409 = arith.addf %408, %407 : vector<8x32xf32>
    %410 = arith.divf %408, %409 : vector<8x32xf32>
    %411 = arith.mulf %402, %385 : vector<8x32xf32>
    %412 = arith.mulf %396, %404 : vector<8x32xf32>
    %413 = arith.addf %411, %412 : vector<8x32xf32>
    %414 = math.tanh %413 : vector<8x32xf32>
    %415 = arith.mulf %410, %414 : vector<8x32xf32>
    %c0_207 = arith.constant 0 : index
    %c0_208 = arith.constant 0 : index
    %416 = vector.load %arg17[%c0_207, %c0_208] : memref<8x32xf32, #tpu.memory_space<vmem>>, vector<8x32xf32>
    tpu.vector_store %arg17[%c0_207, %c0_208], %415 {strides = array<i32>} : memref<8x32xf32, #tpu.memory_space<vmem>>, vector<8x32xf32>,
    %c0_209 = arith.constant 0 : index
    %c0_210 = arith.constant 0 : index
    %417 = vector.load %arg18[%c0_209, %c0_210] : memref<8x32xf32, #tpu.memory_space<vmem>>, vector<8x32xf32>
    tpu.vector_store %arg18[%c0_209, %c0_210], %413 {strides = array<i32>} : memref<8x32xf32, #tpu.memory_space<vmem>>, vector<8x32xf32>,
    %418 = arith.index_cast %c1_i32_196 : i32 to index
    %c0_211 = arith.constant 0 : index
    %c0_212 = arith.constant 0 : index
    %419 = vector.load %arg16[%418, %c0_211, %c0_212] : memref<8x8x32xf32, #tpu.memory_space<vmem>>, vector<1x8x32xf32>
    %420 = vector.shape_cast %419 : vector<1x8x32xf32> to vector<8x32xf32>
    %421 = vector.shape_cast %415 : vector<8x32xf32> to vector<1x8x32xf32>
    tpu.vector_store %arg16[%418, %c0_211, %c0_212], %421 {strides = array<i32>} : memref<8x8x32xf32, #tpu.memory_space<vmem>>, vector<1x8x32xf32>,
    %c2_i32_213 = arith.constant 2 : i32
    %c0_214 = arith.constant 0 : index
    %c0_215 = arith.constant 0 : index
    %422 = vector.load %arg17[%c0_214, %c0_215] : memref<8x32xf32, #tpu.memory_space<vmem>>, vector<8x32xf32>
    %c0_216 = arith.constant 0 : index
    %c0_217 = arith.constant 0 : index
    %423 = vector.load %arg18[%c0_216, %c0_217] : memref<8x32xf32, #tpu.memory_space<vmem>>, vector<8x32xf32>
    %424 = arith.index_cast %c2_i32_213 : i32 to index
    %c0_218 = arith.constant 0 : index
    %c0_219 = arith.constant 0 : index
    %425 = vector.load %arg15[%424, %c0_218, %c0_219] : memref<8x8x128xf32, #tpu.memory_space<vmem>>, vector<1x8x128xf32>
    %426 = vector.shape_cast %425 : vector<1x8x128xf32> to vector<8x128xf32>
    %cst_220 = arith.constant dense<0.000000e+00> : vector<8x128xf32>
    %427 = tpu.matmul %422, %341, %cst_220 {dimension_numbers = #tpu.dot_dimension_numbers<[1], [0], [0], [1], [0, 0, 1, 1], [], []>, precision = #tpu.contract_precision<fp32>} : vector<8x32xf32>, vector<32x128xf32>, vector<8x128xf32> -> vector<8x128xf32>
    %428 = arith.addf %426, %427 : vector<8x128xf32>
    %429 = vector.extract_strided_slice %428 {offsets = [0, 0], sizes = [8, 32], strides = [1, 1]} : vector<8x128xf32> to vector<8x32xf32>
    %430 = arith.negf %429 : vector<8x32xf32>
    %431 = math.exp %430 : vector<8x32xf32>
    %cst_221 = arith.constant 1.000000e+00 : f32
    %432 = vector.broadcast %cst_221 : f32 to vector<8x32xf32>
    %433 = arith.addf %432, %431 : vector<8x32xf32>
    %434 = arith.divf %432, %433 : vector<8x32xf32>
    %435 = vector.extract_strided_slice %428 {offsets = [0, 32], sizes = [8, 32], strides = [1, 1]} : vector<8x128xf32> to vector<8x32xf32>
    %436 = arith.negf %435 : vector<8x32xf32>
    %437 = math.exp %436 : vector<8x32xf32>
    %cst_222 = arith.constant 1.000000e+00 : f32
    %438 = vector.broadcast %cst_222 : f32 to vector<8x32xf32>
    %439 = arith.addf %438, %437 : vector<8x32xf32>
    %440 = arith.divf %438, %439 : vector<8x32xf32>
    %441 = vector.extract_strided_slice %428 {offsets = [0, 64], sizes = [8, 32], strides = [1, 1]} : vector<8x128xf32> to vector<8x32xf32>
    %442 = math.tanh %441 : vector<8x32xf32>
    %443 = vector.extract_strided_slice %428 {offsets = [0, 96], sizes = [8, 32], strides = [1, 1]} : vector<8x128xf32> to vector<8x32xf32>
    %444 = arith.negf %443 : vector<8x32xf32>
    %445 = math.exp %444 : vector<8x32xf32>
    %cst_223 = arith.constant 1.000000e+00 : f32
    %446 = vector.broadcast %cst_223 : f32 to vector<8x32xf32>
    %447 = arith.addf %446, %445 : vector<8x32xf32>
    %448 = arith.divf %446, %447 : vector<8x32xf32>
    %449 = arith.mulf %440, %423 : vector<8x32xf32>
    %450 = arith.mulf %434, %442 : vector<8x32xf32>
    %451 = arith.addf %449, %450 : vector<8x32xf32>
    %452 = math.tanh %451 : vector<8x32xf32>
    %453 = arith.mulf %448, %452 : vector<8x32xf32>
    %c0_224 = arith.constant 0 : index
    %c0_225 = arith.constant 0 : index
    %454 = vector.load %arg17[%c0_224, %c0_225] : memref<8x32xf32, #tpu.memory_space<vmem>>, vector<8x32xf32>
    tpu.vector_store %arg17[%c0_224, %c0_225], %453 {strides = array<i32>} : memref<8x32xf32, #tpu.memory_space<vmem>>, vector<8x32xf32>,
    %c0_226 = arith.constant 0 : index
    %c0_227 = arith.constant 0 : index
    %455 = vector.load %arg18[%c0_226, %c0_227] : memref<8x32xf32, #tpu.memory_space<vmem>>, vector<8x32xf32>
    tpu.vector_store %arg18[%c0_226, %c0_227], %451 {strides = array<i32>} : memref<8x32xf32, #tpu.memory_space<vmem>>, vector<8x32xf32>,
    %456 = arith.index_cast %c2_i32_213 : i32 to index
    %c0_228 = arith.constant 0 : index
    %c0_229 = arith.constant 0 : index
    %457 = vector.load %arg16[%456, %c0_228, %c0_229] : memref<8x8x32xf32, #tpu.memory_space<vmem>>, vector<1x8x32xf32>
    %458 = vector.shape_cast %457 : vector<1x8x32xf32> to vector<8x32xf32>
    %459 = vector.shape_cast %453 : vector<8x32xf32> to vector<1x8x32xf32>
    tpu.vector_store %arg16[%456, %c0_228, %c0_229], %459 {strides = array<i32>} : memref<8x8x32xf32, #tpu.memory_space<vmem>>, vector<1x8x32xf32>,
    %c3_i32_230 = arith.constant 3 : i32
    %c0_231 = arith.constant 0 : index
    %c0_232 = arith.constant 0 : index
    %460 = vector.load %arg17[%c0_231, %c0_232] : memref<8x32xf32, #tpu.memory_space<vmem>>, vector<8x32xf32>
    %c0_233 = arith.constant 0 : index
    %c0_234 = arith.constant 0 : index
    %461 = vector.load %arg18[%c0_233, %c0_234] : memref<8x32xf32, #tpu.memory_space<vmem>>, vector<8x32xf32>
    %462 = arith.index_cast %c3_i32_230 : i32 to index
    %c0_235 = arith.constant 0 : index
    %c0_236 = arith.constant 0 : index
    %463 = vector.load %arg15[%462, %c0_235, %c0_236] : memref<8x8x128xf32, #tpu.memory_space<vmem>>, vector<1x8x128xf32>
    %464 = vector.shape_cast %463 : vector<1x8x128xf32> to vector<8x128xf32>
    %cst_237 = arith.constant dense<0.000000e+00> : vector<8x128xf32>
    %465 = tpu.matmul %460, %341, %cst_237 {dimension_numbers = #tpu.dot_dimension_numbers<[1], [0], [0], [1], [0, 0, 1, 1], [], []>, precision = #tpu.contract_precision<fp32>} : vector<8x32xf32>, vector<32x128xf32>, vector<8x128xf32> -> vector<8x128xf32>
    %466 = arith.addf %464, %465 : vector<8x128xf32>
    %467 = vector.extract_strided_slice %466 {offsets = [0, 0], sizes = [8, 32], strides = [1, 1]} : vector<8x128xf32> to vector<8x32xf32>
    %468 = arith.negf %467 : vector<8x32xf32>
    %469 = math.exp %468 : vector<8x32xf32>
    %cst_238 = arith.constant 1.000000e+00 : f32
    %470 = vector.broadcast %cst_238 : f32 to vector<8x32xf32>
    %471 = arith.addf %470, %469 : vector<8x32xf32>
    %472 = arith.divf %470, %471 : vector<8x32xf32>
    %473 = vector.extract_strided_slice %466 {offsets = [0, 32], sizes = [8, 32], strides = [1, 1]} : vector<8x128xf32> to vector<8x32xf32>
    %474 = arith.negf %473 : vector<8x32xf32>
    %475 = math.exp %474 : vector<8x32xf32>
    %cst_239 = arith.constant 1.000000e+00 : f32
    %476 = vector.broadcast %cst_239 : f32 to vector<8x32xf32>
    %477 = arith.addf %476, %475 : vector<8x32xf32>
    %478 = arith.divf %476, %477 : vector<8x32xf32>
    %479 = vector.extract_strided_slice %466 {offsets = [0, 64], sizes = [8, 32], strides = [1, 1]} : vector<8x128xf32> to vector<8x32xf32>
    %480 = math.tanh %479 : vector<8x32xf32>
    %481 = vector.extract_strided_slice %466 {offsets = [0, 96], sizes = [8, 32], strides = [1, 1]} : vector<8x128xf32> to vector<8x32xf32>
    %482 = arith.negf %481 : vector<8x32xf32>
    %483 = math.exp %482 : vector<8x32xf32>
    %cst_240 = arith.constant 1.000000e+00 : f32
    %484 = vector.broadcast %cst_240 : f32 to vector<8x32xf32>
    %485 = arith.addf %484, %483 : vector<8x32xf32>
    %486 = arith.divf %484, %485 : vector<8x32xf32>
    %487 = arith.mulf %478, %461 : vector<8x32xf32>
    %488 = arith.mulf %472, %480 : vector<8x32xf32>
    %489 = arith.addf %487, %488 : vector<8x32xf32>
    %490 = math.tanh %489 : vector<8x32xf32>
    %491 = arith.mulf %486, %490 : vector<8x32xf32>
    %c0_241 = arith.constant 0 : index
    %c0_242 = arith.constant 0 : index
    %492 = vector.load %arg17[%c0_241, %c0_242] : memref<8x32xf32, #tpu.memory_space<vmem>>, vector<8x32xf32>
    tpu.vector_store %arg17[%c0_241, %c0_242], %491 {strides = array<i32>} : memref<8x32xf32, #tpu.memory_space<vmem>>, vector<8x32xf32>,
    %c0_243 = arith.constant 0 : index
    %c0_244 = arith.constant 0 : index
    %493 = vector.load %arg18[%c0_243, %c0_244] : memref<8x32xf32, #tpu.memory_space<vmem>>, vector<8x32xf32>
    tpu.vector_store %arg18[%c0_243, %c0_244], %489 {strides = array<i32>} : memref<8x32xf32, #tpu.memory_space<vmem>>, vector<8x32xf32>,
    %494 = arith.index_cast %c3_i32_230 : i32 to index
    %c0_245 = arith.constant 0 : index
    %c0_246 = arith.constant 0 : index
    %495 = vector.load %arg16[%494, %c0_245, %c0_246] : memref<8x8x32xf32, #tpu.memory_space<vmem>>, vector<1x8x32xf32>
    %496 = vector.shape_cast %495 : vector<1x8x32xf32> to vector<8x32xf32>
    %497 = vector.shape_cast %491 : vector<8x32xf32> to vector<1x8x32xf32>
    tpu.vector_store %arg16[%494, %c0_245, %c0_246], %497 {strides = array<i32>} : memref<8x8x32xf32, #tpu.memory_space<vmem>>, vector<1x8x32xf32>,
    %c4_i32_247 = arith.constant 4 : i32
    %c0_248 = arith.constant 0 : index
    %c0_249 = arith.constant 0 : index
    %498 = vector.load %arg17[%c0_248, %c0_249] : memref<8x32xf32, #tpu.memory_space<vmem>>, vector<8x32xf32>
    %c0_250 = arith.constant 0 : index
    %c0_251 = arith.constant 0 : index
    %499 = vector.load %arg18[%c0_250, %c0_251] : memref<8x32xf32, #tpu.memory_space<vmem>>, vector<8x32xf32>
    %500 = arith.index_cast %c4_i32_247 : i32 to index
    %c0_252 = arith.constant 0 : index
    %c0_253 = arith.constant 0 : index
    %501 = vector.load %arg15[%500, %c0_252, %c0_253] : memref<8x8x128xf32, #tpu.memory_space<vmem>>, vector<1x8x128xf32>
    %502 = vector.shape_cast %501 : vector<1x8x128xf32> to vector<8x128xf32>
    %cst_254 = arith.constant dense<0.000000e+00> : vector<8x128xf32>
    %503 = tpu.matmul %498, %341, %cst_254 {dimension_numbers = #tpu.dot_dimension_numbers<[1], [0], [0], [1], [0, 0, 1, 1], [], []>, precision = #tpu.contract_precision<fp32>} : vector<8x32xf32>, vector<32x128xf32>, vector<8x128xf32> -> vector<8x128xf32>
    %504 = arith.addf %502, %503 : vector<8x128xf32>
    %505 = vector.extract_strided_slice %504 {offsets = [0, 0], sizes = [8, 32], strides = [1, 1]} : vector<8x128xf32> to vector<8x32xf32>
    %506 = arith.negf %505 : vector<8x32xf32>
    %507 = math.exp %506 : vector<8x32xf32>
    %cst_255 = arith.constant 1.000000e+00 : f32
    %508 = vector.broadcast %cst_255 : f32 to vector<8x32xf32>
    %509 = arith.addf %508, %507 : vector<8x32xf32>
    %510 = arith.divf %508, %509 : vector<8x32xf32>
    %511 = vector.extract_strided_slice %504 {offsets = [0, 32], sizes = [8, 32], strides = [1, 1]} : vector<8x128xf32> to vector<8x32xf32>
    %512 = arith.negf %511 : vector<8x32xf32>
    %513 = math.exp %512 : vector<8x32xf32>
    %cst_256 = arith.constant 1.000000e+00 : f32
    %514 = vector.broadcast %cst_256 : f32 to vector<8x32xf32>
    %515 = arith.addf %514, %513 : vector<8x32xf32>
    %516 = arith.divf %514, %515 : vector<8x32xf32>
    %517 = vector.extract_strided_slice %504 {offsets = [0, 64], sizes = [8, 32], strides = [1, 1]} : vector<8x128xf32> to vector<8x32xf32>
    %518 = math.tanh %517 : vector<8x32xf32>
    %519 = vector.extract_strided_slice %504 {offsets = [0, 96], sizes = [8, 32], strides = [1, 1]} : vector<8x128xf32> to vector<8x32xf32>
    %520 = arith.negf %519 : vector<8x32xf32>
    %521 = math.exp %520 : vector<8x32xf32>
    %cst_257 = arith.constant 1.000000e+00 : f32
    %522 = vector.broadcast %cst_257 : f32 to vector<8x32xf32>
    %523 = arith.addf %522, %521 : vector<8x32xf32>
    %524 = arith.divf %522, %523 : vector<8x32xf32>
    %525 = arith.mulf %516, %499 : vector<8x32xf32>
    %526 = arith.mulf %510, %518 : vector<8x32xf32>
    %527 = arith.addf %525, %526 : vector<8x32xf32>
    %528 = math.tanh %527 : vector<8x32xf32>
    %529 = arith.mulf %524, %528 : vector<8x32xf32>
    %c0_258 = arith.constant 0 : index
    %c0_259 = arith.constant 0 : index
    %530 = vector.load %arg17[%c0_258, %c0_259] : memref<8x32xf32, #tpu.memory_space<vmem>>, vector<8x32xf32>
    tpu.vector_store %arg17[%c0_258, %c0_259], %529 {strides = array<i32>} : memref<8x32xf32, #tpu.memory_space<vmem>>, vector<8x32xf32>,
    %c0_260 = arith.constant 0 : index
    %c0_261 = arith.constant 0 : index
    %531 = vector.load %arg18[%c0_260, %c0_261] : memref<8x32xf32, #tpu.memory_space<vmem>>, vector<8x32xf32>
    tpu.vector_store %arg18[%c0_260, %c0_261], %527 {strides = array<i32>} : memref<8x32xf32, #tpu.memory_space<vmem>>, vector<8x32xf32>,
    %532 = arith.index_cast %c4_i32_247 : i32 to index
    %c0_262 = arith.constant 0 : index
    %c0_263 = arith.constant 0 : index
    %533 = vector.load %arg16[%532, %c0_262, %c0_263] : memref<8x8x32xf32, #tpu.memory_space<vmem>>, vector<1x8x32xf32>
    %534 = vector.shape_cast %533 : vector<1x8x32xf32> to vector<8x32xf32>
    %535 = vector.shape_cast %529 : vector<8x32xf32> to vector<1x8x32xf32>
    tpu.vector_store %arg16[%532, %c0_262, %c0_263], %535 {strides = array<i32>} : memref<8x8x32xf32, #tpu.memory_space<vmem>>, vector<1x8x32xf32>,
    %c5_i32_264 = arith.constant 5 : i32
    %c0_265 = arith.constant 0 : index
    %c0_266 = arith.constant 0 : index
    %536 = vector.load %arg17[%c0_265, %c0_266] : memref<8x32xf32, #tpu.memory_space<vmem>>, vector<8x32xf32>
    %c0_267 = arith.constant 0 : index
    %c0_268 = arith.constant 0 : index
    %537 = vector.load %arg18[%c0_267, %c0_268] : memref<8x32xf32, #tpu.memory_space<vmem>>, vector<8x32xf32>
    %538 = arith.index_cast %c5_i32_264 : i32 to index
    %c0_269 = arith.constant 0 : index
    %c0_270 = arith.constant 0 : index
    %539 = vector.load %arg15[%538, %c0_269, %c0_270] : memref<8x8x128xf32, #tpu.memory_space<vmem>>, vector<1x8x128xf32>
    %540 = vector.shape_cast %539 : vector<1x8x128xf32> to vector<8x128xf32>
    %cst_271 = arith.constant dense<0.000000e+00> : vector<8x128xf32>
    %541 = tpu.matmul %536, %341, %cst_271 {dimension_numbers = #tpu.dot_dimension_numbers<[1], [0], [0], [1], [0, 0, 1, 1], [], []>, precision = #tpu.contract_precision<fp32>} : vector<8x32xf32>, vector<32x128xf32>, vector<8x128xf32> -> vector<8x128xf32>
    %542 = arith.addf %540, %541 : vector<8x128xf32>
    %543 = vector.extract_strided_slice %542 {offsets = [0, 0], sizes = [8, 32], strides = [1, 1]} : vector<8x128xf32> to vector<8x32xf32>
    %544 = arith.negf %543 : vector<8x32xf32>
    %545 = math.exp %544 : vector<8x32xf32>
    %cst_272 = arith.constant 1.000000e+00 : f32
    %546 = vector.broadcast %cst_272 : f32 to vector<8x32xf32>
    %547 = arith.addf %546, %545 : vector<8x32xf32>
    %548 = arith.divf %546, %547 : vector<8x32xf32>
    %549 = vector.extract_strided_slice %542 {offsets = [0, 32], sizes = [8, 32], strides = [1, 1]} : vector<8x128xf32> to vector<8x32xf32>
    %550 = arith.negf %549 : vector<8x32xf32>
    %551 = math.exp %550 : vector<8x32xf32>
    %cst_273 = arith.constant 1.000000e+00 : f32
    %552 = vector.broadcast %cst_273 : f32 to vector<8x32xf32>
    %553 = arith.addf %552, %551 : vector<8x32xf32>
    %554 = arith.divf %552, %553 : vector<8x32xf32>
    %555 = vector.extract_strided_slice %542 {offsets = [0, 64], sizes = [8, 32], strides = [1, 1]} : vector<8x128xf32> to vector<8x32xf32>
    %556 = math.tanh %555 : vector<8x32xf32>
    %557 = vector.extract_strided_slice %542 {offsets = [0, 96], sizes = [8, 32], strides = [1, 1]} : vector<8x128xf32> to vector<8x32xf32>
    %558 = arith.negf %557 : vector<8x32xf32>
    %559 = math.exp %558 : vector<8x32xf32>
    %cst_274 = arith.constant 1.000000e+00 : f32
    %560 = vector.broadcast %cst_274 : f32 to vector<8x32xf32>
    %561 = arith.addf %560, %559 : vector<8x32xf32>
    %562 = arith.divf %560, %561 : vector<8x32xf32>
    %563 = arith.mulf %554, %537 : vector<8x32xf32>
    %564 = arith.mulf %548, %556 : vector<8x32xf32>
    %565 = arith.addf %563, %564 : vector<8x32xf32>
    %566 = math.tanh %565 : vector<8x32xf32>
    %567 = arith.mulf %562, %566 : vector<8x32xf32>
    %c0_275 = arith.constant 0 : index
    %c0_276 = arith.constant 0 : index
    %568 = vector.load %arg17[%c0_275, %c0_276] : memref<8x32xf32, #tpu.memory_space<vmem>>, vector<8x32xf32>
    tpu.vector_store %arg17[%c0_275, %c0_276], %567 {strides = array<i32>} : memref<8x32xf32, #tpu.memory_space<vmem>>, vector<8x32xf32>,
    %c0_277 = arith.constant 0 : index
    %c0_278 = arith.constant 0 : index
    %569 = vector.load %arg18[%c0_277, %c0_278] : memref<8x32xf32, #tpu.memory_space<vmem>>, vector<8x32xf32>
    tpu.vector_store %arg18[%c0_277, %c0_278], %565 {strides = array<i32>} : memref<8x32xf32, #tpu.memory_space<vmem>>, vector<8x32xf32>,
    %570 = arith.index_cast %c5_i32_264 : i32 to index
    %c0_279 = arith.constant 0 : index
    %c0_280 = arith.constant 0 : index
    %571 = vector.load %arg16[%570, %c0_279, %c0_280] : memref<8x8x32xf32, #tpu.memory_space<vmem>>, vector<1x8x32xf32>
    %572 = vector.shape_cast %571 : vector<1x8x32xf32> to vector<8x32xf32>
    %573 = vector.shape_cast %567 : vector<8x32xf32> to vector<1x8x32xf32>
    tpu.vector_store %arg16[%570, %c0_279, %c0_280], %573 {strides = array<i32>} : memref<8x8x32xf32, #tpu.memory_space<vmem>>, vector<1x8x32xf32>,
    %c6_i32_281 = arith.constant 6 : i32
    %c0_282 = arith.constant 0 : index
    %c0_283 = arith.constant 0 : index
    %574 = vector.load %arg17[%c0_282, %c0_283] : memref<8x32xf32, #tpu.memory_space<vmem>>, vector<8x32xf32>
    %c0_284 = arith.constant 0 : index
    %c0_285 = arith.constant 0 : index
    %575 = vector.load %arg18[%c0_284, %c0_285] : memref<8x32xf32, #tpu.memory_space<vmem>>, vector<8x32xf32>
    %576 = arith.index_cast %c6_i32_281 : i32 to index
    %c0_286 = arith.constant 0 : index
    %c0_287 = arith.constant 0 : index
    %577 = vector.load %arg15[%576, %c0_286, %c0_287] : memref<8x8x128xf32, #tpu.memory_space<vmem>>, vector<1x8x128xf32>
    %578 = vector.shape_cast %577 : vector<1x8x128xf32> to vector<8x128xf32>
    %cst_288 = arith.constant dense<0.000000e+00> : vector<8x128xf32>
    %579 = tpu.matmul %574, %341, %cst_288 {dimension_numbers = #tpu.dot_dimension_numbers<[1], [0], [0], [1], [0, 0, 1, 1], [], []>, precision = #tpu.contract_precision<fp32>} : vector<8x32xf32>, vector<32x128xf32>, vector<8x128xf32> -> vector<8x128xf32>
    %580 = arith.addf %578, %579 : vector<8x128xf32>
    %581 = vector.extract_strided_slice %580 {offsets = [0, 0], sizes = [8, 32], strides = [1, 1]} : vector<8x128xf32> to vector<8x32xf32>
    %582 = arith.negf %581 : vector<8x32xf32>
    %583 = math.exp %582 : vector<8x32xf32>
    %cst_289 = arith.constant 1.000000e+00 : f32
    %584 = vector.broadcast %cst_289 : f32 to vector<8x32xf32>
    %585 = arith.addf %584, %583 : vector<8x32xf32>
    %586 = arith.divf %584, %585 : vector<8x32xf32>
    %587 = vector.extract_strided_slice %580 {offsets = [0, 32], sizes = [8, 32], strides = [1, 1]} : vector<8x128xf32> to vector<8x32xf32>
    %588 = arith.negf %587 : vector<8x32xf32>
    %589 = math.exp %588 : vector<8x32xf32>
    %cst_290 = arith.constant 1.000000e+00 : f32
    %590 = vector.broadcast %cst_290 : f32 to vector<8x32xf32>
    %591 = arith.addf %590, %589 : vector<8x32xf32>
    %592 = arith.divf %590, %591 : vector<8x32xf32>
    %593 = vector.extract_strided_slice %580 {offsets = [0, 64], sizes = [8, 32], strides = [1, 1]} : vector<8x128xf32> to vector<8x32xf32>
    %594 = math.tanh %593 : vector<8x32xf32>
    %595 = vector.extract_strided_slice %580 {offsets = [0, 96], sizes = [8, 32], strides = [1, 1]} : vector<8x128xf32> to vector<8x32xf32>
    %596 = arith.negf %595 : vector<8x32xf32>
    %597 = math.exp %596 : vector<8x32xf32>
    %cst_291 = arith.constant 1.000000e+00 : f32
    %598 = vector.broadcast %cst_291 : f32 to vector<8x32xf32>
    %599 = arith.addf %598, %597 : vector<8x32xf32>
    %600 = arith.divf %598, %599 : vector<8x32xf32>
    %601 = arith.mulf %592, %575 : vector<8x32xf32>
    %602 = arith.mulf %586, %594 : vector<8x32xf32>
    %603 = arith.addf %601, %602 : vector<8x32xf32>
    %604 = math.tanh %603 : vector<8x32xf32>
    %605 = arith.mulf %600, %604 : vector<8x32xf32>
    %c0_292 = arith.constant 0 : index
    %c0_293 = arith.constant 0 : index
    %606 = vector.load %arg17[%c0_292, %c0_293] : memref<8x32xf32, #tpu.memory_space<vmem>>, vector<8x32xf32>
    tpu.vector_store %arg17[%c0_292, %c0_293], %605 {strides = array<i32>} : memref<8x32xf32, #tpu.memory_space<vmem>>, vector<8x32xf32>,
    %c0_294 = arith.constant 0 : index
    %c0_295 = arith.constant 0 : index
    %607 = vector.load %arg18[%c0_294, %c0_295] : memref<8x32xf32, #tpu.memory_space<vmem>>, vector<8x32xf32>
    tpu.vector_store %arg18[%c0_294, %c0_295], %603 {strides = array<i32>} : memref<8x32xf32, #tpu.memory_space<vmem>>, vector<8x32xf32>,
    %608 = arith.index_cast %c6_i32_281 : i32 to index
    %c0_296 = arith.constant 0 : index
    %c0_297 = arith.constant 0 : index
    %609 = vector.load %arg16[%608, %c0_296, %c0_297] : memref<8x8x32xf32, #tpu.memory_space<vmem>>, vector<1x8x32xf32>
    %610 = vector.shape_cast %609 : vector<1x8x32xf32> to vector<8x32xf32>
    %611 = vector.shape_cast %605 : vector<8x32xf32> to vector<1x8x32xf32>
    tpu.vector_store %arg16[%608, %c0_296, %c0_297], %611 {strides = array<i32>} : memref<8x8x32xf32, #tpu.memory_space<vmem>>, vector<1x8x32xf32>,
    %c7_i32_298 = arith.constant 7 : i32
    %c0_299 = arith.constant 0 : index
    %c0_300 = arith.constant 0 : index
    %612 = vector.load %arg17[%c0_299, %c0_300] : memref<8x32xf32, #tpu.memory_space<vmem>>, vector<8x32xf32>
    %c0_301 = arith.constant 0 : index
    %c0_302 = arith.constant 0 : index
    %613 = vector.load %arg18[%c0_301, %c0_302] : memref<8x32xf32, #tpu.memory_space<vmem>>, vector<8x32xf32>
    %614 = arith.index_cast %c7_i32_298 : i32 to index
    %c0_303 = arith.constant 0 : index
    %c0_304 = arith.constant 0 : index
    %615 = vector.load %arg15[%614, %c0_303, %c0_304] : memref<8x8x128xf32, #tpu.memory_space<vmem>>, vector<1x8x128xf32>
    %616 = vector.shape_cast %615 : vector<1x8x128xf32> to vector<8x128xf32>
    %cst_305 = arith.constant dense<0.000000e+00> : vector<8x128xf32>
    %617 = tpu.matmul %612, %341, %cst_305 {dimension_numbers = #tpu.dot_dimension_numbers<[1], [0], [0], [1], [0, 0, 1, 1], [], []>, precision = #tpu.contract_precision<fp32>} : vector<8x32xf32>, vector<32x128xf32>, vector<8x128xf32> -> vector<8x128xf32>
    %618 = arith.addf %616, %617 : vector<8x128xf32>
    %619 = vector.extract_strided_slice %618 {offsets = [0, 0], sizes = [8, 32], strides = [1, 1]} : vector<8x128xf32> to vector<8x32xf32>
    %620 = arith.negf %619 : vector<8x32xf32>
    %621 = math.exp %620 : vector<8x32xf32>
    %cst_306 = arith.constant 1.000000e+00 : f32
    %622 = vector.broadcast %cst_306 : f32 to vector<8x32xf32>
    %623 = arith.addf %622, %621 : vector<8x32xf32>
    %624 = arith.divf %622, %623 : vector<8x32xf32>
    %625 = vector.extract_strided_slice %618 {offsets = [0, 32], sizes = [8, 32], strides = [1, 1]} : vector<8x128xf32> to vector<8x32xf32>
    %626 = arith.negf %625 : vector<8x32xf32>
    %627 = math.exp %626 : vector<8x32xf32>
    %cst_307 = arith.constant 1.000000e+00 : f32
    %628 = vector.broadcast %cst_307 : f32 to vector<8x32xf32>
    %629 = arith.addf %628, %627 : vector<8x32xf32>
    %630 = arith.divf %628, %629 : vector<8x32xf32>
    %631 = vector.extract_strided_slice %618 {offsets = [0, 64], sizes = [8, 32], strides = [1, 1]} : vector<8x128xf32> to vector<8x32xf32>
    %632 = math.tanh %631 : vector<8x32xf32>
    %633 = vector.extract_strided_slice %618 {offsets = [0, 96], sizes = [8, 32], strides = [1, 1]} : vector<8x128xf32> to vector<8x32xf32>
    %634 = arith.negf %633 : vector<8x32xf32>
    %635 = math.exp %634 : vector<8x32xf32>
    %cst_308 = arith.constant 1.000000e+00 : f32
    %636 = vector.broadcast %cst_308 : f32 to vector<8x32xf32>
    %637 = arith.addf %636, %635 : vector<8x32xf32>
    %638 = arith.divf %636, %637 : vector<8x32xf32>
    %639 = arith.mulf %630, %613 : vector<8x32xf32>
    %640 = arith.mulf %624, %632 : vector<8x32xf32>
    %641 = arith.addf %639, %640 : vector<8x32xf32>
    %642 = math.tanh %641 : vector<8x32xf32>
    %643 = arith.mulf %638, %642 : vector<8x32xf32>
    %c0_309 = arith.constant 0 : index
    %c0_310 = arith.constant 0 : index
    %644 = vector.load %arg17[%c0_309, %c0_310] : memref<8x32xf32, #tpu.memory_space<vmem>>, vector<8x32xf32>
    tpu.vector_store %arg17[%c0_309, %c0_310], %643 {strides = array<i32>} : memref<8x32xf32, #tpu.memory_space<vmem>>, vector<8x32xf32>,
    %c0_311 = arith.constant 0 : index
    %c0_312 = arith.constant 0 : index
    %645 = vector.load %arg18[%c0_311, %c0_312] : memref<8x32xf32, #tpu.memory_space<vmem>>, vector<8x32xf32>
    tpu.vector_store %arg18[%c0_311, %c0_312], %641 {strides = array<i32>} : memref<8x32xf32, #tpu.memory_space<vmem>>, vector<8x32xf32>,
    %646 = arith.index_cast %c7_i32_298 : i32 to index
    %c0_313 = arith.constant 0 : index
    %c0_314 = arith.constant 0 : index
    %647 = vector.load %arg16[%646, %c0_313, %c0_314] : memref<8x8x32xf32, #tpu.memory_space<vmem>>, vector<1x8x32xf32>
    %648 = vector.shape_cast %647 : vector<1x8x32xf32> to vector<8x32xf32>
    %649 = vector.shape_cast %643 : vector<8x32xf32> to vector<1x8x32xf32>
    tpu.vector_store %arg16[%646, %c0_313, %c0_314], %649 {strides = array<i32>} : memref<8x8x32xf32, #tpu.memory_space<vmem>>, vector<1x8x32xf32>,
    %c8_i32_315 = arith.constant 8 : i32
    %c0_316 = arith.constant 0 : index
    %c0_317 = arith.constant 0 : index
    %650 = vector.load %arg17[%c0_316, %c0_317] : memref<8x32xf32, #tpu.memory_space<vmem>>, vector<8x32xf32>
    %c1 = arith.constant 1 : index
    %c0_318 = arith.constant 0 : index
    %c0_319 = arith.constant 0 : index
    %651 = vector.load %arg13[%c1, %c0_318, %c0_319] : memref<2x8x32xf32, #tpu.memory_space<vmem>>, vector<1x8x32xf32>
    %652 = vector.shape_cast %651 : vector<1x8x32xf32> to vector<8x32xf32>
    %653 = vector.shape_cast %650 : vector<8x32xf32> to vector<1x8x32xf32>
    tpu.vector_store %arg13[%c1, %c0_318, %c0_319], %653 {strides = array<i32>} : memref<2x8x32xf32, #tpu.memory_space<vmem>>, vector<1x8x32xf32>,
    %c0_320 = arith.constant 0 : index
    %c0_321 = arith.constant 0 : index
    %654 = vector.load %arg18[%c0_320, %c0_321] : memref<8x32xf32, #tpu.memory_space<vmem>>, vector<8x32xf32>
    %c1_322 = arith.constant 1 : index
    %c0_323 = arith.constant 0 : index
    %c0_324 = arith.constant 0 : index
    %655 = vector.load %arg14[%c1_322, %c0_323, %c0_324] : memref<2x8x32xf32, #tpu.memory_space<vmem>>, vector<1x8x32xf32>
    %656 = vector.shape_cast %655 : vector<1x8x32xf32> to vector<8x32xf32>
    %657 = vector.shape_cast %654 : vector<8x32xf32> to vector<1x8x32xf32>
    tpu.vector_store %arg14[%c1_322, %c0_323, %c0_324], %657 {strides = array<i32>} : memref<2x8x32xf32, #tpu.memory_space<vmem>>, vector<1x8x32xf32>,
    %c0_325 = arith.constant 0 : index
    %c0_326 = arith.constant 0 : index
    %c0_327 = arith.constant 0 : index
    %658 = vector.load %arg16[%c0_325, %c0_326, %c0_327] : memref<8x8x32xf32, #tpu.memory_space<vmem>>, vector<8x8x32xf32>
    %659 = vector.shape_cast %658 : vector<8x8x32xf32> to vector<64x32xf32>
    %c0_328 = arith.constant 0 : index
    %c0_329 = arith.constant 0 : index
    %660 = vector.load %arg10[%c0_328, %c0_329] : memref<32x32xf32, #tpu.memory_space<vmem>>, vector<32x32xf32>
    %cst_330 = arith.constant dense<0.000000e+00> : vector<64x32xf32>
    %661 = tpu.matmul %659, %660, %cst_330 {dimension_numbers = #tpu.dot_dimension_numbers<[1], [0], [0], [1], [0, 0, 1, 1], [], []>, precision = #tpu.contract_precision<fp32>} : vector<64x32xf32>, vector<32x32xf32>, vector<64x32xf32> -> vector<64x32xf32>
    %c0_331 = arith.constant 0 : index
    %c0_332 = arith.constant 0 : index
    %662 = vector.load %arg11[%c0_331, %c0_332] : memref<1x32xf32, #tpu.memory_space<vmem>>, vector<1x32xf32>
    %663 = vector.broadcast %662 : vector<1x32xf32> to vector<64x32xf32>
    %664 = arith.addf %661, %663 : vector<64x32xf32>
    %cst_333 = arith.constant 0.000000e+00 : f32
    %665 = vector.broadcast %cst_333 : f32 to vector<64x32xf32>
    %666 = arith.maximumf %664, %665 : vector<64x32xf32>
    %667 = vector.shape_cast %666 : vector<64x32xf32> to vector<8x8x32xf32>
    %c0_334 = arith.constant 0 : index
    %c0_335 = arith.constant 0 : index
    %c0_336 = arith.constant 0 : index
    %668 = vector.load %arg12[%c0_334, %c0_335, %c0_336] : memref<8x8x32xf32, #tpu.memory_space<vmem>>, vector<8x8x32xf32>
    tpu.vector_store %arg12[%c0_334, %c0_335, %c0_336], %667 {strides = array<i32>} : memref<8x8x32xf32, #tpu.memory_space<vmem>>, vector<8x8x32xf32>,
    return
  }
  func.func @transform_0(%arg0: i32) -> (i32, i32, i32) {
    %c0_i32 = arith.constant 0 : i32
    %c0_i32_0 = arith.constant 0 : i32
    %c0_i32_1 = arith.constant 0 : i32
    %c0_i32_2 = arith.constant 0 : i32
    return %c0_i32, %c0_i32_0, %c0_i32_1 : i32, i32, i32
  }
  func.func @transform_1(%arg0: i32) -> (i32, i32) {
    %c0_i32 = arith.constant 0 : i32
    %c0_i32_0 = arith.constant 0 : i32
    %c0_i32_1 = arith.constant 0 : i32
    return %c0_i32, %c0_i32_0 : i32, i32
  }
  func.func @transform_2(%arg0: i32) -> (i32, i32) {
    %c0_i32 = arith.constant 0 : i32
    %c0_i32_0 = arith.constant 0 : i32
    %c0_i32_1 = arith.constant 0 : i32
    return %c0_i32, %c0_i32_0 : i32, i32
  }
  func.func @transform_3(%arg0: i32) -> (i32, i32) {
    %c0_i32 = arith.constant 0 : i32
    %c0_i32_0 = arith.constant 0 : i32
    %c0_i32_1 = arith.constant 0 : i32
    return %c0_i32, %c0_i32_0 : i32, i32
  }
  func.func @transform_4(%arg0: i32) -> (i32, i32) {
    %c0_i32 = arith.constant 0 : i32
    %c0_i32_0 = arith.constant 0 : i32
    %c0_i32_1 = arith.constant 0 : i32
    return %c0_i32, %c0_i32_0 : i32, i32
  }
  func.func @transform_5(%arg0: i32) -> (i32, i32) {
    %c0_i32 = arith.constant 0 : i32
    %c0_i32_0 = arith.constant 0 : i32
    %c0_i32_1 = arith.constant 0 : i32
    return %c0_i32, %c0_i32_0 : i32, i32
  }
  func.func @transform_6(%arg0: i32) -> (i32, i32) {
    %c0_i32 = arith.constant 0 : i32
    %c0_i32_0 = arith.constant 0 : i32
    %c0_i32_1 = arith.constant 0 : i32
    return %c0_i32, %c0_i32_0 : i32, i32
  }
  func.func @transform_7(%arg0: i32) -> (i32, i32) {
    %c0_i32 = arith.constant 0 : i32
    %c0_i32_0 = arith.constant 0 : i32
    %c0_i32_1 = arith.constant 0 : i32
    return %c0_i32, %c0_i32_0 : i32, i32
  }
  func.func @transform_8(%arg0: i32) -> (i32, i32) {
    %c0_i32 = arith.constant 0 : i32
    %c0_i32_0 = arith.constant 0 : i32
    %c0_i32_1 = arith.constant 0 : i32
    return %c0_i32, %c0_i32_0 : i32, i32
  }
  func.func @transform_9(%arg0: i32) -> (i32, i32) {
    %c0_i32 = arith.constant 0 : i32
    %c0_i32_0 = arith.constant 0 : i32
    %c0_i32_1 = arith.constant 0 : i32
    return %c0_i32, %c0_i32_0 : i32, i32
  }
  func.func @transform_10(%arg0: i32) -> (i32, i32) {
    %c0_i32 = arith.constant 0 : i32
    %c0_i32_0 = arith.constant 0 : i32
    %c0_i32_1 = arith.constant 0 : i32
    return %c0_i32, %c0_i32_0 : i32, i32
  }
  func.func @transform_11(%arg0: i32) -> (i32, i32, i32) {
    %c0_i32 = arith.constant 0 : i32
    %c0_i32_0 = arith.constant 0 : i32
    %c0_i32_1 = arith.constant 0 : i32
    %c0_i32_2 = arith.constant 0 : i32
    return %c0_i32, %c0_i32_0, %c0_i32_1 : i32, i32, i32
  }
  func.func @transform_12(%arg0: i32) -> (i32, i32, i32) {
    %c0_i32 = arith.constant 0 : i32
    %c0_i32_0 = arith.constant 0 : i32
    %c0_i32_1 = arith.constant 0 : i32
    %c0_i32_2 = arith.constant 0 : i32
    return %c0_i32, %c0_i32_0, %c0_i32_1 : i32, i32, i32
  }
  func.func @transform_13(%arg0: i32) -> (i32, i32, i32) {
    %c0_i32 = arith.constant 0 : i32
    %c0_i32_0 = arith.constant 0 : i32
    %c0_i32_1 = arith.constant 0 : i32
    %c0_i32_2 = arith.constant 0 : i32
    return %c0_i32, %c0_i32_0, %c0_i32_1 : i32, i32, i32
  }
}

</mosaic_0001>

<bundles_post_ra>
// kernel: decoder_vanilla_forward.1
= control target key start
LH: loop header
LB: loop body
LE: loop exit
PB: predicated region body
PF: predicated region fallthrough
CT: control target
= control target key end

     0   :  { %19 = vsyncpa [#allocation7], 0  ;;  %s17048_s0 = inlined_call_operand.hbm [shape: f32[8,8,16], index: 0, kind: input, shape index: {}]   ;;  %s17049_s1 = inlined_call_operand.hbm [shape: f32[8,16], index: 1, kind: input, shape index: {}]   ;;  %s17050_s2 = inlined_call_operand.hbm [shape: f32[16,128], index: 2, kind: input, shape index: {}]   ;;  %s17051_s3 = inlined_call_operand.hbm [shape: f32[16,128], index: 3, kind: input, shape index: {}]   ;;  %s17052_s4 = inlined_call_operand.hbm [shape: f32[32,128], index: 4, kind: input, shape index: {}]   ;;  %s17053_s5 = inlined_call_operand.hbm [shape: f32[1,128], index: 5, kind: input, shape index: {}]   ;;  %s17054_s6 = inlined_call_operand.hbm [shape: f32[32,128], index: 6, kind: input, shape index: {}]   ;;  %s17055_s7 = inlined_call_operand.hbm [shape: f32[32,128], index: 7, kind: input, shape index: {}]   ;;  %s17056_s8 = inlined_call_operand.hbm [shape: f32[1,128], index: 8, kind: input, shape index: {}]   ;;  %s17057_s9 = inlined_call_operand.hbm [shape: f32[32,32], index: 9, kind: input, shape index: {}]   ;;  %s17058_s10 = inlined_call_operand.hbm [shape: f32[1,32], index: 10, kind: input, shape index: {}]   ;;  %s17059_s11 = inlined_call_operand.hbm [shape: f32[8,8,32], index: 11, kind: output, shape index: {0}]   ;;  %s17060_s12 = inlined_call_operand.hbm [shape: f32[2,8,32], index: 12, kind: output, shape index: {1}]   ;;  %s17061_s13 = inlined_call_operand.hbm [shape: f32[2,8,32], index: 13, kind: output, shape index: {2}]  }
   0x1   :  { %20 = vsyncpa [#allocation10], 0 }
   0x2   :  { %21 = vsyncpa [#allocation13], 0 }
   0x3   :  { %22 = vsyncpa [#allocation16], 0 }
   0x4   :  { %23 = vsyncpa [#allocation19], 0 }
   0x5   :  { %24 = vsyncpa [#allocation22], 0 }
   0x6   :  { %25 = vsyncpa [#allocation8], 0 }
   0x7   :  { %26 = vsyncpa [#allocation26], 0  ;;  %s15387_s25 = smov [#allocation9]   ;;  %s15063_s29 = scalar_lea.hbm %s17049_s1, 128 }
   0x8   :  { %s45_s26 = sshll.u32 %s15387_s25, 4  ;;  %p15064_p0 = scmp.ne.s32.totalorder %s17049_s1, %s15063_s29  ;;  %s46_s26 = int_to_ptr.vmem [resolvable:$true] %s45_s26 }
   0x9   :  { %p15067_p1 = scmp.lt.u32.totalorder %s15063_s29, %s17049_s1 }
   0xb   :  { %p15069_p2 = pnand %p15067_p1, %p15064_p0 }
   0xd   :  { %15072 = shalt.err (!%p15069_p2)
}
   0xe   :  { %s15073_s17 = scalar_lea.vmem %s46_s26, 128  ;;  %p15078_p4 = scmp.lt.s32.totalorder %s46_s26, %s46_s26 }
   0xf   :  { %p15074_p3 = scmp.ne.s32.totalorder %s46_s26, %s15073_s17  ;;  %p15079_p5 = scmp.lt.s32.totalorder %s15073_s17, %s15073_s17 }
  0x11   :  { %p15080_p6 = por %p15079_p5, %p15078_p4 }
  0x13   :  { %p15081_p7 = pnand %p15080_p6, %p15074_p3 }
  0x15   :  { %15084 = shalt.err (!%p15081_p7)
}
  0x16   :  { %48 = dma.hbm_to_vmem [thread:$0]  %s17049_s1, 128, %s46_s26, [#allocation10]  }
  0x17   :  { %s15388_s20 = smov [#allocation12]   ;;  %s15389_s22 = smov [#allocation15]  }
  0x18   :  { %s66_s21 = sshll.u32 %s15388_s20, 4  ;;  %s91_s23 = sshll.u32 %s15389_s22, 4  ;;  %s67_s21 = int_to_ptr.vmem [resolvable:$true] %s66_s21  ;;  %s92_s23 = int_to_ptr.vmem [resolvable:$true] %s91_s23 }
  0x19   :  { %s15085_s27 = scalar_lea.hbm %s17051_s3, 256 }
  0x1a   :  { %p15086_p8 = scmp.ne.s32.totalorder %s17051_s3, %s15085_s27  ;;  %p15089_p9 = scmp.lt.u32.totalorder %s15085_s27, %s17051_s3 }
  0x1c   :  { %p15091_p10 = pnand %p15089_p9, %p15086_p8 }
  0x1e   :  { %15094 = shalt.err (!%p15091_p10)
}
  0x1f   :  { %s15095_s1 = scalar_lea.vmem %s67_s21, 256  ;;  %p15100_p12 = scmp.lt.s32.totalorder %s67_s21, %s67_s21 }
  0x20   :  { %p15096_p11 = scmp.ne.s32.totalorder %s67_s21, %s15095_s1  ;;  %p15101_p13 = scmp.lt.s32.totalorder %s15095_s1, %s15095_s1 }
  0x22   :  { %p15102_p0 = por %p15101_p13, %p15100_p12 }
  0x24   :  { %p15103_p1 = pnand %p15102_p0, %p15096_p11 }
  0x26   :  { %15106 = shalt.err (!%p15103_p1)
}
  0x27   :  { %s15390_s26 = smov 128   ;;  %s15391_s15 = smov 8  }
  0x28   :  { %72 = dma.hbm_to_vmem [thread:$0]  %s17051_s3, 256, %s67_s21, [#allocation13], %s15390_s26, %s15390_s26, %s15391_s15  }
  0x29   :  { %s15107_s20 = scalar_lea.hbm %s17053_s5, 16 }
  0x2a   :  { %p15108_p2 = scmp.ne.s32.totalorder %s17053_s5, %s15107_s20  ;;  %p15111_p3 = scmp.lt.u32.totalorder %s15107_s20, %s17053_s5 }
  0x2c   :  { %p15113_p4 = pnand %p15111_p3, %p15108_p2 }
  0x2e   :  { %15116 = shalt.err (!%p15113_p4)
}
  0x2f   :  { %s15117_s28 = scalar_lea.vmem %s92_s23, 16  ;;  %s15121_s29 = scalar_lea.vmem %s92_s23, 32 }
  0x30   :  { %p15118_p5 = scmp.ne.s32.totalorder %s92_s23, %s15117_s28  ;;  %p15122_p6 = scmp.lt.s32.totalorder %s92_s23, %s92_s23 }
  0x31   :  { %p15123_p7 = scmp.lt.s32.totalorder %s15121_s29, %s15117_s28 }
  0x33   :  { %p15124_p8 = por %p15123_p7, %p15122_p6 }
  0x35   :  { %p15125_p9 = pnand %p15124_p8, %p15118_p5 }
  0x37   :  { %15128 = shalt.err (!%p15125_p9)
}
  0x38   :  { %94 = dma.hbm_to_vmem [thread:$0]  %s17053_s5, 16, %s92_s23, [#allocation16]  }
  0x39   :  { %s15392_s30 = smov [#allocation18]   ;;  %s15393_s1 = smov [#allocation21]  }
  0x3a   :  { %s112_s14 = sshll.u32 %s15392_s30, 4  ;;  %s134_s16 = sshll.u32 %s15393_s1, 4  ;;  %s113_s14 = int_to_ptr.vmem [resolvable:$true] %s112_s14  ;;  %s135_s16 = int_to_ptr.vmem [resolvable:$true] %s134_s16 }
  0x3b   :  { %s15129_s19 = scalar_lea.hbm %s17055_s7, 512 }
  0x3c   :  { %p15130_p10 = scmp.ne.s32.totalorder %s17055_s7, %s15129_s19  ;;  %p15133_p11 = scmp.lt.u32.totalorder %s15129_s19, %s17055_s7 }
  0x3e   :  { %p15135_p12 = pnand %p15133_p11, %p15130_p10 }
  0x40   :  { %15138 = shalt.err (!%p15135_p12)
}
  0x41   :  { %s15139_s5 = scalar_lea.vmem %s113_s14, 512  ;;  %p15144_p0 = scmp.lt.s32.totalorder %s113_s14, %s113_s14 }
  0x42   :  { %p15140_p13 = scmp.ne.s32.totalorder %s113_s14, %s15139_s5  ;;  %p15145_p1 = scmp.lt.s32.totalorder %s15139_s5, %s15139_s5 }
  0x44   :  { %p15146_p2 = por %p15145_p1, %p15144_p0 }
  0x46   :  { %p15147_p3 = pnand %p15146_p2, %p15140_p13 }
  0x48   :  { %15150 = shalt.err (!%p15147_p3)
}
  0x49   :  { %118 = dma.hbm_to_vmem [thread:$0]  %s17055_s7, 512, %s113_s14, [#allocation19], %s15390_s26, %s15390_s26, %s15391_s15  }
  0x4a   :  { %s15151_s3 = scalar_lea.hbm %s17057_s9, 512 }
  0x4b   :  { %p15152_p4 = scmp.ne.s32.totalorder %s17057_s9, %s15151_s3  ;;  %p15155_p5 = scmp.lt.u32.totalorder %s15151_s3, %s17057_s9 }
  0x4d   :  { %p15157_p6 = pnand %p15155_p5, %p15152_p4 }
  0x4f   :  { %15160 = shalt.err (!%p15157_p6)
}
  0x50   :  { %s15161_s18 = scalar_lea.vmem %s135_s16, 512  ;;  %p15166_p8 = scmp.lt.s32.totalorder %s135_s16, %s135_s16 }
  0x51   :  { %p15162_p7 = scmp.ne.s32.totalorder %s135_s16, %s15161_s18  ;;  %p15167_p9 = scmp.lt.s32.totalorder %s15161_s18, %s15161_s18 }
  0x53   :  { %p15168_p10 = por %p15167_p9, %p15166_p8 }
  0x55   :  { %p15169_p11 = pnand %p15168_p10, %p15162_p7 }
  0x57   :  { %15172 = shalt.err (!%p15169_p11)
}
  0x58   :  { %140 = dma.hbm_to_vmem [thread:$0]  %s17057_s9, 512, %s135_s16, [#allocation22], %s15390_s26, %s15390_s26, %s15391_s15  }
  0x59   :  { %s15394_s19 = smov [#allocation6]   ;;  %s15395_s22 = smov [#allocation11]  }
  0x5a   :  { %s32_s20 = sshll.u32 %s15394_s19, 4  ;;  %s54_s24 = sshll.u32 %s15395_s22, 4  ;;  %s33_s20 = int_to_ptr.vmem [resolvable:$true] %s32_s20  ;;  %s55_s24 = int_to_ptr.vmem [resolvable:$true] %s54_s24 }
  0x5b   :  { %s15173_s23 = scalar_lea.hbm %s17048_s0, 1024 }
  0x5c   :  { %p15174_p12 = scmp.ne.s32.totalorder %s17048_s0, %s15173_s23  ;;  %p15177_p13 = scmp.lt.u32.totalorder %s15173_s23, %s17048_s0 }
  0x5e   :  { %p15179_p0 = pnand %p15177_p13, %p15174_p12 }
  0x60   :  { %15182 = shalt.err (!%p15179_p0)
}
  0x61   :  { %s15183_s9 = scalar_lea.vmem %s33_s20, 1024  ;;  %p15188_p2 = scmp.lt.s32.totalorder %s33_s20, %s33_s20 }
  0x62   :  { %p15184_p1 = scmp.ne.s32.totalorder %s33_s20, %s15183_s9  ;;  %p15189_p3 = scmp.lt.s32.totalorder %s15183_s9, %s15183_s9 }
  0x64   :  { %p15190_p4 = por %p15189_p3, %p15188_p2 }
  0x66   :  { %p15191_p5 = pnand %p15190_p4, %p15184_p1 }
  0x68   :  { %15194 = shalt.err (!%p15191_p5)
}
  0x69   :  { %38 = dma.hbm_to_vmem [thread:$0]  %s17048_s0, 1024, %s33_s20, [#allocation7], %s15390_s26, %s15390_s26, %s15391_s15  }
  0x6a   :  { %s15195_s17 = scalar_lea.hbm %s17050_s2, 256 }
  0x6b   :  { %p15196_p6 = scmp.ne.s32.totalorder %s17050_s2, %s15195_s17  ;;  %p15199_p7 = scmp.lt.u32.totalorder %s15195_s17, %s17050_s2 }
  0x6d   :  { %p15201_p8 = pnand %p15199_p7, %p15196_p6 }
  0x6f   :  { %15204 = shalt.err (!%p15201_p8)
}
  0x70   :  { %s15205_s22 = scalar_lea.vmem %s55_s24, 256  ;;  %p15210_p10 = scmp.lt.s32.totalorder %s55_s24, %s55_s24 }
  0x71   :  { %p15206_p9 = scmp.ne.s32.totalorder %s55_s24, %s15205_s22  ;;  %p15211_p11 = scmp.lt.s32.totalorder %s15205_s22, %s15205_s22 }
  0x73   :  { %p15212_p12 = por %p15211_p11, %p15210_p10 }
  0x75   :  { %p15213_p13 = pnand %p15212_p12, %p15206_p9 }
  0x77   :  { %15216 = shalt.err (!%p15213_p13)
}
  0x78   :  { %60 = dma.hbm_to_vmem [thread:$0]  %s17050_s2, 256, %s55_s24, [#allocation10], %s15390_s26, %s15390_s26, %s15391_s15  }
  0x79   :  { %s15396_s25 = smov [#allocation14]   ;;  %s15397_s23 = smov [#allocation17]  }
  0x7a   :  { %s78_s5 = sshll.u32 %s15396_s25, 4  ;;  %s100_s27 = sshll.u32 %s15397_s23, 4  ;;  %s79_s5 = int_to_ptr.vmem [resolvable:$true] %s78_s5  ;;  %s101_s27 = int_to_ptr.vmem [resolvable:$true] %s100_s27 }
  0x7b   :  { %s15217_s3 = scalar_lea.hbm %s17052_s4, 512 }
  0x7c   :  { %p15218_p0 = scmp.ne.s32.totalorder %s17052_s4, %s15217_s3  ;;  %p15221_p1 = scmp.lt.u32.totalorder %s15217_s3, %s17052_s4 }
  0x7e   :  { %p15223_p2 = pnand %p15221_p1, %p15218_p0 }
  0x80   :  { %15226 = shalt.err (!%p15223_p2)
}
  0x81   :  { %s15227_s2 = scalar_lea.vmem %s79_s5, 512  ;;  %p15232_p4 = scmp.lt.s32.totalorder %s79_s5, %s79_s5 }
  0x82   :  { %p15228_p3 = scmp.ne.s32.totalorder %s79_s5, %s15227_s2  ;;  %p15233_p5 = scmp.lt.s32.totalorder %s15227_s2, %s15227_s2 }
  0x84   :  { %p15234_p6 = por %p15233_p5, %p15232_p4 }
  0x86   :  { %p15235_p7 = pnand %p15234_p6, %p15228_p3 }
  0x88   :  { %15238 = shalt.err (!%p15235_p7)
}
  0x89   :  { %84 = dma.hbm_to_vmem [thread:$0]  %s17052_s4, 512, %s79_s5, [#allocation13], %s15390_s26, %s15390_s26, %s15391_s15  }
  0x8a   :  { %s15239_s7 = scalar_lea.hbm %s17054_s6, 512 }
  0x8b   :  { %p15240_p8 = scmp.ne.s32.totalorder %s17054_s6, %s15239_s7  ;;  %p15243_p9 = scmp.lt.u32.totalorder %s15239_s7, %s17054_s6 }
  0x8d   :  { %p15245_p10 = pnand %p15243_p9, %p15240_p8 }
  0x8f   :  { %15248 = shalt.err (!%p15245_p10)
}
  0x90   :  { %s15249_s20 = scalar_lea.vmem %s101_s27, 512  ;;  %p15254_p12 = scmp.lt.s32.totalorder %s101_s27, %s101_s27 }
  0x91   :  { %p15250_p11 = scmp.ne.s32.totalorder %s101_s27, %s15249_s20  ;;  %p15255_p13 = scmp.lt.s32.totalorder %s15249_s20, %s15249_s20 }
  0x93   :  { %p15256_p0 = por %p15255_p13, %p15254_p12 }
  0x95   :  { %p15257_p1 = pnand %p15256_p0, %p15250_p11 }
  0x97   :  { %15260 = shalt.err (!%p15257_p1)
}
  0x98   :  { %106 = dma.hbm_to_vmem [thread:$0]  %s17054_s6, 512, %s101_s27, [#allocation16], %s15390_s26, %s15390_s26, %s15391_s15  }
  0x99   :  { %s15398_s5 = smov [#allocation20]   ;;  %s15399_s28 = smov [#allocation23]  }
  0x9a   :  { %s125_s23 = sshll.u32 %s15398_s5, 4  ;;  %s147_s29 = sshll.u32 %s15399_s28, 4  ;;  %s126_s23 = int_to_ptr.vmem [resolvable:$true] %s125_s23  ;;  %s148_s29 = int_to_ptr.vmem [resolvable:$true] %s147_s29 }
  0x9b   :  { %s15261_s16 = scalar_lea.hbm %s17056_s8, 16 }
  0x9c   :  { %p15262_p2 = scmp.ne.s32.totalorder %s17056_s8, %s15261_s16  ;;  %p15265_p3 = scmp.lt.u32.totalorder %s15261_s16, %s17056_s8 }
  0x9e   :  { %p15267_p4 = pnand %p15265_p3, %p15262_p2 }
  0xa0   :  { %15270 = shalt.err (!%p15267_p4)
}
  0xa1   :  { %s15271_s6 = scalar_lea.vmem %s126_s23, 16  ;;  %s15275_s27 = scalar_lea.vmem %s126_s23, 32 }
  0xa2   :  { %p15272_p5 = scmp.ne.s32.totalorder %s126_s23, %s15271_s6  ;;  %p15276_p6 = scmp.lt.s32.totalorder %s126_s23, %s126_s23 }
  0xa3   :  { %p15277_p7 = scmp.lt.s32.totalorder %s15275_s27, %s15271_s6 }
  0xa5   :  { %p15278_p8 = por %p15277_p7, %p15276_p6 }
  0xa7   :  { %p15279_p9 = pnand %p15278_p8, %p15272_p5 }
  0xa9   :  { %15282 = shalt.err (!%p15279_p9)
}
  0xaa   :  { %128 = dma.hbm_to_vmem [thread:$0]  %s17056_s8, 16, %s126_s23, [#allocation19]  }
  0xab   :  { %s15283_s14 = scalar_lea.hbm %s17058_s10, 16 }
  0xac   :  { %p15284_p10 = scmp.ne.s32.totalorder %s17058_s10, %s15283_s14  ;;  %p15287_p11 = scmp.lt.u32.totalorder %s15283_s14, %s17058_s10 }
  0xae   :  { %p15289_p12 = pnand %p15287_p11, %p15284_p10 }
  0xb0   :  { %15292 = shalt.err (!%p15289_p12)
}
  0xb1   :  { %s15293_s4 = scalar_lea.vmem %s148_s29, 16  ;;  %s15297_s25 = scalar_lea.vmem %s148_s29, 32 }
  0xb2   :  { %p15294_p13 = scmp.ne.s32.totalorder %s148_s29, %s15293_s4  ;;  %p15298_p0 = scmp.lt.s32.totalorder %s148_s29, %s148_s29 }
  0xb3   :  { %p15299_p1 = scmp.lt.s32.totalorder %s15297_s25, %s15293_s4 }
  0xb5   :  { %p15300_p2 = por %p15299_p1, %p15298_p0 }
  0xb7   :  { %p15301_p3 = pnand %p15300_p2, %p15294_p13 }
  0xb9   :  { %15304 = shalt.err (!%p15301_p3)
}
  0xba   :  { %150 = dma.hbm_to_vmem [thread:$0]  %s17058_s10, 16, %s148_s29, [#allocation22]  }
  0xbb   :  { %15371 = dma.done.wait [#allocation7], 1024  }
  0xbc   :  { %15372 = vsyncadd [#allocation7], 4294966272 }
  0xbd   :  { %15373 = dma.done.wait [#allocation10], 384  }
  0xbe   :  { %15374 = vsyncadd [#allocation10], 4294966912 }
  0xbf   :  { %15375 = dma.done.wait [#allocation13], 768  }
  0xc0   :  { %15376 = vsyncadd [#allocation13], 4294966528 }
  0xc1   :  { %15377 = dma.done.wait [#allocation16], 528  }
  0xc2   :  { %15378 = vsyncadd [#allocation16], 4294966768 }
  0xc3   :  { %15379 = dma.done.wait [#allocation19], 528  }
  0xc4   :  { %15380 = vsyncadd [#allocation19], 4294966768 }
  0xc5   :  { %15381 = dma.done.wait [#allocation22], 528  }
  0xc6   :  { %15382 = vsyncadd [#allocation22], 4294966768  ;;  %vm1471_vm0 = vcmask 261120   ;;  %v15400_v0 = vmov 0.0   ;;  %vm194_vm1 = vcmask 130048   ;;  %v192_v1 = vld [vmem:[#allocation11] sm:$0xff] }
  0xc7   :  { %1472 = vst.msk [vmem:[#allocation4] sm:$0xff] %vm1471_vm0, %v15400_v0  ;;  %1473 = vst.msk [vmem:[#allocation5] sm:$0xff] %vm1471_vm0, %v15400_v0  ;;  %v193_v2 = vld [vmem:[#allocation11 + $0x8] sm:$0xff]  ;;  %v184_v3 = vld [vmem:[#allocation6] sm:$0xff]  ;;  %v220_v4 = vand.u32 4294901760, %v192_v1  ;;  %vm15402_vm2 = vmmov 0  }
  0xc8   :  { %v223_v5 = vand.u32 4294901760, %v193_v2  ;;  %v196_v6 = vsel %vm194_vm1, %v184_v3, 0  ;;  %v185_v7 = vld [vmem:[#allocation6 + $0x8] sm:$0xff]  ;;  %v186_v8 = vld [vmem:[#allocation6 + $0x10] sm:$0xff]  ;;  %v187_v9 = vld [vmem:[#allocation6 + $0x18] sm:$0xff]  ;;  %s15403_s10 = smov 64  }
  0xc9   :  { %v15637_v10 = vand.u32 4294901760, %v196_v6  ;;  %v199_v11 = vsel %vm194_vm1, %v185_v7, 0  ;;  %v202_v12 = vsel %vm194_vm1, %v186_v8, 0  ;;  %v205_v13 = vsel %vm194_vm1, %v187_v9, 0  ;;  %v188_v14 = vld [vmem:[#allocation6 + $0x20] sm:$0xff]  ;;  %v189_v23 = vld [vmem:[#allocation6 + $0x28] sm:$0xff] }
  0xca   :  { %v15642_v15 = vpack.c.bf16 %v223_v5, %v220_v4  ;;  %v368_v16 = vsub.f32 %v192_v1, %v220_v4  ;;  %v375_v17 = vsub.f32 %v193_v2, %v223_v5  ;;  %v15644_v18 = vand.u32 4294901760, %v199_v11  ;;  %v190_v40 = vld [vmem:[#allocation6 + $0x30] sm:$0xff]  ;;  %v191_v49 = vld [vmem:[#allocation6 + $0x38] sm:$0xff]  ;;  %s15404_s23 = smov 32   ;;  %s15405_s28 = smov 96  }
  0xcb   :  { %v15647_v19 = vsub.f32 %v196_v6, %v15637_v10  ;;  %v15649_v20 = vand.u32 4294901760, %v202_v12  ;;  %v15651_v21 = vand.u32 4294901760, %v205_v13  ;;  %v208_v22 = vsel %vm194_vm1, %v188_v14, 0  ;;  %s15406_s29 = smov [#allocation25]  }
  0xcc   :  { %v15654_v24 = vpack.c.bf16 %v375_v17, %v368_v16  ;;  %13891 = vmatprep.subr.bf16.mxu1 %v15642_v15  ;;  %v15658_v25 = vsub.f32 %v199_v11, %v15644_v18  ;;  %v369_v26 = vand.u32 4294901760, %v368_v16  ;;  %v376_v27 = vand.u32 4294901760, %v375_v17  ;;  %v980_v11 = vld [vmem:[#allocation12] sm:$0xff]  ;;  %s11699_s3 = sshll.u32 %s15406_s29, 4  ;;  %s11700_s3 = int_to_ptr.vmem [resolvable:$true] %s11699_s3 }
  0xcd   :  { %13893 = vmatpush3.bf16.msra.mxu1 %v15642_v15  ;;  %12492 = vmatprep.mubr.f32.mxu0 %v15647_v19  ;;  %v288_v28 = vand.u32 4294901760, %v15647_v19  ;;  %v15664_v29 = vsub.f32 %v202_v12, %v15649_v20  ;;  %v15667_v30 = vsub.f32 %v205_v13, %v15651_v21  ;;  %v15669_v31 = vand.u32 4294901760, %v208_v22  ;;  %v981_v12 = vld [vmem:[#allocation12 + $0x8] sm:$0xff]  ;;  %s15305_s9 = scalar_lea.vmem %s11700_s3, 256  ;;  %p15310_p5 = scmp.lt.s32.totalorder %s11700_s3, %s11700_s3 }
  0xce   :  { %13899 = vmatprep.subr.bf16.mxu0 %v15654_v24  ;;  %v298_v32 = vand.u32 4294901760, %v15658_v25  ;;  %v370_v33 = vsub.f32 %v368_v16, %v369_v26  ;;  %v377_v34 = vsub.f32 %v375_v17, %v376_v27  ;;  %v211_v35 = vsel %vm194_vm1, %v189_v23, 0  ;;  %v979_v13 = vld [vmem:[#allocation9] sm:$0xff]  ;;  %p15306_p4 = scmp.ne.s32.totalorder %s11700_s3, %s15305_s9  ;;  %p15311_p6 = scmp.lt.s32.totalorder %s15305_s9, %s15305_s9 }
  0xcf   :  { %13901 = vmatpush3.bf16.msra.mxu0 %v15654_v24  ;;  %v289_v36 = vsub.f32 %v15647_v19, %v288_v28  ;;  %v308_v37 = vand.u32 4294901760, %v15664_v29  ;;  %v318_v38 = vand.u32 4294901760, %v15667_v30  ;;  %v15679_v39 = vsub.f32 %v208_v22, %v15669_v31 }
  0xd0   :  { %v299_v41 = vsub.f32 %v15658_v25, %v298_v32  ;;  %v371_v42 = vand.u32 4294901760, %v370_v33  ;;  %v378_v43 = vand.u32 4294901760, %v377_v34  ;;  %v15682_v44 = vand.u32 4294901760, %v211_v35  ;;  %13903 = vmatprep.subr.bf16.mxu0 %v15642_v15  ;;  %p15312_p7 = por %p15311_p6, %p15310_p5 }
  0xd1   :  { %v290_v45 = vand.u32 4294901760, %v289_v36  ;;  %v309_v46 = vsub.f32 %v15664_v29, %v308_v37  ;;  %v319_v47 = vsub.f32 %v15667_v30, %v318_v38  ;;  %v328_v48 = vand.u32 4294901760, %v15679_v39  ;;  %v1468_v36 = vld [vmem:[#allocation14 + $0x8] sm:$0xff] }
  0xd2   :  { %12493 = vmatmul.mubr.f32.vlgmr.msra.gmra.mrb[0].mxu0 %v15658_v25  ;;  %v300_v50 = vand.u32 4294901760, %v299_v41  ;;  %v13894_v51 = vpack.c.bf16 %v378_v43, %v371_v42  ;;  %v337_v52 = vsub.f32 %v211_v35, %v15682_v44  ;;  %v214_v53 = vsel %vm194_vm1, %v190_v40, 0  ;;  %v1467_v35 = vld [vmem:[#allocation14] sm:$0xff]  ;;  %v1469_v41 = vld [vmem:[#allocation14 + $0x10] sm:$0xff]  ;;  %v1470_v42 = vld [vmem:[#allocation14 + $0x18] sm:$0xff]  ;;  %p15313_p8 = pnand %p15312_p7, %p15306_p4 }
  0xd3   :  { %12460 = vmatprep.mubr.f32.mxu1 %v290_v45  ;;  %12495 = vmatprep.mubr.f32.mxu0 %v15664_v29  ;;  %v310_v54 = vand.u32 4294901760, %v309_v46  ;;  %v329_v55 = vsub.f32 %v15679_v39, %v328_v48  ;;  %v15693_v56 = vand.u32 4294901760, %v214_v53  ;;  %v320_v57 = vand.u32 4294901760, %v319_v47 }
  0xd4   :  { %12461 = vmatmul.mubr.f32.vlgmr.msra.gmra.mrb[0].mxu1 %v300_v50  ;;  %13895 = vmatprep.subr.bf16.mxu1 %v13894_v51  ;;  %v338_v58 = vand.u32 4294901760, %v337_v52  ;;  %v217_v59 = vsel %vm194_vm1, %v191_v49, 0  ;;  %v13906_v60 = vpack.c.bf16 %v376_v27, %v369_v26  ;;  %v993_v14 = vand.u32 4294901760, %v980_v11 }
  0xd5   :  { %13897 = vmatpush3.bf16.msra.mxu1 %v13894_v51  ;;  %12463 = vmatprep.mubr.f32.mxu1 %v310_v54  ;;  %v330_v61 = vand.u32 4294901760, %v329_v55  ;;  %v347_v62 = vsub.f32 %v214_v53, %v15693_v56  ;;  %v15697_v63 = vand.u32 4294901760, %v217_v59  ;;  %v996_v16 = vand.u32 4294901760, %v981_v12 }
  0xd6   :  { %12496 = vmatmul.mubr.f32.gmra.mrb[2].mxu0 %v15667_v30  ;;  %v339_v1 = vsub.f32 %v337_v52, %v338_v58  ;;  %14604 = vmatprep.subr.bf16.mxu1 %v15654_v24  ;;  %v990_v17 = vsel %vm194_vm1, %v979_v13, 0  ;;  %v15401_v19 = vmov 0.0|0.0   ;;  %v15719_v23 = vsub.f32 %v980_v11, %v993_v14 }
  0xd7   :  { %12498 = vmatprep.mubr.f32.mxu0 %v15679_v39  ;;  %13905 = vmatpush3.bf16.msra.mxu0 %v15642_v15  ;;  %v348_v2 = vand.u32 4294901760, %v347_v62  ;;  %v15704_v3 = vsub.f32 %v217_v59, %v15697_v63  ;;  %v15716_v22 = vand.u32 4294901760, %v990_v17  ;;  %v1481_v39 = vand.u32 4294901760, %v1467_v35 }
  0xd8   :  { %12464 = vmatmul.mubr.f32.gmra.mrb[2].mxu1 %v320_v57  ;;  %v340_v4 = vand.u32 4294901760, %v339_v1  ;;  %13907 = vmatprep.subr.bf16.mxu0 %v13906_v60  ;;  %v1072_v26 = vand.u32 4294901760, %v15719_v23  ;;  %v1484_v40 = vand.u32 4294901760, %v1468_v36  ;;  %v1487_v45 = vand.u32 4294901760, %v1469_v41 }
  0xd9   :  { %12466 = vmatprep.mubr.f32.mxu1 %v330_v61  ;;  %v349_v5 = vsub.f32 %v347_v62, %v348_v2  ;;  %v358_v6 = vand.u32 4294901760, %v15704_v3  ;;  %v15726_v25 = vsub.f32 %v990_v17, %v15716_v22  ;;  %v1490_v46 = vand.u32 4294901760, %v1470_v42 }
  0xda   :  { %12499 = vmatmul.mubr.f32.gmra.mrb[4].mxu0 %v337_v52  ;;  %v1073_v29 = vsub.f32 %v15719_v23, %v1072_v26  ;;  %v15754_v43 = vpack.c.bf16 %v1484_v40, %v1481_v39  ;;  %v1575_v52 = vsub.f32 %v1469_v41, %v1487_v45 }
  0xdb   :  { %12508 = vmatprep.mubr.f32.mxu0 %v288_v28  ;;  %v350_v7 = vand.u32 4294901760, %v349_v5  ;;  %v359_v8 = vsub.f32 %v15704_v3, %v358_v6  ;;  %v1061_v28 = vand.u32 4294901760, %v15726_v25  ;;  %v15763_v47 = vpack.c.bf16 %v1490_v46, %v1487_v45 }
  0xdc   :  { %12467 = vmatmul.mubr.f32.gmra.mrb[4].mxu1 %v340_v4  ;;  %v1074_v33 = vand.u32 4294901760, %v1073_v29  ;;  %v1582_v53 = vsub.f32 %v1470_v42, %v1490_v46  ;;  %v1576_v57 = vand.u32 4294901760, %v1575_v52 }
  0xdd   :  { %12469 = vmatprep.mubr.f32.mxu1 %v350_v7  ;;  %v360_v9 = vand.u32 4294901760, %v359_v8 }
  0xde   :  { %12509 = vmatmul.mubr.f32.vlgmr.msra.gmra.mrb[0].mxu0 %v298_v32  ;;  %v1062_v32 = vsub.f32 %v15726_v25, %v1061_v28  ;;  %v15816_v7 = vpack.c.bf16 %v1582_v53, %v1575_v52 }
  0xdf   :  { %12511 = vmatprep.mubr.f32.mxu0 %v308_v37  ;;  %13909 = vmatpush3.bf16.msra.mxu0 %v13906_v60 }
  0xe0   :  { %12470 = vmatmul.mubr.f32.gmra.mrb[6].mxu1 %v360_v9  ;;  %13911 = vmatprep.subr.bf16.mxu0 %v15642_v15  ;;  %v1063_v37 = vand.u32 4294901760, %v1062_v32 }
  0xe1   :  { %12476 = vmatprep.mubr.f32.mxu1 %v15637_v10 }
  0xe2   :  { %12512 = vmatmul.mubr.f32.gmra.mrb[2].mxu0 %v318_v38 }
  0xe3   :  { %12514 = vmatprep.mubr.f32.mxu0 %v328_v48  ;;  %v1568_v48 = vsub.f32 %v1468_v36, %v1484_v40  ;;  %v11735_v40 = vld [vmem:[#allocation15] ss:$0 sm:$0xff] }
  0xe4   :  { %12477 = vmatmul.mubr.f32.vlgmr.msra.gmra.mrb[0].mxu1 %v15644_v18 }
  0xe5   :  { %14605 = vmatpush3.bf16.msra.mxu1 %v15654_v24  ;;  %12479 = vmatprep.mubr.f32.mxu1 %v15649_v20  ;;  %v15721_v24 = vsub.f32 %v981_v12, %v996_v16  ;;  %v1569_v51 = vand.u32 4294901760, %v1568_v48 }
  0xe6   :  { %12515 = vmatmul.mubr.f32.gmra.mrb[4].mxu0 %v338_v58  ;;  %13914 = vmatprep.subr.bf16.mxu1 %v15401_v19  ;;  %v1583_v58 = vand.u32 4294901760, %v1582_v53 }
  0xe7   :  { %12517 = vmatprep.mubr.f32.mxu0 %v348_v2  ;;  %v1079_v27 = vand.u32 4294901760, %v15721_v24 }
  0xe8   :  { %12480 = vmatmul.mubr.f32.gmra.mrb[2].mxu1 %v15651_v21  ;;  %v15832_v9 = vpack.c.bf16 %v1583_v58, %v1576_v57 }
  0xe9   :  { %12482 = vmatprep.mubr.f32.mxu1 %v15669_v31  ;;  %v1080_v30 = vsub.f32 %v15721_v24, %v1079_v27 }
  0xea   :  { %12518 = vmatmul.mubr.f32.gmra.mrb[6].mxu0 %v358_v6 }
  0xeb   :  { %12524 = vmatprep.mubr.f32.mxu0 %v15637_v10  ;;  %v1081_v34 = vand.u32 4294901760, %v1080_v30 }
  0xec   :  { %12483 = vmatmul.mubr.f32.gmra.mrb[4].mxu1 %v15682_v44 }
  0xed   :  { %12485 = vmatprep.mubr.f32.mxu1 %v15693_v56  ;;  %v13918_v38 = vpack.c.bf16 %v1081_v34, %v1074_v33 }
  0xee   :  { %12525 = vmatmul.mubr.f32.vlgmr.msra.gmra.mrb[0].mxu0 %v15644_v18 }
  0xef   :  { %12527 = vmatprep.mubr.f32.mxu0 %v15649_v20  ;;  %13913 = vmatpush3.bf16.msra.mxu0 %v15642_v15  ;;  %v13915_v15 = vpack.c.bf16 %v996_v16, %v993_v14 }
  0xf0   :  { %12486 = vmatmul.mubr.f32.gmra.mrb[6].mxu1 %v15697_v63  ;;  %14004 = vmatprep.subr.bf16.mxu0 %v15401_v19 }
  0xf1   :  { %12501 = vmatprep.mubr.f32.mxu1 %v347_v62  ;;  %v1577_v62 = vsub.f32 %v1575_v52, %v1576_v57 }
  0xf2   :  { %12528 = vmatmul.mubr.f32.gmra.mrb[2].mxu0 %v15651_v21 }
  0xf3   :  { %12530 = vmatprep.mubr.f32.mxu0 %v15669_v31 }
  0xf6   :  { %12531 = vmatmul.mubr.f32.gmra.mrb[4].mxu0 %v15682_v44 }
  0xf7   :  { %12533 = vmatprep.mubr.f32.mxu0 %v15693_v56 }
  0xf8   :  { %12502 = vmatmul.mubr.f32.vlgmr.msra.gmra.mrb[6].mxu1 %v15704_v3  ;;  %v1578_v3 = vand.u32 4294901760, %v1577_v62 }
  0xf9   :  { %13916 = vmatpush3.bf16.msra.mxu1 %v13915_v15  ;;  %12556 = vmatprep.mubr.msk.f32.mxu1 %vm15402_vm2, %v15400_v0 }
  0xfa   :  { %12534 = vmatmul.mubr.f32.gmra.mrb[6].mxu0 %v15697_v63  ;;  %13917 = vmatprep.subr.bf16.mxu1 %v15401_v19 }
  0xfb   :  { %12540 = vmatprep.mubr.f32.mxu0 %v15637_v10  ;;  %v13921_v10 = vpack.c.bf16 %v15721_v24, %v15719_v23 }
  0xfc   :  { %12557 = vmatmul.mubr.f32.vlgmr.msra.gmra.mrb[8].mxu1 %v1063_v37 }
  0xfd   :  { %13919 = vmatpush3.bf16.msra.mxu1 %v13918_v38  ;;  %12563 = vmatprep.mubr.msk.f32.mxu1 %vm15402_vm2, %v15400_v0 }
  0xfe   :  { %12541 = vmatmul.mubr.f32.vlgmr.msra.gmra.mrb[0].mxu0 %v15644_v18  ;;  %13920 = vmatprep.subr.bf16.mxu1 %v15401_v19  ;;  %v13927_v18 = vpack.c.bf16 %v1079_v27, %v1072_v26 }
  0xff   :  { %12543 = vmatprep.mubr.f32.mxu0 %v15649_v20  ;;  %14006 = vmatpush3.bf16.msra.mxu0 %v15754_v43  ;;  %v1474_v20 = vld [vmem:[#allocation4] sm:$0xff] }
 0x100   :  { %14007 = vmatprep.subr.bf16.mxu0 %v15401_v19 }
 0x102   :  { %12544 = vmatmul.mubr.f32.gmra.mrb[2].mxu0 %v15651_v21  ;;  %v1478_v21 = vsel %vm1471_vm0, %v1474_v20, 0 }
 0x103   :  { %12546 = vmatprep.mubr.f32.mxu0 %v15669_v31  ;;  %14009 = vmatpush3.bf16.msra.mxu0 %v15763_v47  ;;  %v15788_v31 = vand.u32 4294901760, %v1478_v21 }
 0x104   :  { %12564 = vmatmul.mubr.f32.vlgmr.msra.gmra.mrb[8].mxu1 %v15716_v22  ;;  %14010 = vmatprep.subr.bf16.mxu0 %v15401_v19 }
 0x105   :  { %13922 = vmatpush3.bf16.msra.mxu1 %v13921_v10  ;;  %12570 = vmatprep.mubr.msk.f32.mxu1 %vm15402_vm2, %v15400_v0  ;;  %v1550_v49 = vsub.f32 %v1478_v21, %v15788_v31 }
 0x106   :  { %12547 = vmatmul.mubr.f32.gmra.mrb[4].mxu0 %v15682_v44  ;;  %13923 = vmatprep.subr.bf16.mxu1 %v15401_v19  ;;  %v1561_v44 = vsub.f32 %v1467_v35, %v1481_v39 }
 0x107   :  { %12549 = vmatprep.mubr.f32.mxu0 %v15693_v56  ;;  %v1551_v54 = vand.u32 4294901760, %v1550_v49  ;;  %v1570_v56 = vsub.f32 %v1568_v48, %v1569_v51 }
 0x108   :  { %v1562_v50 = vand.u32 4294901760, %v1561_v44  ;;  %v15811_v6 = vpack.c.bf16 %v1568_v48, %v1561_v44 }
 0x109   :  { %v1552_v59 = vsub.f32 %v1550_v49, %v1551_v54  ;;  %v1571_v61 = vand.u32 4294901760, %v1570_v56 }
 0x10a   :  { %12550 = vmatmul.mubr.f32.gmra.mrb[6].mxu0 %v15697_v63  ;;  %v1563_v55 = vsub.f32 %v1561_v44, %v1562_v50  ;;  %v1584_v63 = vsub.f32 %v1582_v53, %v1583_v58  ;;  %v15828_v8 = vpack.c.bf16 %v1569_v51, %v1562_v50  ;;  %v1475_v53 = vld [vmem:[#allocation5] sm:$0xff] }
 0x10b   :  { %12734 = vmatprep.mubr.msk.f32.mxu0 %vm15402_vm2, %v15400_v0  ;;  %v1553_v1 = vand.u32 4294901760, %v1552_v59 }
 0x10c   :  { %12571 = vmatmul.mubr.f32.vlgmr.msra.gmra.mrb[8].mxu1 %v15726_v25  ;;  %v1564_v60 = vand.u32 4294901760, %v1563_v55  ;;  %v1585_v4 = vand.u32 4294901760, %v1584_v63 }
 0x10d   :  { %13925 = vmatpush3.bf16.msra.mxu1 %v13915_v15  ;;  %12577 = vmatprep.mubr.msk.f32.mxu1 %vm15402_vm2, %v15400_v0 }
 0x10e   :  { %13926 = vmatprep.subr.bf16.mxu1 %v15401_v19  ;;  %v15801_v2 = vpack.c.bf16 %v1571_v61, %v1564_v60  ;;  %v15805_v5 = vpack.c.bf16 %v1585_v4, %v1578_v3 }
 0x114   :  { %12578 = vmatmul.mubr.f32.vlgmr.msra.gmra.mrb[8].mxu1 %v1061_v28 }
 0x115   :  { %13928 = vmatpush3.bf16.msra.mxu1 %v13927_v18  ;;  %12584 = vmatprep.mubr.msk.f32.mxu1 %vm15402_vm2, %v15400_v0 }
 0x116   :  { %13929 = vmatprep.subr.bf16.mxu1 %v15401_v19 }
 0x11c   :  { %12585 = vmatmul.mubr.f32.vlgmr.msra.gmra.mrb[8].mxu1 %v15716_v22 }
 0x11d   :  { %13931 = vmatpush3.bf16.msra.mxu1 %v13915_v15  ;;  %12591 = vmatprep.mubr.msk.f32.mxu1 %vm15402_vm2, %v15400_v0 }
 0x11e   :  { %13932 = vmatprep.subr.bf16.mxu1 %v15401_v19 }
 0x124   :  { %12592 = vmatmul.mubr.f32.vlgmr.msra.gmra.mrb[8].mxu1 %v15716_v22 }
 0x125   :  { %13934 = vmatpush3.bf16.msra.mxu1 %v15754_v43  ;;  %12602 = vmatprep.mubr.msk.f32.mxu1 %vm15402_vm2, %v15400_v0 }
 0x126   :  { %13935 = vmatprep.subr.bf16.mxu1 %v15401_v19 }
 0x129   :  { %13937 = vmatpush3.bf16.msra.mxu1 %v15763_v47 }
 0x12a   :  { %13938 = vmatprep.subr.bf16.mxu1 %v15401_v19 }
 0x12c   :  { %12603 = vmatmul.mubr.f32.vlgmr.msra.gmra.mrb[10].mxu1 %v1553_v1 }
 0x12d   :  { %13940 = vmatpush3.bf16.msra.mxu1 %v15801_v2  ;;  %12613 = vmatprep.mubr.msk.f32.mxu1 %vm15402_vm2, %v15400_v0 }
 0x12e   :  { %13941 = vmatprep.subr.bf16.mxu1 %v15401_v19 }
 0x131   :  { %13943 = vmatpush3.bf16.msra.mxu1 %v15805_v5 }
 0x132   :  { %13944 = vmatprep.subr.bf16.mxu1 %v15401_v19 }
 0x134   :  { %12614 = vmatmul.mubr.f32.vlgmr.msra.gmra.mrb[10].mxu1 %v15788_v31 }
 0x135   :  { %13946 = vmatpush3.bf16.msra.mxu1 %v15811_v6  ;;  %12624 = vmatprep.mubr.msk.f32.mxu1 %vm15402_vm2, %v15400_v0 }
 0x136   :  { %13947 = vmatprep.subr.bf16.mxu1 %v15401_v19 }
 0x139   :  { %13949 = vmatpush3.bf16.msra.mxu1 %v15816_v7 }
 0x13a   :  { %13950 = vmatprep.subr.bf16.mxu1 %v15401_v19 }
 0x13c   :  { %12625 = vmatmul.mubr.f32.vlgmr.msra.gmra.mrb[10].mxu1 %v1550_v49 }
 0x13d   :  { %13952 = vmatpush3.bf16.msra.mxu1 %v15754_v43  ;;  %12635 = vmatprep.mubr.msk.f32.mxu1 %vm15402_vm2, %v15400_v0 }
 0x13e   :  { %13953 = vmatprep.subr.bf16.mxu1 %v15401_v19 }
 0x141   :  { %13955 = vmatpush3.bf16.msra.mxu1 %v15763_v47 }
 0x142   :  { %13956 = vmatprep.subr.bf16.mxu1 %v15401_v19 }
 0x144   :  { %12636 = vmatmul.mubr.f32.vlgmr.msra.gmra.mrb[10].mxu1 %v1551_v54 }
 0x145   :  { %13958 = vmatpush3.bf16.msra.mxu1 %v15828_v8  ;;  %12646 = vmatprep.mubr.msk.f32.mxu1 %vm15402_vm2, %v15400_v0 }
 0x146   :  { %13959 = vmatprep.subr.bf16.mxu1 %v15401_v19 }
 0x149   :  { %13961 = vmatpush3.bf16.msra.mxu1 %v15832_v9 }
 0x14a   :  { %13962 = vmatprep.subr.bf16.mxu1 %v15401_v19 }
 0x14c   :  { %12647 = vmatmul.mubr.f32.vlgmr.msra.gmra.mrb[10].mxu1 %v15788_v31 }
 0x14d   :  { %13964 = vmatpush3.bf16.msra.mxu1 %v15754_v43  ;;  %12657 = vmatprep.mubr.msk.f32.mxu1 %vm15402_vm2, %v15400_v0 }
 0x14e   :  { %13965 = vmatprep.subr.bf16.mxu1 %v15401_v19 }
 0x151   :  { %13967 = vmatpush3.bf16.msra.mxu1 %v15763_v47 }
 0x152   :  { %13968 = vmatprep.subr.bf16.mxu1 %v15401_v19 }
 0x154   :  { %12658 = vmatmul.mubr.f32.vlgmr.msra.gmra.mrb[10].mxu1 %v15788_v31 }
 0x155   :  { %13970 = vmatpush3.bf16.msra.mxu1 %v15754_v43  ;;  %12668 = vmatprep.mubr.msk.f32.mxu1 %vm15402_vm2, %v15400_v0 }
 0x156   :  { %13971 = vmatprep.subr.bf16.mxu1 %v15401_v19 }
 0x159   :  { %13973 = vmatpush3.bf16.msra.mxu1 %v15763_v47 }
 0x15a   :  { %13974 = vmatprep.subr.bf16.mxu1 %v15401_v19 }
 0x1b7   :  { %v12478_v11 = vpop.f32.mrb[0].mxu1 }
 0x1b8   :  { %v443_v12 = vpop.f32.mrb[1].mxu1 }
 0x1bb   :  { %v12481_v13 = vpop.f32.mrb[2].mxu1 }
 0x1bc   :  { %v455_v14 = vpop.f32.mrb[3].mxu1 }
 0x1bf   :  { %v12484_v16 = vpop.f32.mrb[4].mxu1 }
 0x1c0   :  { %v467_v17 = vpop.f32.mrb[5].mxu1 }
 0x1cb   :  { %v12503_v22 = vpop.f32.mrb[6].mxu1 }
 0x1cc   :  { %v603_v23 = vpop.f32.mrb[7].mxu1 }
 0x1d1   :  { %v12542_v24 = vpop.f32.mrb[0].mxu0 }
 0x1d2   :  { %v14606_v25 = vadd.f32 %v12542_v24, %v12478_v11  ;;  %v933_v26 = vpop.f32.mrb[1].mxu0 }
 0x1d3   :  { %v14607_v27 = vadd.f32 %v933_v26, %v443_v12 }
 0x1d5   :  { %v12545_v28 = vpop.f32.mrb[2].mxu0 }
 0x1d6   :  { %v14608_v29 = vadd.f32 %v12545_v28, %v12481_v13  ;;  %v945_v30 = vpop.f32.mrb[3].mxu0 }
 0x1d7   :  { %v14609_v32 = vadd.f32 %v945_v30, %v455_v14 }
 0x1d9   :  { %v12548_v15 = vpop.f32.mrb[4].mxu0 }
 0x1da   :  { %v14610_v33 = vadd.f32 %v12548_v15, %v12484_v16  ;;  %v957_v34 = vpop.f32.mrb[5].mxu0 }
 0x1db   :  { %v14611_v35 = vadd.f32 %v957_v34, %v467_v17 }
 0x1dd   :  { %v12551_v36 = vpop.f32.mrb[6].mxu0 }
 0x1de   :  { %v14612_v37 = vadd.f32 %v12551_v36, %v12503_v22  ;;  %v969_v38 = vpop.f32.mrb[7].mxu0 }
 0x1df   :  { %v14613_v39 = vadd.f32 %v969_v38, %v603_v23 }
 0x1f7   :  { %v1447_v41 = vpop.f32.mrb[8].mxu1 }
 0x1f8   :  { %v14614_v42 = vadd.f32 %v11735_v40, %v1447_v41  ;;  %v12593_v45 = vpop.f32.mrb[9].mxu1 }
 0x1fa   :  { %v1451_v46 = vadd.f32 %v14614_v42, %v14607_v27  ;;  %v15853_v10 = vadd.f32 %v14614_v42, %v14606_v25  ;;  %v15855_v18 = vadd.f32 %v14614_v42, %v14609_v32  ;;  %v15857_v20 = vadd.f32 %v14614_v42, %v14608_v29 }
 0x1fb   :  { %v15859_v21 = vadd.f32 %v14614_v42, %v14611_v35  ;;  %v15861_v31 = vadd.f32 %v14614_v42, %v14610_v33  ;;  %v15863_v44 = vadd.f32 %v14614_v42, %v14613_v39  ;;  %v15865_v48 = vadd.f32 %v14614_v42, %v14612_v37 }
 0x227   :  { %v1961_v49 = vpop.f32.mrb[10].mxu1 }
 0x228   :  { %v1965_v50 = vadd.f32 %v1961_v49, %v1451_v46  ;;  %v12659_v51 = vpop.f32.mrb[11].mxu1 }
 0x22a   :  { %14935 = vtanh.f32 %v1965_v50  ;;  %v11736_v54 = vmul.f32 -1.442695, %v1965_v50 }
 0x22c   :  { %14937 = vpow2.f32 %v11736_v54 }
 0x234   :  { %v14936_v52 = vpop.eup %14935 }
 0x235   :  { %1979 = vrot.lane.b32.xlu0 %v14936_v52, %s15403_s10 }
 0x236   :  { %v14938_v55 = vpop.eup %14937 }
 0x237   :  { %v1969_v56 = vadd.f32 1.0, %v14938_v55 }
 0x239   :  { %1974 = vrot.lane.b32.xlu0 %v1475_v53, %s15404_s23  ;;  %14939 = vrcp.f32 %v1969_v56 }
 0x243   :  { %v14940_v57 = vpop.eup %14939 }
 0x2a7   :  { %v1980_v58 = vpop.permute.xlu0 %1979 }
 0x2a8   :  { %v1982_v59 = vmul.f32 %v14940_v57, %v1980_v58 }
 0x2aa   :  { %1984 = vrot.lane.b32.xlu1 %v1982_v59, %s15404_s23 }
 0x2ab   :  { %v1975_v60 = vpop.permute.xlu0 %1974 }
 0x2ac   :  { %v1977_v61 = vmul.f32 %v14940_v57, %v1975_v60 }
 0x31c   :  { %v1985_v62 = vpop.permute.xlu1 %1984 }
 0x31d   :  { %v1987_v63 = vadd.f32 %v1985_v62, %v1977_v61 }
 0x31f   :  { %14941 = vtanh.f32 %v1987_v63 }
 0x329   :  { %v14942_v1 = vpop.eup %14941 }
 0x32a   :  { %1990 = vrot.lane.b32.xlu1 %v14942_v1, %s15403_s10 }
 0x32e   :  { %2000 = vrot.lane.b32.xlu1 %v1987_v63, %s15405_s28 }
 0x39c   :  { %v1991_v3 = vpop.permute.xlu1 %1990 }
 0x39d   :  { %v1993_v4 = vmul.f32 %v14940_v57, %v1991_v3 }
 0x39f   :  { %1995 = vrot.lane.b32.xlu0 %v1993_v4, %s15404_s23 }
 0x3a0   :  { %v2001_v11 = vpop.permute.xlu1 %2000 }
 0x3a1   :  { %2003 = vst.msk [vmem:[#allocation5] sm:$0xff] %vm1471_vm0, %v2001_v11 }
 0x3a8   :  { %v2006_v12 = vld [vmem:[#allocation5] sm:$0xff] }
 0x3a9   :  { %2506 = vrot.lane.b32.xlu1 %v2006_v12, %s15404_s23 }
 0x411   :  { %v1996_v13 = vpop.permute.xlu0 %1995 }
 0x412   :  { %1998 = vst.msk [vmem:[#allocation4] sm:$0xff] %vm1471_vm0, %v1996_v13  ;;  %2004 = vst.msk [vmem:[#allocation3] sm:$0xff] %vm1471_vm0, %v1996_v13 }
 0x419   :  { %v2005_v14 = vld [vmem:[#allocation4] sm:$0xff] }
 0x41a   :  { %v2010_v16 = vsel %vm1471_vm0, %v2005_v14, 0 }
 0x41b   :  { %v2081_v17 = vand.u32 4294901760, %v2010_v16  ;;  %v2507_v36 = vpop.permute.xlu1 %2506 }
 0x41d   :  { %v2082_v22 = vsub.f32 %v2010_v16, %v2081_v17 }
 0x41f   :  { %v2083_v23 = vand.u32 4294901760, %v2082_v22 }
 0x421   :  { %v2084_v24 = vsub.f32 %v2082_v22, %v2083_v23 }
 0x423   :  { %v2085_v25 = vand.u32 4294901760, %v2084_v24 }
 0x425   :  { %12669 = vmatmul.mubr.f32.vlgmr.msra.gmra.mrb[12].mxu1 %v2085_v25 }
 0x426   :  { %13976 = vmatpush3.bf16.msra.mxu1 %v15801_v2  ;;  %12679 = vmatprep.mubr.msk.f32.mxu1 %vm15402_vm2, %v15400_v0 }
 0x427   :  { %13977 = vmatprep.subr.bf16.mxu1 %v15401_v19 }
 0x42a   :  { %13979 = vmatpush3.bf16.msra.mxu1 %v15805_v5 }
 0x42b   :  { %13980 = vmatprep.subr.bf16.mxu1 %v15401_v19 }
 0x42d   :  { %12680 = vmatmul.mubr.f32.vlgmr.msra.gmra.mrb[12].mxu1 %v2081_v17 }
 0x42e   :  { %13982 = vmatpush3.bf16.msra.mxu1 %v15811_v6  ;;  %12690 = vmatprep.mubr.msk.f32.mxu1 %vm15402_vm2, %v15400_v0 }
 0x42f   :  { %13983 = vmatprep.subr.bf16.mxu1 %v15401_v19 }
 0x432   :  { %13985 = vmatpush3.bf16.msra.mxu1 %v15816_v7 }
 0x433   :  { %13986 = vmatprep.subr.bf16.mxu1 %v15401_v19 }
 0x435   :  { %12691 = vmatmul.mubr.f32.vlgmr.msra.gmra.mrb[12].mxu1 %v2082_v22 }
 0x436   :  { %13988 = vmatpush3.bf16.msra.mxu1 %v15754_v43  ;;  %12701 = vmatprep.mubr.msk.f32.mxu1 %vm15402_vm2, %v15400_v0 }
 0x437   :  { %13989 = vmatprep.subr.bf16.mxu1 %v15401_v19 }
 0x43a   :  { %13991 = vmatpush3.bf16.msra.mxu1 %v15763_v47 }
 0x43b   :  { %13992 = vmatprep.subr.bf16.mxu1 %v15401_v19 }
 0x43d   :  { %12702 = vmatmul.mubr.f32.vlgmr.msra.gmra.mrb[12].mxu1 %v2083_v23 }
 0x43e   :  { %13994 = vmatpush3.bf16.msra.mxu1 %v15828_v8  ;;  %12712 = vmatprep.mubr.msk.f32.mxu1 %vm15402_vm2, %v15400_v0 }
 0x43f   :  { %13995 = vmatprep.subr.bf16.mxu1 %v15401_v19 }
 0x442   :  { %13997 = vmatpush3.bf16.msra.mxu1 %v15832_v9 }
 0x443   :  { %13998 = vmatprep.subr.bf16.mxu1 %v15401_v19 }
 0x445   :  { %12713 = vmatmul.mubr.f32.vlgmr.msra.gmra.mrb[12].mxu1 %v2081_v17 }
 0x446   :  { %14000 = vmatpush3.bf16.msra.mxu1 %v15754_v43  ;;  %12723 = vmatprep.mubr.msk.f32.mxu1 %vm15402_vm2, %v15400_v0 }
 0x447   :  { %14001 = vmatprep.subr.bf16.mxu1 %v15401_v19 }
 0x44a   :  { %14003 = vmatpush3.bf16.msra.mxu1 %v15763_v47 }
 0x44b   :  { %14040 = vmatprep.subr.bf16.mxu1 %v15401_v19 }
 0x44d   :  { %12724 = vmatmul.mubr.f32.vlgmr.msra.gmra.mrb[12].mxu1 %v2081_v17 }
 0x44e   :  { %14042 = vmatpush3.bf16.msra.mxu1 %v15754_v43  ;;  %12800 = vmatprep.mubr.msk.f32.mxu1 %vm15402_vm2, %v15400_v0 }
 0x44f   :  { %14043 = vmatprep.subr.bf16.mxu1 %v15401_v19 }
 0x452   :  { %14045 = vmatpush3.bf16.msra.mxu1 %v15763_v47 }
 0x453   :  { %14046 = vmatprep.subr.bf16.mxu1 %v15401_v19 }
 0x520   :  { %v2493_v26 = vpop.f32.mrb[12].mxu1 }
 0x521   :  { %v2497_v27 = vadd.f32 %v2493_v26, %v15853_v10  ;;  %v12725_v28 = vpop.f32.mrb[13].mxu1 }
 0x523   :  { %14943 = vtanh.f32 %v2497_v27  ;;  %v11737_v30 = vmul.f32 -1.442695, %v2497_v27 }
 0x525   :  { %14945 = vpow2.f32 %v11737_v30 }
 0x52d   :  { %v14944_v29 = vpop.eup %14943 }
 0x52e   :  { %2511 = vrot.lane.b32.xlu0 %v14944_v29, %s15403_s10 }
 0x52f   :  { %v14946_v32 = vpop.eup %14945 }
 0x530   :  { %v2501_v15 = vadd.f32 1.0, %v14946_v32 }
 0x532   :  { %14947 = vrcp.f32 %v2501_v15 }
 0x53c   :  { %v14948_v33 = vpop.eup %14947 }
 0x53d   :  { %v2509_v37 = vmul.f32 %v14948_v33, %v2507_v36 }
 0x5a0   :  { %v2512_v34 = vpop.permute.xlu0 %2511 }
 0x5a1   :  { %v2514_v35 = vmul.f32 %v14948_v33, %v2512_v34 }
 0x5a3   :  { %2516 = vrot.lane.b32.xlu0 %v2514_v35, %s15404_s23 }
 0x615   :  { %v2517_v38 = vpop.permute.xlu0 %2516 }
 0x616   :  { %v2519_v39 = vadd.f32 %v2517_v38, %v2509_v37 }
 0x618   :  { %14949 = vtanh.f32 %v2519_v39 }
 0x622   :  { %v14950_v40 = vpop.eup %14949 }
 0x623   :  { %2522 = vrot.lane.b32.xlu1 %v14950_v40, %s15403_s10 }
 0x627   :  { %2532 = vrot.lane.b32.xlu1 %v2519_v39, %s15405_s28 }
 0x695   :  { %v2523_v41 = vpop.permute.xlu1 %2522 }
 0x696   :  { %v2525_v42 = vmul.f32 %v14948_v33, %v2523_v41 }
 0x698   :  { %2527 = vrot.lane.b32.xlu0 %v2525_v42, %s15404_s23 }
 0x699   :  { %v2533_v45 = vpop.permute.xlu1 %2532 }
 0x69a   :  { %2535 = vst.msk [vmem:[#allocation5] sm:$0xff] %vm1471_vm0, %v2533_v45 }
 0x6a1   :  { %v2539_v46 = vld [vmem:[#allocation5] sm:$0xff] }
 0x6a2   :  { %3039 = vrot.lane.b32.xlu1 %v2539_v46, %s15404_s23 }
 0x70a   :  { %v2528_v10 = vpop.permute.xlu0 %2527 }
 0x70b   :  { %2530 = vst.msk [vmem:[#allocation4] sm:$0xff] %vm1471_vm0, %v2528_v10  ;;  %2537 = vst.msk [vmem:[#allocation3 + $0x8] sm:$0xff] %vm1471_vm0, %v2528_v10 }
 0x712   :  { %v2538_v49 = vld [vmem:[#allocation4] sm:$0xff] }
 0x713   :  { %v2543_v50 = vsel %vm1471_vm0, %v2538_v49, 0 }
 0x714   :  { %v2614_v51 = vand.u32 4294901760, %v2543_v50  ;;  %v3040_v4 = vpop.permute.xlu1 %3039 }
 0x716   :  { %v2615_v52 = vsub.f32 %v2543_v50, %v2614_v51 }
 0x718   :  { %v2616_v53 = vand.u32 4294901760, %v2615_v52 }
 0x71a   :  { %v2617_v54 = vsub.f32 %v2615_v52, %v2616_v53 }
 0x71c   :  { %v2618_v55 = vand.u32 4294901760, %v2617_v54 }
 0x71e   :  { %12735 = vmatmul.mubr.f32.vlgmr.msra.gmra.mrb[8].mxu0 %v2618_v55 }
 0x71f   :  { %14012 = vmatpush3.bf16.msra.mxu0 %v15801_v2  ;;  %12745 = vmatprep.mubr.msk.f32.mxu0 %vm15402_vm2, %v15400_v0 }
 0x720   :  { %14013 = vmatprep.subr.bf16.mxu0 %v15401_v19 }
 0x723   :  { %14015 = vmatpush3.bf16.msra.mxu0 %v15805_v5 }
 0x724   :  { %14016 = vmatprep.subr.bf16.mxu0 %v15401_v19 }
 0x726   :  { %12746 = vmatmul.mubr.f32.vlgmr.msra.gmra.mrb[8].mxu0 %v2614_v51 }
 0x727   :  { %14018 = vmatpush3.bf16.msra.mxu0 %v15811_v6  ;;  %12756 = vmatprep.mubr.msk.f32.mxu0 %vm15402_vm2, %v15400_v0 }
 0x728   :  { %14019 = vmatprep.subr.bf16.mxu0 %v15401_v19 }
 0x72b   :  { %14021 = vmatpush3.bf16.msra.mxu0 %v15816_v7 }
 0x72c   :  { %14022 = vmatprep.subr.bf16.mxu0 %v15401_v19 }
 0x72e   :  { %12757 = vmatmul.mubr.f32.vlgmr.msra.gmra.mrb[8].mxu0 %v2615_v52 }
 0x72f   :  { %14024 = vmatpush3.bf16.msra.mxu0 %v15754_v43  ;;  %12767 = vmatprep.mubr.msk.f32.mxu0 %vm15402_vm2, %v15400_v0 }
 0x730   :  { %14025 = vmatprep.subr.bf16.mxu0 %v15401_v19 }
 0x733   :  { %14027 = vmatpush3.bf16.msra.mxu0 %v15763_v47 }
 0x734   :  { %14028 = vmatprep.subr.bf16.mxu0 %v15401_v19 }
 0x736   :  { %12768 = vmatmul.mubr.f32.vlgmr.msra.gmra.mrb[8].mxu0 %v2616_v53 }
 0x737   :  { %14030 = vmatpush3.bf16.msra.mxu0 %v15828_v8  ;;  %12778 = vmatprep.mubr.msk.f32.mxu0 %vm15402_vm2, %v15400_v0 }
 0x738   :  { %14031 = vmatprep.subr.bf16.mxu0 %v15401_v19 }
 0x73b   :  { %14033 = vmatpush3.bf16.msra.mxu0 %v15832_v9 }
 0x73c   :  { %14034 = vmatprep.subr.bf16.mxu0 %v15401_v19 }
 0x73e   :  { %12779 = vmatmul.mubr.f32.vlgmr.msra.gmra.mrb[8].mxu0 %v2614_v51 }
 0x73f   :  { %14036 = vmatpush3.bf16.msra.mxu0 %v15754_v43  ;;  %12789 = vmatprep.mubr.msk.f32.mxu0 %vm15402_vm2, %v15400_v0 }
 0x740   :  { %14037 = vmatprep.subr.bf16.mxu0 %v15401_v19 }
 0x743   :  { %14039 = vmatpush3.bf16.msra.mxu0 %v15763_v47 }
 0x744   :  { %14076 = vmatprep.subr.bf16.mxu0 %v15401_v19 }
 0x746   :  { %12790 = vmatmul.mubr.f32.vlgmr.msra.gmra.mrb[8].mxu0 %v2614_v51 }
 0x747   :  { %14078 = vmatpush3.bf16.msra.mxu0 %v15754_v43  ;;  %12866 = vmatprep.mubr.msk.f32.mxu0 %vm15402_vm2, %v15400_v0 }
 0x748   :  { %14079 = vmatprep.subr.bf16.mxu0 %v15401_v19 }
 0x74b   :  { %14081 = vmatpush3.bf16.msra.mxu0 %v15763_v47 }
 0x74c   :  { %14082 = vmatprep.subr.bf16.mxu0 %v15401_v19 }
 0x819   :  { %v3026_v56 = vpop.f32.mrb[8].mxu0 }
 0x81a   :  { %v3030_v57 = vadd.f32 %v3026_v56, %v15855_v18  ;;  %v12791_v58 = vpop.f32.mrb[9].mxu0 }
 0x81c   :  { %14951 = vtanh.f32 %v3030_v57  ;;  %v11738_v60 = vmul.f32 -1.442695, %v3030_v57 }
 0x81e   :  { %14953 = vpow2.f32 %v11738_v60 }
 0x826   :  { %v14952_v59 = vpop.eup %14951 }
 0x827   :  { %3044 = vrot.lane.b32.xlu0 %v14952_v59, %s15403_s10 }
 0x828   :  { %v14954_v61 = vpop.eup %14953 }
 0x829   :  { %v3034_v62 = vadd.f32 1.0, %v14954_v61 }
 0x82b   :  { %14955 = vrcp.f32 %v3034_v62 }
 0x835   :  { %v14956_v63 = vpop.eup %14955 }
 0x836   :  { %v3042_v11 = vmul.f32 %v14956_v63, %v3040_v4 }
 0x899   :  { %v3045_v1 = vpop.permute.xlu0 %3044 }
 0x89a   :  { %v3047_v3 = vmul.f32 %v14956_v63, %v3045_v1 }
 0x89c   :  { %3049 = vrot.lane.b32.xlu0 %v3047_v3, %s15404_s23 }
 0x90e   :  { %v3050_v12 = vpop.permute.xlu0 %3049 }
 0x90f   :  { %v3052_v13 = vadd.f32 %v3050_v12, %v3042_v11 }
 0x911   :  { %14957 = vtanh.f32 %v3052_v13 }
 0x91b   :  { %v14958_v18 = vpop.eup %14957 }
 0x91c   :  { %3055 = vrot.lane.b32.xlu1 %v14958_v18, %s15403_s10 }
 0x920   :  { %3065 = vrot.lane.b32.xlu1 %v3052_v13, %s15405_s28 }
 0x98e   :  { %v3056_v14 = vpop.permute.xlu1 %3055 }
 0x98f   :  { %v3058_v16 = vmul.f32 %v14956_v63, %v3056_v14 }
 0x991   :  { %3060 = vrot.lane.b32.xlu0 %v3058_v16, %s15404_s23 }
 0x992   :  { %v3066_v17 = vpop.permute.xlu1 %3065 }
 0x993   :  { %3068 = vst.msk [vmem:[#allocation5] sm:$0xff] %vm1471_vm0, %v3066_v17 }
 0x99a   :  { %v3072_v22 = vld [vmem:[#allocation5] sm:$0xff] }
 0x99b   :  { %3572 = vrot.lane.b32.xlu1 %v3072_v22, %s15404_s23 }
 0xa03   :  { %v3061_v23 = vpop.permute.xlu0 %3060 }
 0xa04   :  { %3063 = vst.msk [vmem:[#allocation4] sm:$0xff] %vm1471_vm0, %v3061_v23  ;;  %3070 = vst.msk [vmem:[#allocation3 + $0x10] sm:$0xff] %vm1471_vm0, %v3061_v23 }
 0xa0b   :  { %v3071_v24 = vld [vmem:[#allocation4] sm:$0xff] }
 0xa0c   :  { %v3076_v25 = vsel %vm1471_vm0, %v3071_v24, 0 }
 0xa0d   :  { %v3147_v26 = vand.u32 4294901760, %v3076_v25  ;;  %v3573_v41 = vpop.permute.xlu1 %3572 }
 0xa0f   :  { %v3148_v27 = vsub.f32 %v3076_v25, %v3147_v26 }
 0xa11   :  { %v3149_v28 = vand.u32 4294901760, %v3148_v27 }
 0xa13   :  { %v3150_v29 = vsub.f32 %v3148_v27, %v3149_v28 }
 0xa15   :  { %v3151_v30 = vand.u32 4294901760, %v3150_v29 }
 0xa17   :  { %12801 = vmatmul.mubr.f32.vlgmr.msra.gmra.mrb[14].mxu1 %v3151_v30 }
 0xa18   :  { %14048 = vmatpush3.bf16.msra.mxu1 %v15801_v2  ;;  %12811 = vmatprep.mubr.msk.f32.mxu1 %vm15402_vm2, %v15400_v0 }
 0xa19   :  { %14049 = vmatprep.subr.bf16.mxu1 %v15401_v19 }
 0xa1c   :  { %14051 = vmatpush3.bf16.msra.mxu1 %v15805_v5 }
 0xa1d   :  { %14052 = vmatprep.subr.bf16.mxu1 %v15401_v19 }
 0xa1f   :  { %12812 = vmatmul.mubr.f32.vlgmr.msra.gmra.mrb[14].mxu1 %v3147_v26 }
 0xa20   :  { %14054 = vmatpush3.bf16.msra.mxu1 %v15811_v6  ;;  %12822 = vmatprep.mubr.msk.f32.mxu1 %vm15402_vm2, %v15400_v0 }
 0xa21   :  { %14055 = vmatprep.subr.bf16.mxu1 %v15401_v19 }
 0xa24   :  { %14057 = vmatpush3.bf16.msra.mxu1 %v15816_v7 }
 0xa25   :  { %14058 = vmatprep.subr.bf16.mxu1 %v15401_v19 }
 0xa27   :  { %12823 = vmatmul.mubr.f32.vlgmr.msra.gmra.mrb[14].mxu1 %v3148_v27 }
 0xa28   :  { %14060 = vmatpush3.bf16.msra.mxu1 %v15754_v43  ;;  %12833 = vmatprep.mubr.msk.f32.mxu1 %vm15402_vm2, %v15400_v0 }
 0xa29   :  { %14061 = vmatprep.subr.bf16.mxu1 %v15401_v19 }
 0xa2c   :  { %14063 = vmatpush3.bf16.msra.mxu1 %v15763_v47 }
 0xa2d   :  { %14064 = vmatprep.subr.bf16.mxu1 %v15401_v19 }
 0xa2f   :  { %12834 = vmatmul.mubr.f32.vlgmr.msra.gmra.mrb[14].mxu1 %v3149_v28 }
 0xa30   :  { %14066 = vmatpush3.bf16.msra.mxu1 %v15828_v8  ;;  %12844 = vmatprep.mubr.msk.f32.mxu1 %vm15402_vm2, %v15400_v0 }
 0xa31   :  { %14067 = vmatprep.subr.bf16.mxu1 %v15401_v19 }
 0xa34   :  { %14069 = vmatpush3.bf16.msra.mxu1 %v15832_v9 }
 0xa35   :  { %14070 = vmatprep.subr.bf16.mxu1 %v15401_v19 }
 0xa37   :  { %12845 = vmatmul.mubr.f32.vlgmr.msra.gmra.mrb[14].mxu1 %v3147_v26 }
 0xa38   :  { %14072 = vmatpush3.bf16.msra.mxu1 %v15754_v43  ;;  %12855 = vmatprep.mubr.msk.f32.mxu1 %vm15402_vm2, %v15400_v0 }
 0xa39   :  { %14073 = vmatprep.subr.bf16.mxu1 %v15401_v19 }
 0xa3c   :  { %14075 = vmatpush3.bf16.msra.mxu1 %v15763_v47 }
 0xa3d   :  { %14112 = vmatprep.subr.bf16.mxu1 %v15401_v19 }
 0xa3f   :  { %12856 = vmatmul.mubr.f32.vlgmr.msra.gmra.mrb[14].mxu1 %v3147_v26 }
 0xa40   :  { %14114 = vmatpush3.bf16.msra.mxu1 %v15754_v43  ;;  %12932 = vmatprep.mubr.msk.f32.mxu1 %vm15402_vm2, %v15400_v0 }
 0xa41   :  { %14115 = vmatprep.subr.bf16.mxu1 %v15401_v19 }
 0xa44   :  { %14117 = vmatpush3.bf16.msra.mxu1 %v15763_v47 }
 0xa45   :  { %14118 = vmatprep.subr.bf16.mxu1 %v15401_v19 }
 0xb12   :  { %v3559_v32 = vpop.f32.mrb[14].mxu1 }
 0xb13   :  { %v3563_v15 = vadd.f32 %v3559_v32, %v15857_v20  ;;  %v12857_v33 = vpop.f32.mrb[15].mxu1 }
 0xb15   :  { %14959 = vtanh.f32 %v3563_v15  ;;  %v11739_v35 = vmul.f32 -1.442695, %v3563_v15 }
 0xb17   :  { %14961 = vpow2.f32 %v11739_v35 }
 0xb1f   :  { %v14960_v34 = vpop.eup %14959 }
 0xb20   :  { %3577 = vrot.lane.b32.xlu0 %v14960_v34, %s15403_s10 }
 0xb21   :  { %v14962_v36 = vpop.eup %14961 }
 0xb22   :  { %v3567_v37 = vadd.f32 1.0, %v14962_v36 }
 0xb24   :  { %14963 = vrcp.f32 %v3567_v37 }
 0xb2e   :  { %v14964_v38 = vpop.eup %14963 }
 0xb2f   :  { %v3575_v42 = vmul.f32 %v14964_v38, %v3573_v41 }
 0xb92   :  { %v3578_v39 = vpop.permute.xlu0 %3577 }
 0xb93   :  { %v3580_v40 = vmul.f32 %v14964_v38, %v3578_v39 }
 0xb95   :  { %3582 = vrot.lane.b32.xlu0 %v3580_v40, %s15404_s23 }
 0xc07   :  { %v3583_v45 = vpop.permute.xlu0 %3582 }
 0xc08   :  { %v3585_v46 = vadd.f32 %v3583_v45, %v3575_v42 }
 0xc0a   :  { %14965 = vtanh.f32 %v3585_v46 }
 0xc14   :  { %v14966_v20 = vpop.eup %14965 }
 0xc15   :  { %3588 = vrot.lane.b32.xlu1 %v14966_v20, %s15403_s10 }
 0xc19   :  { %3598 = vrot.lane.b32.xlu1 %v3585_v46, %s15405_s28 }
 0xc87   :  { %v3589_v10 = vpop.permute.xlu1 %3588 }
 0xc88   :  { %v3591_v49 = vmul.f32 %v14964_v38, %v3589_v10 }
 0xc8a   :  { %3593 = vrot.lane.b32.xlu0 %v3591_v49, %s15404_s23 }
 0xc8b   :  { %v3599_v50 = vpop.permute.xlu1 %3598 }
 0xc8c   :  { %3601 = vst.msk [vmem:[#allocation5] sm:$0xff] %vm1471_vm0, %v3599_v50 }
 0xc93   :  { %v3605_v51 = vld [vmem:[#allocation5] sm:$0xff] }
 0xc94   :  { %4105 = vrot.lane.b32.xlu1 %v3605_v51, %s15404_s23 }
 0xcfc   :  { %v3594_v52 = vpop.permute.xlu0 %3593 }
 0xcfd   :  { %3596 = vst.msk [vmem:[#allocation4] sm:$0xff] %vm1471_vm0, %v3594_v52  ;;  %3603 = vst.msk [vmem:[#allocation3 + $0x18] sm:$0xff] %vm1471_vm0, %v3594_v52 }
 0xd04   :  { %v3604_v53 = vld [vmem:[#allocation4] sm:$0xff] }
 0xd05   :  { %v3609_v54 = vsel %vm1471_vm0, %v3604_v53, 0 }
 0xd06   :  { %v3680_v55 = vand.u32 4294901760, %v3609_v54  ;;  %v4106_v18 = vpop.permute.xlu1 %4105 }
 0xd08   :  { %v3681_v56 = vsub.f32 %v3609_v54, %v3680_v55 }
 0xd0a   :  { %v3682_v57 = vand.u32 4294901760, %v3681_v56 }
 0xd0c   :  { %v3683_v58 = vsub.f32 %v3681_v56, %v3682_v57 }
 0xd0e   :  { %v3684_v59 = vand.u32 4294901760, %v3683_v58 }
 0xd10   :  { %12867 = vmatmul.mubr.f32.vlgmr.msra.gmra.mrb[10].mxu0 %v3684_v59 }
 0xd11   :  { %14084 = vmatpush3.bf16.msra.mxu0 %v15801_v2  ;;  %12877 = vmatprep.mubr.msk.f32.mxu0 %vm15402_vm2, %v15400_v0 }
 0xd12   :  { %14085 = vmatprep.subr.bf16.mxu0 %v15401_v19 }
 0xd15   :  { %14087 = vmatpush3.bf16.msra.mxu0 %v15805_v5 }
 0xd16   :  { %14088 = vmatprep.subr.bf16.mxu0 %v15401_v19 }
 0xd18   :  { %12878 = vmatmul.mubr.f32.vlgmr.msra.gmra.mrb[10].mxu0 %v3680_v55 }
 0xd19   :  { %14090 = vmatpush3.bf16.msra.mxu0 %v15811_v6  ;;  %12888 = vmatprep.mubr.msk.f32.mxu0 %vm15402_vm2, %v15400_v0 }
 0xd1a   :  { %14091 = vmatprep.subr.bf16.mxu0 %v15401_v19 }
 0xd1d   :  { %14093 = vmatpush3.bf16.msra.mxu0 %v15816_v7 }
 0xd1e   :  { %14094 = vmatprep.subr.bf16.mxu0 %v15401_v19 }
 0xd20   :  { %12889 = vmatmul.mubr.f32.vlgmr.msra.gmra.mrb[10].mxu0 %v3681_v56 }
 0xd21   :  { %14096 = vmatpush3.bf16.msra.mxu0 %v15754_v43  ;;  %12899 = vmatprep.mubr.msk.f32.mxu0 %vm15402_vm2, %v15400_v0 }
 0xd22   :  { %14097 = vmatprep.subr.bf16.mxu0 %v15401_v19 }
 0xd25   :  { %14099 = vmatpush3.bf16.msra.mxu0 %v15763_v47 }
 0xd26   :  { %14100 = vmatprep.subr.bf16.mxu0 %v15401_v19 }
 0xd28   :  { %12900 = vmatmul.mubr.f32.vlgmr.msra.gmra.mrb[10].mxu0 %v3682_v57 }
 0xd29   :  { %14102 = vmatpush3.bf16.msra.mxu0 %v15828_v8  ;;  %12910 = vmatprep.mubr.msk.f32.mxu0 %vm15402_vm2, %v15400_v0 }
 0xd2a   :  { %14103 = vmatprep.subr.bf16.mxu0 %v15401_v19 }
 0xd2d   :  { %14105 = vmatpush3.bf16.msra.mxu0 %v15832_v9 }
 0xd2e   :  { %14106 = vmatprep.subr.bf16.mxu0 %v15401_v19 }
 0xd30   :  { %12911 = vmatmul.mubr.f32.vlgmr.msra.gmra.mrb[10].mxu0 %v3680_v55 }
 0xd31   :  { %14108 = vmatpush3.bf16.msra.mxu0 %v15754_v43  ;;  %12921 = vmatprep.mubr.msk.f32.mxu0 %vm15402_vm2, %v15400_v0 }
 0xd32   :  { %14109 = vmatprep.subr.bf16.mxu0 %v15401_v19 }
 0xd35   :  { %14111 = vmatpush3.bf16.msra.mxu0 %v15763_v47 }
 0xd36   :  { %14148 = vmatprep.subr.bf16.mxu0 %v15401_v19 }
 0xd38   :  { %12922 = vmatmul.mubr.f32.vlgmr.msra.gmra.mrb[10].mxu0 %v3680_v55 }
 0xd39   :  { %14150 = vmatpush3.bf16.msra.mxu0 %v15754_v43  ;;  %12998 = vmatprep.mubr.msk.f32.mxu0 %vm15402_vm2, %v15400_v0 }
 0xd3a   :  { %14151 = vmatprep.subr.bf16.mxu0 %v15401_v19 }
 0xd3d   :  { %14153 = vmatpush3.bf16.msra.mxu0 %v15763_v47 }
 0xd3e   :  { %14154 = vmatprep.subr.bf16.mxu0 %v15401_v19 }
 0xe0b   :  { %v4092_v60 = vpop.f32.mrb[10].mxu0 }
 0xe0c   :  { %v4096_v61 = vadd.f32 %v4092_v60, %v15859_v21  ;;  %v12923_v62 = vpop.f32.mrb[11].mxu0 }
 0xe0d   :  { %v5740_v62 = vld [vmem:[#allocation3] sm:$0xff] }
 0xe0e   :  { %14967 = vtanh.f32 %v4096_v61  ;;  %v11740_v1 = vmul.f32 -1.442695, %v4096_v61 }
 0xe10   :  { %14969 = vpow2.f32 %v11740_v1 }
 0xe18   :  { %v14968_v63 = vpop.eup %14967 }
 0xe19   :  { %4110 = vrot.lane.b32.xlu0 %v14968_v63, %s15403_s10  ;;  %v5760_v63 = vsel %vm1471_vm0, %v5740_v62, 0 }
 0xe1a   :  { %v14970_v3 = vpop.eup %14969  ;;  %v16136_v1 = vand.u32 4294901760, %v5760_v63 }
 0xe1b   :  { %v4100_v4 = vadd.f32 1.0, %v14970_v3  ;;  %v5741_v3 = vld [vmem:[#allocation3 + $0x8] sm:$0xff] }
 0xe1d   :  { %14971 = vrcp.f32 %v4100_v4  ;;  %v5742_v4 = vld [vmem:[#allocation3 + $0x10] sm:$0xff] }
 0xe27   :  { %v14972_v11 = vpop.eup %14971 }
 0xe28   :  { %v4108_v14 = vmul.f32 %v14972_v11, %v4106_v18  ;;  %v16148_v18 = vsub.f32 %v5760_v63, %v16136_v1 }
 0xe8b   :  { %v4111_v12 = vpop.permute.xlu0 %4110 }
 0xe8c   :  { %v4113_v13 = vmul.f32 %v14972_v11, %v4111_v12  ;;  %v16143_v12 = vld [vmem:[#allocation17] sm:$0xff] }
 0xe8e   :  { %4115 = vrot.lane.b32.xlu0 %v4113_v13, %s15404_s23  ;;  %v16145_v13 = vld [vmem:[#allocation17 + $0x8] sm:$0xff] }
 0xf00   :  { %v4116_v16 = vpop.permute.xlu0 %4115 }
 0xf01   :  { %v4118_v17 = vadd.f32 %v4116_v16, %v4108_v14  ;;  %v5766_v14 = vsel %vm1471_vm0, %v5742_v4, 0  ;;  %v5743_v16 = vld [vmem:[#allocation3 + $0x18] sm:$0xff] }
 0xf03   :  { %14973 = vtanh.f32 %v4118_v17 }
 0xf0d   :  { %v14974_v21 = vpop.eup %14973 }
 0xf0e   :  { %4121 = vrot.lane.b32.xlu1 %v14974_v21, %s15403_s10 }
 0xf12   :  { %4131 = vrot.lane.b32.xlu1 %v4118_v17, %s15405_s28 }
 0xf80   :  { %v4122_v22 = vpop.permute.xlu1 %4121 }
 0xf81   :  { %v4124_v23 = vmul.f32 %v14972_v11, %v4122_v22  ;;  %v5763_v11 = vsel %vm1471_vm0, %v5741_v3, 0  ;;  %v5784_v22 = vand.u32 4294901760, %v16143_v12 }
 0xf82   :  { %v16152_v17 = vand.u32 4294901760, %v5763_v11 }
 0xf83   :  { %4126 = vrot.lane.b32.xlu0 %v4124_v23, %s15404_s23  ;;  %v5787_v23 = vand.u32 4294901760, %v16145_v13 }
 0xf84   :  { %v4132_v24 = vpop.permute.xlu1 %4131 }
 0xf85   :  { %4134 = vst.msk [vmem:[#allocation5] sm:$0xff] %vm1471_vm0, %v4132_v24  ;;  %v5854_v24 = vand.u32 4294901760, %v16148_v18 }
 0xf8c   :  { %v4138_v25 = vld [vmem:[#allocation5] sm:$0xff] }
 0xf8d   :  { %4638 = vrot.lane.b32.xlu1 %v4138_v25, %s15404_s23  ;;  %v16158_v25 = vld [vmem:[#allocation17 + $0x10] sm:$0xff] }
 0xff5   :  { %v4127_v26 = vpop.permute.xlu0 %4126 }
 0xff6   :  { %4129 = vst.msk [vmem:[#allocation4] sm:$0xff] %vm1471_vm0, %v4127_v26  ;;  %4136 = vst.msk [vmem:[#allocation3 + $0x20] sm:$0xff] %vm1471_vm0, %v4127_v26  ;;  %v16160_v26 = vld [vmem:[#allocation17 + $0x18] sm:$0xff] }
 0xffd   :  { %v4137_v27 = vld [vmem:[#allocation4] sm:$0xff] }
 0xffe   :  { %v4142_v28 = vsel %vm1471_vm0, %v4137_v27, 0  ;;  %v5744_v21 = vld [vmem:[#allocation3 + $0x20] sm:$0xff]  ;;  %v16162_v27 = vand.u32 4294901760, %v5766_v14 }
 0xfff   :  { %v4213_v29 = vand.u32 4294901760, %v4142_v28  ;;  %v4639_v46 = vpop.permute.xlu1 %4638 }
0x1001   :  { %v4214_v30 = vsub.f32 %v4142_v28, %v4213_v29  ;;  %v5769_v28 = vsel %vm1471_vm0, %v5743_v16, 0 }
0x1003   :  { %v4215_v32 = vand.u32 4294901760, %v4214_v30 }
0x1005   :  { %v4216_v15 = vsub.f32 %v4214_v30, %v4215_v32 }
0x1007   :  { %v4217_v33 = vand.u32 4294901760, %v4216_v15  ;;  %v16178_v15 = vpack.c.bf16 %v5787_v23, %v5784_v22 }
0x1009   :  { %12933 = vmatmul.mubr.f32.vlgmr.msra.gmra.mrb[16].mxu1 %v4217_v33  ;;  %v5790_v33 = vand.u32 4294901760, %v16158_v25 }
0x100a   :  { %14120 = vmatpush3.bf16.msra.mxu1 %v15801_v2  ;;  %12943 = vmatprep.mubr.msk.f32.mxu1 %vm15402_vm2, %v15400_v0 }
0x100b   :  { %14121 = vmatprep.subr.bf16.mxu1 %v15401_v19 }
0x100e   :  { %14123 = vmatpush3.bf16.msra.mxu1 %v15805_v5 }
0x100f   :  { %14124 = vmatprep.subr.bf16.mxu1 %v15401_v19 }
0x1011   :  { %12944 = vmatmul.mubr.f32.vlgmr.msra.gmra.mrb[16].mxu1 %v4213_v29 }
0x1012   :  { %14126 = vmatpush3.bf16.msra.mxu1 %v15811_v6  ;;  %12954 = vmatprep.mubr.msk.f32.mxu1 %vm15402_vm2, %v15400_v0 }
0x1013   :  { %14127 = vmatprep.subr.bf16.mxu1 %v15401_v19 }
0x1016   :  { %14129 = vmatpush3.bf16.msra.mxu1 %v15816_v7 }
0x1017   :  { %14130 = vmatprep.subr.bf16.mxu1 %v15401_v19 }
0x1019   :  { %12955 = vmatmul.mubr.f32.vlgmr.msra.gmra.mrb[16].mxu1 %v4214_v30 }
0x101a   :  { %14132 = vmatpush3.bf16.msra.mxu1 %v15754_v43  ;;  %12965 = vmatprep.mubr.msk.f32.mxu1 %vm15402_vm2, %v15400_v0 }
0x101b   :  { %14133 = vmatprep.subr.bf16.mxu1 %v15401_v19 }
0x101e   :  { %14135 = vmatpush3.bf16.msra.mxu1 %v15763_v47 }
0x101f   :  { %14136 = vmatprep.subr.bf16.mxu1 %v15401_v19 }
0x1021   :  { %12966 = vmatmul.mubr.f32.vlgmr.msra.gmra.mrb[16].mxu1 %v4215_v32  ;;  %v16171_v32 = vsub.f32 %v5763_v11, %v16152_v17 }
0x1022   :  { %14138 = vmatpush3.bf16.msra.mxu1 %v15828_v8  ;;  %12976 = vmatprep.mubr.msk.f32.mxu1 %vm15402_vm2, %v15400_v0 }
0x1023   :  { %14139 = vmatprep.subr.bf16.mxu1 %v15401_v19 }
0x1026   :  { %14141 = vmatpush3.bf16.msra.mxu1 %v15832_v9 }
0x1027   :  { %14142 = vmatprep.subr.bf16.mxu1 %v15401_v19 }
0x1029   :  { %12977 = vmatmul.mubr.f32.vlgmr.msra.gmra.mrb[16].mxu1 %v4213_v29 }
0x102a   :  { %14144 = vmatpush3.bf16.msra.mxu1 %v15754_v43  ;;  %12987 = vmatprep.mubr.msk.f32.mxu1 %vm15402_vm2, %v15400_v0 }
0x102b   :  { %14145 = vmatprep.subr.bf16.mxu1 %v15401_v19 }
0x102e   :  { %14147 = vmatpush3.bf16.msra.mxu1 %v15763_v47 }
0x102f   :  { %14184 = vmatprep.subr.bf16.mxu1 %v15401_v19 }
0x1031   :  { %12988 = vmatmul.mubr.f32.vlgmr.msra.gmra.mrb[16].mxu1 %v4213_v29  ;;  %v5772_v29 = vsel %vm1471_vm0, %v5744_v21, 0 }
0x1032   :  { %14186 = vmatpush3.bf16.msra.mxu1 %v15754_v43  ;;  %13064 = vmatprep.mubr.msk.f32.mxu1 %vm15402_vm2, %v15400_v0 }
0x1033   :  { %14187 = vmatprep.subr.bf16.mxu1 %v15401_v19 }
0x1036   :  { %14189 = vmatpush3.bf16.msra.mxu1 %v15763_v47 }
0x1037   :  { %14190 = vmatprep.subr.bf16.mxu1 %v15401_v19 }
0x1104   :  { %v4625_v34 = vpop.f32.mrb[16].mxu1 }
0x1105   :  { %v4629_v35 = vadd.f32 %v4625_v34, %v15861_v31  ;;  %v12989_v36 = vpop.f32.mrb[17].mxu1  ;;  %v5793_v34 = vand.u32 4294901760, %v16160_v26 }
0x1106   :  { %v5855_v36 = vsub.f32 %v16148_v18, %v5854_v24 }
0x1107   :  { %14975 = vtanh.f32 %v4629_v35  ;;  %v11741_v38 = vmul.f32 -1.442695, %v4629_v35  ;;  %v16182_v35 = vand.u32 4294901760, %v5769_v28 }
0x1109   :  { %14977 = vpow2.f32 %v11741_v38  ;;  %v16190_v38 = vand.u32 4294901760, %v5772_v29 }
0x1111   :  { %v14976_v37 = vpop.eup %14975 }
0x1112   :  { %4643 = vrot.lane.b32.xlu0 %v14976_v37, %s15403_s10  ;;  %v16188_v37 = vsub.f32 %v5766_v14, %v16162_v27 }
0x1113   :  { %v14978_v39 = vpop.eup %14977 }
0x1114   :  { %v4633_v40 = vadd.f32 1.0, %v14978_v39 }
0x1116   :  { %14979 = vrcp.f32 %v4633_v40  ;;  %v16199_v40 = vpack.c.bf16 %v5793_v34, %v5790_v33 }
0x1120   :  { %v14980_v41 = vpop.eup %14979 }
0x1121   :  { %v4641_v20 = vmul.f32 %v14980_v41, %v4639_v46  ;;  %v5856_v46 = vand.u32 4294901760, %v5855_v36 }
0x1184   :  { %v4644_v42 = vpop.permute.xlu0 %4643 }
0x1185   :  { %v4646_v45 = vmul.f32 %v14980_v41, %v4644_v42  ;;  %v16203_v42 = vsub.f32 %v5769_v28, %v16182_v35 }
0x1187   :  { %4648 = vrot.lane.b32.xlu0 %v4646_v45, %s15404_s23 }
0x11f9   :  { %v4649_v10 = vpop.permute.xlu0 %4648 }
0x11fa   :  { %v4651_v49 = vadd.f32 %v4649_v10, %v4641_v20  ;;  %v5874_v20 = vand.u32 4294901760, %v16188_v37  ;;  %v16209_v10 = vsub.f32 %v5772_v29, %v16190_v38 }
0x11fc   :  { %14981 = vtanh.f32 %v4651_v49 }
0x1206   :  { %v14982_v31 = vpop.eup %14981 }
0x1207   :  { %4654 = vrot.lane.b32.xlu1 %v14982_v31, %s15403_s10  ;;  %v5884_v31 = vand.u32 4294901760, %v16203_v42 }
0x120b   :  { %4664 = vrot.lane.b32.xlu1 %v4651_v49, %s15405_s28 }
0x1279   :  { %v4655_v50 = vpop.permute.xlu1 %4654 }
0x127a   :  { %v4657_v51 = vmul.f32 %v14980_v41, %v4655_v50  ;;  %v5864_v41 = vand.u32 4294901760, %v16171_v32 }
0x127c   :  { %4659 = vrot.lane.b32.xlu0 %v4657_v51, %s15404_s23  ;;  %v5865_v49 = vsub.f32 %v16171_v32, %v5864_v41  ;;  %v5875_v51 = vsub.f32 %v16188_v37, %v5874_v20 }
0x127d   :  { %v4665_v52 = vpop.permute.xlu1 %4664 }
0x127e   :  { %4667 = vst.msk [vmem:[#allocation5] sm:$0xff] %vm1471_vm0, %v4665_v52  ;;  %v5894_v52 = vand.u32 4294901760, %v16209_v10 }
0x1285   :  { %v4671_v53 = vld [vmem:[#allocation5] sm:$0xff] }
0x1286   :  { %5171 = vrot.lane.b32.xlu1 %v4671_v53, %s15404_s23  ;;  %v5866_v53 = vand.u32 4294901760, %v5865_v49 }
0x12ee   :  { %v4660_v54 = vpop.permute.xlu0 %4659 }
0x12ef   :  { %4662 = vst.msk [vmem:[#allocation4] sm:$0xff] %vm1471_vm0, %v4660_v54  ;;  %4669 = vst.msk [vmem:[#allocation3 + $0x28] sm:$0xff] %vm1471_vm0, %v4660_v54  ;;  %v5885_v54 = vsub.f32 %v16203_v42, %v5884_v31 }
0x12f6   :  { %v4670_v55 = vld [vmem:[#allocation4] sm:$0xff]  ;;  %v5745_v30 = vld [vmem:[#allocation3 + $0x28] sm:$0xff] }
0x12f7   :  { %v4675_v56 = vsel %vm1471_vm0, %v4670_v55, 0  ;;  %v5775_v39 = vsel %vm1471_vm0, %v5745_v30, 0 }
0x12f8   :  { %v16113_v57 = vand.u32 4294901760, %v4675_v56  ;;  %v16205_v45 = vand.u32 4294901760, %v5775_v39  ;;  %v5172_v30 = vpop.permute.xlu1 %5171 }
0x12fa   :  { %v4747_v58 = vsub.f32 %v4675_v56, %v16113_v57  ;;  %v16219_v50 = vsub.f32 %v5775_v39, %v16205_v45  ;;  %v5876_v56 = vand.u32 4294901760, %v5875_v51 }
0x12fc   :  { %v4748_v59 = vand.u32 4294901760, %v4747_v58  ;;  %v5904_v55 = vand.u32 4294901760, %v16219_v50 }
0x12fe   :  { %v4749_v60 = vsub.f32 %v4747_v58, %v4748_v59 }
0x1300   :  { %v4750_v61 = vand.u32 4294901760, %v4749_v60 }
0x1302   :  { %12999 = vmatmul.mubr.f32.vlgmr.msra.gmra.mrb[12].mxu0 %v4750_v61 }
0x1303   :  { %14156 = vmatpush3.bf16.msra.mxu0 %v15801_v2  ;;  %13009 = vmatprep.mubr.msk.f32.mxu0 %vm15402_vm2, %v15400_v0 }
0x1304   :  { %14157 = vmatprep.subr.bf16.mxu0 %v15401_v19 }
0x1307   :  { %14159 = vmatpush3.bf16.msra.mxu0 %v15805_v5 }
0x1308   :  { %14160 = vmatprep.subr.bf16.mxu0 %v15401_v19 }
0x130a   :  { %13010 = vmatmul.mubr.f32.vlgmr.msra.gmra.mrb[12].mxu0 %v16113_v57 }
0x130b   :  { %14162 = vmatpush3.bf16.msra.mxu0 %v15811_v6  ;;  %13020 = vmatprep.mubr.msk.f32.mxu0 %vm15402_vm2, %v15400_v0 }
0x130c   :  { %14163 = vmatprep.subr.bf16.mxu0 %v15401_v19 }
0x130f   :  { %14165 = vmatpush3.bf16.msra.mxu0 %v15816_v7 }
0x1310   :  { %14166 = vmatprep.subr.bf16.mxu0 %v15401_v19 }
0x1312   :  { %13021 = vmatmul.mubr.f32.vlgmr.msra.gmra.mrb[12].mxu0 %v4747_v58  ;;  %v5886_v58 = vand.u32 4294901760, %v5885_v54 }
0x1313   :  { %14168 = vmatpush3.bf16.msra.mxu0 %v15754_v43  ;;  %13031 = vmatprep.mubr.msk.f32.mxu0 %vm15402_vm2, %v15400_v0 }
0x1314   :  { %14169 = vmatprep.subr.bf16.mxu0 %v15401_v19 }
0x1317   :  { %14171 = vmatpush3.bf16.msra.mxu0 %v15763_v47 }
0x1318   :  { %14172 = vmatprep.subr.bf16.mxu0 %v15401_v19 }
0x131a   :  { %13032 = vmatmul.mubr.f32.vlgmr.msra.gmra.mrb[12].mxu0 %v4748_v59  ;;  %v5905_v59 = vsub.f32 %v16219_v50, %v5904_v55 }
0x131b   :  { %14174 = vmatpush3.bf16.msra.mxu0 %v15828_v8  ;;  %13042 = vmatprep.mubr.msk.f32.mxu0 %vm15402_vm2, %v15400_v0 }
0x131c   :  { %14175 = vmatprep.subr.bf16.mxu0 %v15401_v19  ;;  %v5906_v61 = vand.u32 4294901760, %v5905_v59 }
0x131f   :  { %14177 = vmatpush3.bf16.msra.mxu0 %v15832_v9 }
0x1320   :  { %14178 = vmatprep.subr.bf16.mxu0 %v15401_v19 }
0x1322   :  { %13043 = vmatmul.mubr.f32.vlgmr.msra.gmra.mrb[12].mxu0 %v16113_v57 }
0x1323   :  { %14180 = vmatpush3.bf16.msra.mxu0 %v15754_v43  ;;  %13053 = vmatprep.mubr.msk.f32.mxu0 %vm15402_vm2, %v15400_v0 }
0x1324   :  { %14181 = vmatprep.subr.bf16.mxu0 %v15401_v19 }
0x1327   :  { %14183 = vmatpush3.bf16.msra.mxu0 %v15763_v47 }
0x1328   :  { %14221 = vmatprep.subr.bf16.mxu0 %v16178_v15 }
0x132a   :  { %13054 = vmatmul.mubr.f32.vlgmr.msra.gmra.mrb[12].mxu0 %v16113_v57  ;;  %v5895_v57 = vsub.f32 %v16209_v10, %v5894_v52 }
0x132b   :  { %14223 = vmatpush3.bf16.msra.mxu0 %v16178_v15  ;;  %13130 = vmatprep.mubr.f32.mxu0 %v5856_v46 }
0x132c   :  { %14225 = vmatprep.subr.bf16.mxu0 %v16199_v40  ;;  %v5896_v60 = vand.u32 4294901760, %v5895_v57 }
0x132f   :  { %14227 = vmatpush3.bf16.msra.mxu0 %v16199_v40 }
0x1332   :  { %13131 = vmatmul.mubr.f32.vlgmr.msra.gmra.mrb[14].mxu0 %v5866_v53 }
0x1333   :  { %13133 = vmatprep.mubr.f32.mxu0 %v5876_v56 }
0x1336   :  { %13134 = vmatmul.mubr.f32.gmra.mrb[16].mxu0 %v5886_v58 }
0x1337   :  { %13136 = vmatprep.mubr.f32.mxu0 %v5896_v60 }
0x133a   :  { %13137 = vmatmul.mubr.f32.gmra.mrb[18].mxu0 %v5906_v61 }
0x13fd   :  { %v5158_v62 = vpop.f32.mrb[12].mxu0 }
0x13fe   :  { %v5162_v63 = vadd.f32 %v5158_v62, %v15863_v44  ;;  %v13055_v3 = vpop.f32.mrb[13].mxu0 }
0x1400   :  { %14983 = vtanh.f32 %v5162_v63  ;;  %v11742_v11 = vmul.f32 -1.442695, %v5162_v63 }
0x1402   :  { %14985 = vpow2.f32 %v11742_v11 }
0x140a   :  { %v14984_v4 = vpop.eup %14983 }
0x140b   :  { %5176 = vrot.lane.b32.xlu0 %v14984_v4, %s15403_s10 }
0x140c   :  { %v14986_v14 = vpop.eup %14985 }
0x140d   :  { %v5166_v16 = vadd.f32 1.0, %v14986_v14 }
0x140f   :  { %14987 = vrcp.f32 %v5166_v16 }
0x1419   :  { %v14988_v21 = vpop.eup %14987 }
0x141a   :  { %v5174_v36 = vmul.f32 %v14988_v21, %v5172_v30 }
0x147d   :  { %v5177_v28 = vpop.permute.xlu0 %5176 }
0x147e   :  { %v5179_v29 = vmul.f32 %v14988_v21, %v5177_v28 }
0x1480   :  { %5181 = vrot.lane.b32.xlu0 %v5179_v29, %s15404_s23 }
0x14f2   :  { %v5182_v39 = vpop.permute.xlu0 %5181 }
0x14f3   :  { %v5184_v46 = vadd.f32 %v5182_v39, %v5174_v36 }
0x14f5   :  { %14989 = vtanh.f32 %v5184_v46 }
0x14ff   :  { %v14990_v44 = vpop.eup %14989 }
0x1500   :  { %5187 = vrot.lane.b32.xlu1 %v14990_v44, %s15403_s10 }
0x1504   :  { %5197 = vrot.lane.b32.xlu1 %v5184_v46, %s15405_s28 }
0x1572   :  { %v5188_v49 = vpop.permute.xlu1 %5187 }
0x1573   :  { %v5190_v51 = vmul.f32 %v14988_v21, %v5188_v49  ;;  %v16297_v49 = vsub.f32 %v16143_v12, %v5784_v22 }
0x1575   :  { %5192 = vrot.lane.b32.xlu0 %v5190_v51, %s15404_s23  ;;  %v16302_v51 = vsub.f32 %v16145_v13, %v5787_v23 }
0x1576   :  { %v5198_v53 = vpop.permute.xlu1 %5197 }
0x1577   :  { %5200 = vst.msk [vmem:[#allocation5] sm:$0xff] %vm1471_vm0, %v5198_v53  ;;  %v5935_v53 = vand.u32 4294901760, %v16297_v49 }
0x1579   :  { %v5936_v13 = vsub.f32 %v16297_v49, %v5935_v53 }
0x157e   :  { %v5204_v54 = vld [vmem:[#allocation5] sm:$0xff] }
0x157f   :  { %5704 = vrot.lane.b32.xlu1 %v5204_v54, %s15404_s23  ;;  %v5942_v54 = vand.u32 4294901760, %v16302_v51 }
0x1581   :  { %v5943_v22 = vsub.f32 %v16302_v51, %v5942_v54 }
0x15e7   :  { %v5193_v56 = vpop.permute.xlu0 %5192 }
0x15e8   :  { %5195 = vst.msk [vmem:[#allocation4] sm:$0xff] %vm1471_vm0, %v5193_v56  ;;  %5202 = vst.msk [vmem:[#allocation3 + $0x30] sm:$0xff] %vm1471_vm0, %v5193_v56  ;;  %v16309_v56 = vsub.f32 %v16158_v25, %v5790_v33  ;;  %v5937_v33 = vand.u32 4294901760, %v5936_v13 }
0x15ea   :  { %v5949_v23 = vand.u32 4294901760, %v16309_v56 }
0x15ef   :  { %v5203_v57 = vld [vmem:[#allocation4] sm:$0xff]  ;;  %v5746_v58 = vld [vmem:[#allocation3 + $0x30] sm:$0xff] }
0x15f0   :  { %v5208_v59 = vsel %vm1471_vm0, %v5203_v57, 0  ;;  %v5778_v60 = vsel %vm1471_vm0, %v5746_v58, 0  ;;  %v16314_v57 = vsub.f32 %v16160_v26, %v5793_v34 }
0x15f1   :  { %v5279_v61 = vand.u32 4294901760, %v5208_v59  ;;  %v16248_v62 = vand.u32 4294901760, %v5778_v60  ;;  %v5705_v36 = vpop.permute.xlu1 %5704 }
0x15f2   :  { %v5956_v58 = vand.u32 4294901760, %v16314_v57 }
0x15f3   :  { %v5280_v63 = vsub.f32 %v5208_v59, %v5279_v61  ;;  %v16251_v3 = vsub.f32 %v5778_v60, %v16248_v62  ;;  %v5944_v59 = vand.u32 4294901760, %v5943_v22  ;;  %v5950_v60 = vsub.f32 %v16309_v56, %v5949_v23 }
0x15f4   :  { %v5957_v26 = vsub.f32 %v16314_v57, %v5956_v58 }
0x15f5   :  { %v5281_v4 = vand.u32 4294901760, %v5280_v63  ;;  %v5914_v11 = vand.u32 4294901760, %v16251_v3 }
0x15f7   :  { %v5282_v14 = vsub.f32 %v5280_v63, %v5281_v4  ;;  %v5915_v16 = vsub.f32 %v16251_v3, %v5914_v11 }
0x15f9   :  { %v5283_v21 = vand.u32 4294901760, %v5282_v14  ;;  %v5916_v28 = vand.u32 4294901760, %v5915_v16  ;;  %v6577_v16 = vld [vmem:[#allocation18] sm:$0xff] }
0x15fb   :  { %13065 = vmatmul.mubr.f32.vlgmr.msra.gmra.mrb[18].mxu1 %v5283_v21  ;;  %13139 = vmatprep.mubr.f32.mxu0 %v5916_v28  ;;  %v6578_v21 = vld [vmem:[#allocation18 + $0x8] sm:$0xff]  ;;  %v6590_v28 = vand.u32 4294901760, %v6577_v16 }
0x15fc   :  { %14192 = vmatpush3.bf16.msra.mxu1 %v15801_v2  ;;  %13075 = vmatprep.mubr.msk.f32.mxu1 %vm15402_vm2, %v15400_v0 }
0x15fd   :  { %14193 = vmatprep.subr.bf16.mxu1 %v15401_v19 }
0x1600   :  { %14195 = vmatpush3.bf16.msra.mxu1 %v15805_v5 }
0x1601   :  { %14196 = vmatprep.subr.bf16.mxu1 %v15401_v19 }
0x1603   :  { %13076 = vmatmul.mubr.f32.vlgmr.msra.gmra.mrb[18].mxu1 %v5279_v61 }
0x1604   :  { %14198 = vmatpush3.bf16.msra.mxu1 %v15811_v6  ;;  %13086 = vmatprep.mubr.msk.f32.mxu1 %vm15402_vm2, %v15400_v0 }
0x1605   :  { %14199 = vmatprep.subr.bf16.mxu1 %v15401_v19 }
0x1608   :  { %14201 = vmatpush3.bf16.msra.mxu1 %v15816_v7 }
0x1609   :  { %14202 = vmatprep.subr.bf16.mxu1 %v15401_v19 }
0x160b   :  { %13087 = vmatmul.mubr.f32.vlgmr.msra.gmra.mrb[18].mxu1 %v5280_v63  ;;  %v5951_v63 = vand.u32 4294901760, %v5950_v60 }
0x160c   :  { %14204 = vmatpush3.bf16.msra.mxu1 %v15754_v43  ;;  %13097 = vmatprep.mubr.msk.f32.mxu1 %vm15402_vm2, %v15400_v0 }
0x160d   :  { %14205 = vmatprep.subr.bf16.mxu1 %v15401_v19 }
0x1610   :  { %14207 = vmatpush3.bf16.msra.mxu1 %v15763_v47 }
0x1611   :  { %14208 = vmatprep.subr.bf16.mxu1 %v15401_v19 }
0x1613   :  { %13098 = vmatmul.mubr.f32.vlgmr.msra.gmra.mrb[18].mxu1 %v5281_v4  ;;  %v5958_v4 = vand.u32 4294901760, %v5957_v26 }
0x1614   :  { %14210 = vmatpush3.bf16.msra.mxu1 %v15828_v8  ;;  %13108 = vmatprep.mubr.msk.f32.mxu1 %vm15402_vm2, %v15400_v0 }
0x1615   :  { %14211 = vmatprep.subr.bf16.mxu1 %v15401_v19  ;;  %v14232_v14 = vpack.c.bf16 %v5958_v4, %v5951_v63  ;;  %v14240_v4 = vpack.c.bf16 %v16314_v57, %v16309_v56 }
0x1618   :  { %14213 = vmatpush3.bf16.msra.mxu1 %v15832_v9 }
0x1619   :  { %14214 = vmatprep.subr.bf16.mxu1 %v15401_v19 }
0x161b   :  { %13109 = vmatmul.mubr.f32.vlgmr.msra.gmra.mrb[18].mxu1 %v5279_v61 }
0x161c   :  { %14216 = vmatpush3.bf16.msra.mxu1 %v15754_v43  ;;  %13119 = vmatprep.mubr.msk.f32.mxu1 %vm15402_vm2, %v15400_v0 }
0x161d   :  { %14217 = vmatprep.subr.bf16.mxu1 %v15401_v19 }
0x1620   :  { %14219 = vmatpush3.bf16.msra.mxu1 %v15763_v47 }
0x1621   :  { %14268 = vmatprep.subr.bf16.mxu1 %v15401_v19 }
0x1623   :  { %13120 = vmatmul.mubr.f32.vlgmr.msra.gmra.mrb[18].mxu1 %v5279_v61  ;;  %v14228_v61 = vpack.c.bf16 %v5944_v59, %v5937_v33 }
0x1624   :  { %13250 = vmatprep.mubr.msk.f32.mxu1 %vm15402_vm2, %v15400_v0 }
0x1625   :  { %14229 = vmatprep.subr.bf16.mxu0 %v14228_v61 }
0x1626   :  { %14231 = vmatpush3.bf16.msra.mxu0 %v14228_v61 }
0x1627   :  { %14233 = vmatprep.subr.bf16.mxu0 %v14232_v14 }
0x162a   :  { %14235 = vmatpush3.bf16.msra.mxu0 %v14232_v14 }
0x16f6   :  { %v5691_v2 = vpop.f32.mrb[18].mxu1 }
0x16f7   :  { %v5695_v5 = vadd.f32 %v5691_v2, %v15865_v48  ;;  %v13121_v6 = vpop.f32.mrb[19].mxu1  ;;  %v6593_v2 = vand.u32 4294901760, %v6578_v21 }
0x16f8   :  { %v6670_v6 = vsub.f32 %v6577_v16, %v6590_v28 }
0x16f9   :  { %14991 = vtanh.f32 %v5695_v5  ;;  %v11743_v43 = vmul.f32 -1.442695, %v5695_v5  ;;  %v16328_v5 = vpack.c.bf16 %v6593_v2, %v6590_v28 }
0x16fb   :  { %14993 = vpow2.f32 %v11743_v43  ;;  %v6579_v43 = vld [vmem:[#allocation18 + $0x10] sm:$0xff]  ;;  %14270 = vmatpush3.bf16.msra.mxu1 %v16328_v5 }
0x16fc   :  { %14271 = vmatprep.subr.bf16.mxu1 %v15401_v19 }
0x1703   :  { %v14992_v7 = vpop.eup %14991 }
0x1704   :  { %5709 = vrot.lane.b32.xlu0 %v14992_v7, %s15403_s10  ;;  %v6677_v7 = vsub.f32 %v6578_v21, %v6593_v2  ;;  %v16357_v2 = vpack.c.bf16 %v5942_v54, %v5935_v53 }
0x1705   :  { %v14994_v8 = vpop.eup %14993 }
0x1706   :  { %v5699_v9 = vadd.f32 1.0, %v14994_v8  ;;  %v6580_v8 = vld [vmem:[#allocation18 + $0x18] sm:$0xff]  ;;  %v16347_v16 = vpack.c.bf16 %v6677_v7, %v6670_v6 }
0x1708   :  { %14995 = vrcp.f32 %v5699_v9  ;;  %v6596_v9 = vand.u32 4294901760, %v6579_v43 }
0x1712   :  { %v14996_v47 = vpop.eup %14995 }
0x1713   :  { %v5707_v39 = vmul.f32 %v14996_v47, %v5705_v36 }
0x1776   :  { %v5710_v29 = vpop.permute.xlu0 %5709 }
0x1777   :  { %v5712_v30 = vmul.f32 %v14996_v47, %v5710_v29  ;;  %v6671_v29 = vand.u32 4294901760, %v6670_v6 }
0x1779   :  { %5714 = vrot.lane.b32.xlu0 %v5712_v30, %s15404_s23  ;;  %v6678_v30 = vand.u32 4294901760, %v6677_v7 }
0x177b   :  { %v16351_v28 = vpack.c.bf16 %v6678_v30, %v6671_v29 }
0x17eb   :  { %v5715_v46 = vpop.permute.xlu0 %5714 }
0x17ec   :  { %v5717_v44 = vadd.f32 %v5715_v46, %v5707_v39  ;;  %v14236_v39 = vpack.c.bf16 %v16302_v51, %v16297_v49 }
0x17ee   :  { %14997 = vtanh.f32 %v5717_v44  ;;  %14237 = vmatprep.subr.bf16.mxu0 %v14236_v39 }
0x17f8   :  { %v14998_v48 = vpop.eup %14997 }
0x17f9   :  { %5720 = vrot.lane.b32.xlu1 %v14998_v48, %s15403_s10  ;;  %v6679_v48 = vsub.f32 %v6677_v7, %v6678_v30 }
0x17fd   :  { %5730 = vrot.lane.b32.xlu1 %v5717_v44, %s15405_s28  ;;  %v6672_v44 = vsub.f32 %v6670_v6, %v6671_v29 }
0x17ff   :  { %v6673_v22 = vand.u32 4294901760, %v6672_v44 }
0x186b   :  { %v5721_v12 = vpop.permute.xlu1 %5720 }
0x186c   :  { %v5723_v25 = vmul.f32 %v14996_v47, %v5721_v12  ;;  %v6599_v47 = vand.u32 4294901760, %v6580_v8  ;;  %v6684_v12 = vsub.f32 %v6579_v43, %v6596_v9 }
0x186e   :  { %5725 = vrot.lane.b32.xlu0 %v5723_v25, %s15404_s23  ;;  %v16337_v46 = vpack.c.bf16 %v6599_v47, %v6596_v9  ;;  %v6691_v13 = vsub.f32 %v6580_v8, %v6599_v47  ;;  %v6680_v25 = vand.u32 4294901760, %v6679_v48  ;;  %v6685_v33 = vand.u32 4294901760, %v6684_v12 }
0x186f   :  { %v5731_v34 = vpop.permute.xlu1 %5730  ;;  %v16361_v8 = vpack.c.bf16 %v5956_v58, %v5949_v23 }
0x1870   :  { %5733 = vst.msk [vmem:[#allocation5] sm:$0xff] %vm1471_vm0, %v5731_v34  ;;  %14273 = vmatpush3.bf16.msra.mxu1 %v16337_v46  ;;  %v6692_v59 = vand.u32 4294901760, %v6691_v13  ;;  %v16341_v60 = vpack.c.bf16 %v6680_v25, %v6673_v22  ;;  %v6686_v26 = vsub.f32 %v6684_v12, %v6685_v33  ;;  %v16349_v21 = vpack.c.bf16 %v6691_v13, %v6684_v12 }
0x1871   :  { %14274 = vmatprep.subr.bf16.mxu1 %v15401_v19 }
0x1872   :  { %v6693_v34 = vsub.f32 %v6691_v13, %v6692_v59  ;;  %v6687_v61 = vand.u32 4294901760, %v6686_v26  ;;  %v16359_v43 = vpack.c.bf16 %v6692_v59, %v6685_v33 }
0x1874   :  { %v6694_v63 = vand.u32 4294901760, %v6693_v34 }
0x1876   :  { %v16345_v14 = vpack.c.bf16 %v6694_v63, %v6687_v61 }
0x1877   :  { %v5738_v36 = vld [vmem:[#allocation5] sm:$0xff] }
0x1878   :  { %6582 = vst.msk [vmem:[#allocation5] sm:$0xff] %vm1471_vm0, %v15400_v0  ;;  %5739 = vst.msk [vmem:[#allocation27] sm:$0xff] %vm1471_vm0, %v5738_v36 }
0x187f   :  { %v6584_v9 = vld [vmem:[#allocation5] sm:$0xff] }
0x1880   :  { %7083 = vrot.lane.b32.xlu1 %v6584_v9, %s15404_s23 }
0x18e0   :  { %v5726_v56 = vpop.permute.xlu0 %5725 }
0x18e1   :  { %5728 = vst.msk [vmem:[#allocation4] sm:$0xff] %vm1471_vm0, %v5726_v56  ;;  %5735 = vst.msk [vmem:[#allocation3 + $0x38] sm:$0xff] %vm1471_vm0, %v5726_v56 }
0x18e8   :  { %v5736_v57 = vld [vmem:[#allocation4] sm:$0xff]  ;;  %v5747_v6 = vld [vmem:[#allocation3 + $0x38] sm:$0xff] }
0x18e9   :  { %6581 = vst.msk [vmem:[#allocation4] sm:$0xff] %vm1471_vm0, %v15400_v0  ;;  %5737 = vst.msk [vmem:[#allocation25] sm:$0xff] %vm1471_vm0, %v5736_v57  ;;  %v5781_v49 = vsel %vm1471_vm0, %v5747_v6, 0 }
0x18ea   :  { %v16370_v51 = vand.u32 4294901760, %v5781_v49 }
0x18ec   :  { %v16373_v53 = vsub.f32 %v5781_v49, %v16370_v51 }
0x18ee   :  { %v5924_v54 = vand.u32 4294901760, %v16373_v53 }
0x18f0   :  { %v5925_v23 = vsub.f32 %v16373_v53, %v5924_v54  ;;  %v6583_v58 = vld [vmem:[#allocation4] sm:$0xff] }
0x18f1   :  { %v6587_v7 = vsel %vm1471_vm0, %v6583_v58, 0 }
0x18f2   :  { %v5926_v47 = vand.u32 4294901760, %v5925_v23  ;;  %v16380_v29 = vand.u32 4294901760, %v6587_v7  ;;  %v7084_v25 = vpop.permute.xlu1 %7083 }
0x18f4   :  { %13140 = vmatmul.mubr.f32.gmra.mrb[20].mxu0 %v5926_v47  ;;  %v6659_v30 = vsub.f32 %v6587_v7, %v16380_v29 }
0x18f5   :  { %13150 = vmatprep.mubr.f32.mxu0 %v16136_v1 }
0x18f6   :  { %v6660_v36 = vand.u32 4294901760, %v6659_v30 }
0x18f8   :  { %13151 = vmatmul.mubr.f32.vlgmr.msra.gmra.mrb[14].mxu0 %v16152_v17  ;;  %v6661_v44 = vsub.f32 %v6659_v30, %v6660_v36 }
0x18f9   :  { %13153 = vmatprep.mubr.f32.mxu0 %v16162_v27  ;;  %14239 = vmatpush3.bf16.msra.mxu0 %v14236_v39 }
0x18fa   :  { %v6662_v48 = vand.u32 4294901760, %v6661_v44  ;;  %14241 = vmatprep.subr.bf16.mxu0 %v14240_v4 }
0x18fc   :  { %13154 = vmatmul.mubr.f32.gmra.mrb[16].mxu0 %v16182_v35  ;;  %13251 = vmatmul.mubr.f32.vlgmr.msra.gmra.mrb[20].mxu1 %v6662_v48 }
0x18fd   :  { %13156 = vmatprep.mubr.f32.mxu0 %v16190_v38  ;;  %14276 = vmatpush3.bf16.msra.mxu1 %v16341_v60 }
0x18fe   :  { %14277 = vmatprep.subr.bf16.mxu1 %v15401_v19  ;;  %14243 = vmatpush3.bf16.msra.mxu0 %v14240_v4 }
0x18ff   :  { %13261 = vmatprep.mubr.msk.f32.mxu1 %vm15402_vm2, %v15400_v0  ;;  %14245 = vmatprep.subr.bf16.mxu0 %v16178_v15 }
0x1900   :  { %13157 = vmatmul.mubr.f32.gmra.mrb[18].mxu0 %v16205_v45 }
0x1901   :  { %13159 = vmatprep.mubr.f32.mxu0 %v16248_v62  ;;  %14279 = vmatpush3.bf16.msra.mxu1 %v16345_v14 }
0x1902   :  { %14280 = vmatprep.subr.bf16.mxu1 %v15401_v19 }
0x1904   :  { %13160 = vmatmul.mubr.f32.gmra.mrb[20].mxu0 %v16370_v51  ;;  %13262 = vmatmul.mubr.f32.vlgmr.msra.gmra.mrb[20].mxu1 %v16380_v29 }
0x1905   :  { %13170 = vmatprep.mubr.f32.mxu0 %v16148_v18  ;;  %14282 = vmatpush3.bf16.msra.mxu1 %v16347_v16 }
0x1906   :  { %14283 = vmatprep.subr.bf16.mxu1 %v15401_v19  ;;  %13272 = vmatprep.mubr.msk.f32.mxu1 %vm15402_vm2, %v15400_v0 }
0x1908   :  { %13171 = vmatmul.mubr.f32.vlgmr.msra.gmra.mrb[14].mxu0 %v16171_v32 }
0x1909   :  { %13173 = vmatprep.mubr.f32.mxu0 %v16188_v37  ;;  %14247 = vmatpush3.bf16.msra.mxu0 %v16178_v15 }
0x190a   :  { %14285 = vmatpush3.bf16.msra.mxu1 %v16349_v21  ;;  %14249 = vmatprep.subr.bf16.mxu0 %v16199_v40 }
0x190b   :  { %14286 = vmatprep.subr.bf16.mxu1 %v15401_v19 }
0x190c   :  { %13174 = vmatmul.mubr.f32.gmra.mrb[16].mxu0 %v16203_v42 }
0x190d   :  { %13273 = vmatmul.mubr.f32.vlgmr.msra.gmra.mrb[20].mxu1 %v6659_v30  ;;  %13176 = vmatprep.mubr.f32.mxu0 %v16209_v10 }
0x190e   :  { %14288 = vmatpush3.bf16.msra.mxu1 %v16328_v5  ;;  %14251 = vmatpush3.bf16.msra.mxu0 %v16199_v40 }
0x190f   :  { %14289 = vmatprep.subr.bf16.mxu1 %v15401_v19  ;;  %13283 = vmatprep.mubr.msk.f32.mxu1 %vm15402_vm2, %v15400_v0 }
0x1910   :  { %13177 = vmatmul.mubr.f32.gmra.mrb[18].mxu0 %v16219_v50  ;;  %14253 = vmatprep.subr.bf16.mxu0 %v16357_v2 }
0x1911   :  { %13179 = vmatprep.mubr.f32.mxu0 %v16251_v3 }
0x1912   :  { %14291 = vmatpush3.bf16.msra.mxu1 %v16337_v46 }
0x1913   :  { %14292 = vmatprep.subr.bf16.mxu1 %v15401_v19 }
0x1914   :  { %13180 = vmatmul.mubr.f32.gmra.mrb[20].mxu0 %v16373_v53 }
0x1915   :  { %13284 = vmatmul.mubr.f32.vlgmr.msra.gmra.mrb[20].mxu1 %v6660_v36  ;;  %13190 = vmatprep.mubr.f32.mxu0 %v5854_v24 }
0x1916   :  { %14294 = vmatpush3.bf16.msra.mxu1 %v16351_v28  ;;  %13294 = vmatprep.mubr.msk.f32.mxu1 %vm15402_vm2, %v15400_v0 }
0x1917   :  { %14295 = vmatprep.subr.bf16.mxu1 %v15401_v19 }
0x1918   :  { %13191 = vmatmul.mubr.f32.vlgmr.msra.gmra.mrb[14].mxu0 %v5864_v41 }
0x1919   :  { %13193 = vmatprep.mubr.f32.mxu0 %v5874_v20  ;;  %14255 = vmatpush3.bf16.msra.mxu0 %v16357_v2 }
0x191a   :  { %14297 = vmatpush3.bf16.msra.mxu1 %v16359_v43  ;;  %14257 = vmatprep.subr.bf16.mxu0 %v16361_v8 }
0x191b   :  { %14298 = vmatprep.subr.bf16.mxu1 %v15401_v19 }
0x191c   :  { %13194 = vmatmul.mubr.f32.gmra.mrb[16].mxu0 %v5884_v31 }
0x191d   :  { %13295 = vmatmul.mubr.f32.vlgmr.msra.gmra.mrb[20].mxu1 %v16380_v29  ;;  %13196 = vmatprep.mubr.f32.mxu0 %v5894_v52 }
0x191e   :  { %14300 = vmatpush3.bf16.msra.mxu1 %v16328_v5  ;;  %14259 = vmatpush3.bf16.msra.mxu0 %v16361_v8 }
0x191f   :  { %14301 = vmatprep.subr.bf16.mxu1 %v15401_v19  ;;  %13305 = vmatprep.mubr.msk.f32.mxu1 %vm15402_vm2, %v15400_v0 }
0x1920   :  { %13197 = vmatmul.mubr.f32.gmra.mrb[18].mxu0 %v5904_v55  ;;  %14261 = vmatprep.subr.bf16.mxu0 %v16178_v15 }
0x1921   :  { %13199 = vmatprep.mubr.f32.mxu0 %v5914_v11 }
0x1922   :  { %14303 = vmatpush3.bf16.msra.mxu1 %v16337_v46 }
0x1923   :  { %14304 = vmatprep.subr.bf16.mxu1 %v15401_v19 }
0x1924   :  { %13200 = vmatmul.mubr.f32.gmra.mrb[20].mxu0 %v5924_v54 }
0x1925   :  { %13306 = vmatmul.mubr.f32.vlgmr.msra.gmra.mrb[20].mxu1 %v16380_v29  ;;  %13210 = vmatprep.mubr.f32.mxu0 %v16136_v1 }
0x1926   :  { %14306 = vmatpush3.bf16.msra.mxu1 %v16328_v5  ;;  %13316 = vmatprep.mubr.msk.f32.mxu1 %vm15402_vm2, %v15400_v0 }
0x1927   :  { %14307 = vmatprep.subr.bf16.mxu1 %v15401_v19 }
0x1928   :  { %13211 = vmatmul.mubr.f32.vlgmr.msra.gmra.mrb[14].mxu0 %v16152_v17 }
0x1929   :  { %13213 = vmatprep.mubr.f32.mxu0 %v16162_v27  ;;  %14263 = vmatpush3.bf16.msra.mxu0 %v16178_v15 }
0x192a   :  { %14265 = vmatprep.subr.bf16.mxu0 %v16199_v40  ;;  %14309 = vmatpush3.bf16.msra.mxu1 %v16337_v46 }
0x192b   :  { %14310 = vmatprep.subr.bf16.mxu1 %v15401_v19 }
0x192c   :  { %13214 = vmatmul.mubr.f32.gmra.mrb[16].mxu0 %v16182_v35 }
0x192d   :  { %13216 = vmatprep.mubr.f32.mxu0 %v16190_v38  ;;  %14267 = vmatpush3.bf16.msra.mxu0 %v16199_v40 }
0x192e   :  { %14340 = vmatprep.subr.bf16.mxu0 %v15401_v19 }
0x1930   :  { %13217 = vmatmul.mubr.f32.gmra.mrb[18].mxu0 %v16205_v45 }
0x1931   :  { %13219 = vmatprep.mubr.f32.mxu0 %v16248_v62 }
0x1934   :  { %13220 = vmatmul.mubr.f32.gmra.mrb[20].mxu0 %v16370_v51 }
0x1935   :  { %13230 = vmatprep.mubr.f32.mxu0 %v16136_v1 }
0x1938   :  { %13231 = vmatmul.mubr.f32.vlgmr.msra.gmra.mrb[14].mxu0 %v16152_v17  ;;  %v11744_v17 = vld [vmem:[#allocation20] ss:$0 sm:$0xff] }
0x1939   :  { %13233 = vmatprep.mubr.f32.mxu0 %v16162_v27  ;;  %14342 = vmatpush3.bf16.msra.mxu0 %v16328_v5 }
0x193a   :  { %14343 = vmatprep.subr.bf16.mxu0 %v15401_v19 }
0x193c   :  { %13234 = vmatmul.mubr.f32.gmra.mrb[16].mxu0 %v16182_v35 }
0x193d   :  { %13236 = vmatprep.mubr.f32.mxu0 %v16190_v38  ;;  %14345 = vmatpush3.bf16.msra.mxu0 %v16337_v46 }
0x193e   :  { %14346 = vmatprep.subr.bf16.mxu0 %v15401_v19 }
0x1940   :  { %13237 = vmatmul.mubr.f32.gmra.mrb[18].mxu0 %v16205_v45 }
0x1941   :  { %13239 = vmatprep.mubr.f32.mxu0 %v16248_v62 }
0x1944   :  { %13240 = vmatmul.mubr.f32.gmra.mrb[20].mxu0 %v16370_v51 }
0x1945   :  { %13382 = vmatprep.mubr.msk.f32.mxu0 %vm15402_vm2, %v15400_v0 }
0x19f8   :  { %v7070_v1 = vpop.f32.mrb[20].mxu1 }
0x19f9   :  { %v13307_v18 = vpop.f32.mrb[21].mxu1 }
0x1a0b   :  { %v13232_v24 = vpop.f32.mrb[14].mxu0 }
0x1a0c   :  { %v16489_v27 = vadd.f32 %v13232_v24, %v11744_v17  ;;  %v6523_v32 = vpop.f32.mrb[15].mxu0 }
0x1a0d   :  { %v14616_v15 = vadd.f32 %v11744_v17, %v6523_v32 }
0x1a0f   :  { %v7074_v35 = vadd.f32 %v14616_v15, %v7070_v1  ;;  %v13235_v37 = vpop.f32.mrb[16].mxu0 }
0x1a10   :  { %v16491_v38 = vadd.f32 %v13235_v37, %v11744_v17  ;;  %v6535_v40 = vpop.f32.mrb[17].mxu0 }
0x1a11   :  { %14999 = vtanh.f32 %v7074_v35  ;;  %v16493_v41 = vadd.f32 %v11744_v17, %v6535_v40  ;;  %v11745_v3 = vmul.f32 -1.442695, %v7074_v35 }
0x1a13   :  { %v13238_v42 = vpop.f32.mrb[18].mxu0  ;;  %15001 = vpow2.f32 %v11745_v3 }
0x1a14   :  { %v16495_v45 = vadd.f32 %v13238_v42, %v11744_v17  ;;  %v6547_v20 = vpop.f32.mrb[19].mxu0 }
0x1a15   :  { %v16497_v10 = vadd.f32 %v11744_v17, %v6547_v20 }
0x1a17   :  { %v13241_v31 = vpop.f32.mrb[20].mxu0 }
0x1a18   :  { %v16499_v50 = vadd.f32 %v13241_v31, %v11744_v17  ;;  %v6559_v52 = vpop.f32.mrb[21].mxu0 }
0x1a19   :  { %v16501_v55 = vadd.f32 %v11744_v17, %v6559_v52 }
0x1a1b   :  { %v15000_v62 = vpop.eup %14999 }
0x1a1c   :  { %7088 = vrot.lane.b32.xlu0 %v15000_v62, %s15403_s10 }
0x1a1d   :  { %v15002_v11 = vpop.eup %15001 }
0x1a1e   :  { %v7078_v39 = vadd.f32 1.0, %v15002_v11 }
0x1a20   :  { %15003 = vrcp.f32 %v7078_v39 }
0x1a2a   :  { %v15004_v12 = vpop.eup %15003 }
0x1a2b   :  { %v7086_v33 = vmul.f32 %v15004_v12, %v7084_v25 }
0x1a8e   :  { %v7089_v13 = vpop.permute.xlu0 %7088 }
0x1a8f   :  { %v7091_v22 = vmul.f32 %v15004_v12, %v7089_v13 }
0x1a91   :  { %7093 = vrot.lane.b32.xlu0 %v7091_v22, %s15404_s23 }
0x1b03   :  { %v7094_v59 = vpop.permute.xlu0 %7093 }
0x1b04   :  { %v7096_v26 = vadd.f32 %v7094_v59, %v7086_v33 }
0x1b06   :  { %15005 = vtanh.f32 %v7096_v26 }
0x1b10   :  { %v15006_v34 = vpop.eup %15005 }
0x1b11   :  { %7099 = vrot.lane.b32.xlu1 %v15006_v34, %s15403_s10 }
0x1b15   :  { %7109 = vrot.lane.b32.xlu1 %v7096_v26, %s15405_s28 }
0x1b83   :  { %v7100_v61 = vpop.permute.xlu1 %7099 }
0x1b84   :  { %v7102_v63 = vmul.f32 %v15004_v12, %v7100_v61 }
0x1b86   :  { %7104 = vrot.lane.b32.xlu0 %v7102_v63, %s15404_s23 }
0x1b87   :  { %v7110_v4 = vpop.permute.xlu1 %7109 }
0x1b88   :  { %7112 = vst.msk [vmem:[#allocation5] sm:$0xff] %vm1471_vm0, %v7110_v4 }
0x1b8f   :  { %v7115_v2 = vld [vmem:[#allocation5] sm:$0xff] }
0x1b90   :  { %7614 = vrot.lane.b32.xlu1 %v7115_v2, %s15404_s23 }
0x1bf8   :  { %v7105_v8 = vpop.permute.xlu0 %7104 }
0x1bf9   :  { %7107 = vst.msk [vmem:[#allocation4] sm:$0xff] %vm1471_vm0, %v7105_v8  ;;  %7113 = vst.msk [vmem:[#allocation3] sm:$0xff] %vm1471_vm0, %v7105_v8 }
0x1c00   :  { %v7114_v9 = vld [vmem:[#allocation4] sm:$0xff] }
0x1c01   :  { %v7118_v56 = vsel %vm1471_vm0, %v7114_v9, 0 }
0x1c02   :  { %v7189_v57 = vand.u32 4294901760, %v7118_v56  ;;  %v7615_v1 = vpop.permute.xlu1 %7614 }
0x1c04   :  { %v7190_v6 = vsub.f32 %v7118_v56, %v7189_v57 }
0x1c06   :  { %v7191_v49 = vand.u32 4294901760, %v7190_v6 }
0x1c08   :  { %v7192_v51 = vsub.f32 %v7190_v6, %v7191_v49 }
0x1c0a   :  { %v7193_v53 = vand.u32 4294901760, %v7192_v51 }
0x1c0c   :  { %13317 = vmatmul.mubr.f32.vlgmr.msra.gmra.mrb[22].mxu1 %v7193_v53 }
0x1c0d   :  { %14312 = vmatpush3.bf16.msra.mxu1 %v16341_v60  ;;  %13327 = vmatprep.mubr.msk.f32.mxu1 %vm15402_vm2, %v15400_v0 }
0x1c0e   :  { %14313 = vmatprep.subr.bf16.mxu1 %v15401_v19 }
0x1c11   :  { %14315 = vmatpush3.bf16.msra.mxu1 %v16345_v14 }
0x1c12   :  { %14316 = vmatprep.subr.bf16.mxu1 %v15401_v19 }
0x1c14   :  { %13328 = vmatmul.mubr.f32.vlgmr.msra.gmra.mrb[22].mxu1 %v7189_v57 }
0x1c15   :  { %14318 = vmatpush3.bf16.msra.mxu1 %v16347_v16  ;;  %13338 = vmatprep.mubr.msk.f32.mxu1 %vm15402_vm2, %v15400_v0 }
0x1c16   :  { %14319 = vmatprep.subr.bf16.mxu1 %v15401_v19 }
0x1c19   :  { %14321 = vmatpush3.bf16.msra.mxu1 %v16349_v21 }
0x1c1a   :  { %14322 = vmatprep.subr.bf16.mxu1 %v15401_v19 }
0x1c1c   :  { %13339 = vmatmul.mubr.f32.vlgmr.msra.gmra.mrb[22].mxu1 %v7190_v6 }
0x1c1d   :  { %14324 = vmatpush3.bf16.msra.mxu1 %v16328_v5  ;;  %13349 = vmatprep.mubr.msk.f32.mxu1 %vm15402_vm2, %v15400_v0 }
0x1c1e   :  { %14325 = vmatprep.subr.bf16.mxu1 %v15401_v19 }
0x1c21   :  { %14327 = vmatpush3.bf16.msra.mxu1 %v16337_v46 }
0x1c22   :  { %14328 = vmatprep.subr.bf16.mxu1 %v15401_v19 }
0x1c24   :  { %13350 = vmatmul.mubr.f32.vlgmr.msra.gmra.mrb[22].mxu1 %v7191_v49 }
0x1c25   :  { %14330 = vmatpush3.bf16.msra.mxu1 %v16351_v28  ;;  %13360 = vmatprep.mubr.msk.f32.mxu1 %vm15402_vm2, %v15400_v0 }
0x1c26   :  { %14331 = vmatprep.subr.bf16.mxu1 %v15401_v19 }
0x1c29   :  { %14333 = vmatpush3.bf16.msra.mxu1 %v16359_v43 }
0x1c2a   :  { %14334 = vmatprep.subr.bf16.mxu1 %v15401_v19 }
0x1c2c   :  { %13361 = vmatmul.mubr.f32.vlgmr.msra.gmra.mrb[22].mxu1 %v7189_v57 }
0x1c2d   :  { %14336 = vmatpush3.bf16.msra.mxu1 %v16328_v5  ;;  %13371 = vmatprep.mubr.msk.f32.mxu1 %vm15402_vm2, %v15400_v0 }
0x1c2e   :  { %14337 = vmatprep.subr.bf16.mxu1 %v15401_v19 }
0x1c31   :  { %14339 = vmatpush3.bf16.msra.mxu1 %v16337_v46 }
0x1c32   :  { %14376 = vmatprep.subr.bf16.mxu1 %v15401_v19 }
0x1c34   :  { %13372 = vmatmul.mubr.f32.vlgmr.msra.gmra.mrb[22].mxu1 %v7189_v57 }
0x1c35   :  { %14378 = vmatpush3.bf16.msra.mxu1 %v16328_v5  ;;  %13448 = vmatprep.mubr.msk.f32.mxu1 %vm15402_vm2, %v15400_v0 }
0x1c36   :  { %14379 = vmatprep.subr.bf16.mxu1 %v15401_v19 }
0x1c39   :  { %14381 = vmatpush3.bf16.msra.mxu1 %v16337_v46 }
0x1c3a   :  { %14382 = vmatprep.subr.bf16.mxu1 %v15401_v19 }
0x1d07   :  { %v7601_v54 = vpop.f32.mrb[22].mxu1 }
0x1d08   :  { %v7605_v23 = vadd.f32 %v16489_v27, %v7601_v54  ;;  %v13373_v58 = vpop.f32.mrb[23].mxu1 }
0x1d0a   :  { %15007 = vtanh.f32 %v7605_v23  ;;  %v11746_v47 = vmul.f32 -1.442695, %v7605_v23 }
0x1d0c   :  { %15009 = vpow2.f32 %v11746_v47 }
0x1d14   :  { %v15008_v7 = vpop.eup %15007 }
0x1d15   :  { %7619 = vrot.lane.b32.xlu0 %v15008_v7, %s15403_s10 }
0x1d16   :  { %v15010_v29 = vpop.eup %15009 }
0x1d17   :  { %v7609_v30 = vadd.f32 1.0, %v15010_v29 }
0x1d19   :  { %15011 = vrcp.f32 %v7609_v30 }
0x1d23   :  { %v15012_v36 = vpop.eup %15011 }
0x1d24   :  { %v7617_v18 = vmul.f32 %v15012_v36, %v7615_v1 }
0x1d87   :  { %v7620_v44 = vpop.permute.xlu0 %7619 }
0x1d88   :  { %v7622_v48 = vmul.f32 %v15012_v36, %v7620_v44 }
0x1d8a   :  { %7624 = vrot.lane.b32.xlu0 %v7622_v48, %s15404_s23 }
0x1dfc   :  { %v7625_v17 = vpop.permute.xlu0 %7624 }
0x1dfd   :  { %v7627_v24 = vadd.f32 %v7625_v17, %v7617_v18 }
0x1dff   :  { %15013 = vtanh.f32 %v7627_v24 }
0x1e09   :  { %v15014_v27 = vpop.eup %15013 }
0x1e0a   :  { %7630 = vrot.lane.b32.xlu1 %v15014_v27, %s15403_s10 }
0x1e0e   :  { %7640 = vrot.lane.b32.xlu1 %v7627_v24, %s15405_s28 }
0x1e7c   :  { %v7631_v32 = vpop.permute.xlu1 %7630 }
0x1e7d   :  { %v7633_v15 = vmul.f32 %v15012_v36, %v7631_v32 }
0x1e7f   :  { %7635 = vrot.lane.b32.xlu0 %v7633_v15, %s15404_s23 }
0x1e80   :  { %v7641_v35 = vpop.permute.xlu1 %7640 }
0x1e81   :  { %7643 = vst.msk [vmem:[#allocation5] sm:$0xff] %vm1471_vm0, %v7641_v35 }
0x1e88   :  { %v7646_v37 = vld [vmem:[#allocation5] sm:$0xff] }
0x1e89   :  { %8145 = vrot.lane.b32.xlu1 %v7646_v37, %s15404_s23 }
0x1ef1   :  { %v7636_v40 = vpop.permute.xlu0 %7635 }
0x1ef2   :  { %7638 = vst.msk [vmem:[#allocation4] sm:$0xff] %vm1471_vm0, %v7636_v40  ;;  %7644 = vst.msk [vmem:[#allocation3 + $0x8] sm:$0xff] %vm1471_vm0, %v7636_v40 }
0x1ef9   :  { %v7645_v42 = vld [vmem:[#allocation4] sm:$0xff] }
0x1efa   :  { %v7649_v20 = vsel %vm1471_vm0, %v7645_v42, 0 }
0x1efb   :  { %v7720_v31 = vand.u32 4294901760, %v7649_v20  ;;  %v8146_v63 = vpop.permute.xlu1 %8145 }
0x1efd   :  { %v7721_v52 = vsub.f32 %v7649_v20, %v7720_v31 }
0x1eff   :  { %v7722_v62 = vand.u32 4294901760, %v7721_v52 }
0x1f01   :  { %v7723_v3 = vsub.f32 %v7721_v52, %v7722_v62 }
0x1f03   :  { %v7724_v11 = vand.u32 4294901760, %v7723_v3 }
0x1f05   :  { %13383 = vmatmul.mubr.f32.vlgmr.msra.gmra.mrb[22].mxu0 %v7724_v11 }
0x1f06   :  { %14348 = vmatpush3.bf16.msra.mxu0 %v16341_v60  ;;  %13393 = vmatprep.mubr.msk.f32.mxu0 %vm15402_vm2, %v15400_v0 }
0x1f07   :  { %14349 = vmatprep.subr.bf16.mxu0 %v15401_v19 }
0x1f0a   :  { %14351 = vmatpush3.bf16.msra.mxu0 %v16345_v14 }
0x1f0b   :  { %14352 = vmatprep.subr.bf16.mxu0 %v15401_v19 }
0x1f0d   :  { %13394 = vmatmul.mubr.f32.vlgmr.msra.gmra.mrb[22].mxu0 %v7720_v31 }
0x1f0e   :  { %14354 = vmatpush3.bf16.msra.mxu0 %v16347_v16  ;;  %13404 = vmatprep.mubr.msk.f32.mxu0 %vm15402_vm2, %v15400_v0 }
0x1f0f   :  { %14355 = vmatprep.subr.bf16.mxu0 %v15401_v19 }
0x1f12   :  { %14357 = vmatpush3.bf16.msra.mxu0 %v16349_v21 }
0x1f13   :  { %14358 = vmatprep.subr.bf16.mxu0 %v15401_v19 }
0x1f15   :  { %13405 = vmatmul.mubr.f32.vlgmr.msra.gmra.mrb[22].mxu0 %v7721_v52 }
0x1f16   :  { %14360 = vmatpush3.bf16.msra.mxu0 %v16328_v5  ;;  %13415 = vmatprep.mubr.msk.f32.mxu0 %vm15402_vm2, %v15400_v0 }
0x1f17   :  { %14361 = vmatprep.subr.bf16.mxu0 %v15401_v19 }
0x1f1a   :  { %14363 = vmatpush3.bf16.msra.mxu0 %v16337_v46 }
0x1f1b   :  { %14364 = vmatprep.subr.bf16.mxu0 %v15401_v19 }
0x1f1d   :  { %13416 = vmatmul.mubr.f32.vlgmr.msra.gmra.mrb[22].mxu0 %v7722_v62 }
0x1f1e   :  { %14366 = vmatpush3.bf16.msra.mxu0 %v16351_v28  ;;  %13426 = vmatprep.mubr.msk.f32.mxu0 %vm15402_vm2, %v15400_v0 }
0x1f1f   :  { %14367 = vmatprep.subr.bf16.mxu0 %v15401_v19 }
0x1f22   :  { %14369 = vmatpush3.bf16.msra.mxu0 %v16359_v43 }
0x1f23   :  { %14370 = vmatprep.subr.bf16.mxu0 %v15401_v19 }
0x1f25   :  { %13427 = vmatmul.mubr.f32.vlgmr.msra.gmra.mrb[22].mxu0 %v7720_v31 }
0x1f26   :  { %14372 = vmatpush3.bf16.msra.mxu0 %v16328_v5  ;;  %13437 = vmatprep.mubr.msk.f32.mxu0 %vm15402_vm2, %v15400_v0 }
0x1f27   :  { %14373 = vmatprep.subr.bf16.mxu0 %v15401_v19 }
0x1f2a   :  { %14375 = vmatpush3.bf16.msra.mxu0 %v16337_v46 }
0x1f2b   :  { %14412 = vmatprep.subr.bf16.mxu0 %v15401_v19 }
0x1f2d   :  { %13438 = vmatmul.mubr.f32.vlgmr.msra.gmra.mrb[22].mxu0 %v7720_v31 }
0x1f2e   :  { %14414 = vmatpush3.bf16.msra.mxu0 %v16328_v5  ;;  %13514 = vmatprep.mubr.msk.f32.mxu0 %vm15402_vm2, %v15400_v0 }
0x1f2f   :  { %14415 = vmatprep.subr.bf16.mxu0 %v15401_v19 }
0x1f32   :  { %14417 = vmatpush3.bf16.msra.mxu0 %v16337_v46 }
0x1f33   :  { %14418 = vmatprep.subr.bf16.mxu0 %v15401_v19 }
0x2000   :  { %v8132_v39 = vpop.f32.mrb[22].mxu0 }
0x2001   :  { %v8136_v12 = vadd.f32 %v16493_v41, %v8132_v39  ;;  %v13439_v13 = vpop.f32.mrb[23].mxu0 }
0x2003   :  { %15015 = vtanh.f32 %v8136_v12  ;;  %v11747_v25 = vmul.f32 -1.442695, %v8136_v12 }
0x2005   :  { %15017 = vpow2.f32 %v11747_v25 }
0x200d   :  { %v15016_v22 = vpop.eup %15015 }
0x200e   :  { %8150 = vrot.lane.b32.xlu0 %v15016_v22, %s15403_s10 }
0x200f   :  { %v15018_v33 = vpop.eup %15017 }
0x2010   :  { %v8140_v59 = vadd.f32 1.0, %v15018_v33 }
0x2012   :  { %15019 = vrcp.f32 %v8140_v59 }
0x201c   :  { %v15020_v26 = vpop.eup %15019 }
0x201d   :  { %v8148_v4 = vmul.f32 %v15020_v26, %v8146_v63 }
0x2080   :  { %v8151_v34 = vpop.permute.xlu0 %8150 }
0x2081   :  { %v8153_v61 = vmul.f32 %v15020_v26, %v8151_v34 }
0x2083   :  { %8155 = vrot.lane.b32.xlu0 %v8153_v61, %s15404_s23 }
0x20f5   :  { %v8156_v2 = vpop.permute.xlu0 %8155 }
0x20f6   :  { %v8158_v8 = vadd.f32 %v8156_v2, %v8148_v4 }
0x20f8   :  { %15021 = vtanh.f32 %v8158_v8 }
0x2102   :  { %v15022_v41 = vpop.eup %15021 }
0x2103   :  { %8161 = vrot.lane.b32.xlu1 %v15022_v41, %s15403_s10 }
0x2107   :  { %8171 = vrot.lane.b32.xlu1 %v8158_v8, %s15405_s28 }
0x2175   :  { %v8162_v9 = vpop.permute.xlu1 %8161 }
0x2176   :  { %v8164_v56 = vmul.f32 %v15020_v26, %v8162_v9 }
0x2178   :  { %8166 = vrot.lane.b32.xlu0 %v8164_v56, %s15404_s23 }
0x2179   :  { %v8172_v57 = vpop.permute.xlu1 %8171 }
0x217a   :  { %8174 = vst.msk [vmem:[#allocation5] sm:$0xff] %vm1471_vm0, %v8172_v57 }
0x2181   :  { %v8177_v6 = vld [vmem:[#allocation5] sm:$0xff] }
0x2182   :  { %8676 = vrot.lane.b32.xlu1 %v8177_v6, %s15404_s23 }
0x21ea   :  { %v8167_v49 = vpop.permute.xlu0 %8166 }
0x21eb   :  { %8169 = vst.msk [vmem:[#allocation4] sm:$0xff] %vm1471_vm0, %v8167_v49  ;;  %8175 = vst.msk [vmem:[#allocation3 + $0x10] sm:$0xff] %vm1471_vm0, %v8167_v49 }
0x21f2   :  { %v8176_v51 = vld [vmem:[#allocation4] sm:$0xff] }
0x21f3   :  { %v8180_v53 = vsel %vm1471_vm0, %v8176_v51, 0 }
0x21f4   :  { %v8251_v54 = vand.u32 4294901760, %v8180_v53  ;;  %v8677_v32 = vpop.permute.xlu1 %8676 }
0x21f6   :  { %v8252_v23 = vsub.f32 %v8180_v53, %v8251_v54 }
0x21f8   :  { %v8253_v58 = vand.u32 4294901760, %v8252_v23 }
0x21fa   :  { %v8254_v7 = vsub.f32 %v8252_v23, %v8253_v58 }
0x21fc   :  { %v8255_v47 = vand.u32 4294901760, %v8254_v7 }
0x21fe   :  { %13449 = vmatmul.mubr.f32.vlgmr.msra.gmra.mrb[24].mxu1 %v8255_v47 }
0x21ff   :  { %14384 = vmatpush3.bf16.msra.mxu1 %v16341_v60  ;;  %13459 = vmatprep.mubr.msk.f32.mxu1 %vm15402_vm2, %v15400_v0 }
0x2200   :  { %14385 = vmatprep.subr.bf16.mxu1 %v15401_v19 }
0x2203   :  { %14387 = vmatpush3.bf16.msra.mxu1 %v16345_v14 }
0x2204   :  { %14388 = vmatprep.subr.bf16.mxu1 %v15401_v19 }
0x2206   :  { %13460 = vmatmul.mubr.f32.vlgmr.msra.gmra.mrb[24].mxu1 %v8251_v54 }
0x2207   :  { %14390 = vmatpush3.bf16.msra.mxu1 %v16347_v16  ;;  %13470 = vmatprep.mubr.msk.f32.mxu1 %vm15402_vm2, %v15400_v0 }
0x2208   :  { %14391 = vmatprep.subr.bf16.mxu1 %v15401_v19 }
0x220b   :  { %14393 = vmatpush3.bf16.msra.mxu1 %v16349_v21 }
0x220c   :  { %14394 = vmatprep.subr.bf16.mxu1 %v15401_v19 }
0x220e   :  { %13471 = vmatmul.mubr.f32.vlgmr.msra.gmra.mrb[24].mxu1 %v8252_v23 }
0x220f   :  { %14396 = vmatpush3.bf16.msra.mxu1 %v16328_v5  ;;  %13481 = vmatprep.mubr.msk.f32.mxu1 %vm15402_vm2, %v15400_v0 }
0x2210   :  { %14397 = vmatprep.subr.bf16.mxu1 %v15401_v19 }
0x2213   :  { %14399 = vmatpush3.bf16.msra.mxu1 %v16337_v46 }
0x2214   :  { %14400 = vmatprep.subr.bf16.mxu1 %v15401_v19 }
0x2216   :  { %13482 = vmatmul.mubr.f32.vlgmr.msra.gmra.mrb[24].mxu1 %v8253_v58 }
0x2217   :  { %14402 = vmatpush3.bf16.msra.mxu1 %v16351_v28  ;;  %13492 = vmatprep.mubr.msk.f32.mxu1 %vm15402_vm2, %v15400_v0 }
0x2218   :  { %14403 = vmatprep.subr.bf16.mxu1 %v15401_v19 }
0x221b   :  { %14405 = vmatpush3.bf16.msra.mxu1 %v16359_v43 }
0x221c   :  { %14406 = vmatprep.subr.bf16.mxu1 %v15401_v19 }
0x221e   :  { %13493 = vmatmul.mubr.f32.vlgmr.msra.gmra.mrb[24].mxu1 %v8251_v54 }
0x221f   :  { %14408 = vmatpush3.bf16.msra.mxu1 %v16328_v5  ;;  %13503 = vmatprep.mubr.msk.f32.mxu1 %vm15402_vm2, %v15400_v0 }
0x2220   :  { %14409 = vmatprep.subr.bf16.mxu1 %v15401_v19 }
0x2223   :  { %14411 = vmatpush3.bf16.msra.mxu1 %v16337_v46 }
0x2224   :  { %14448 = vmatprep.subr.bf16.mxu1 %v15401_v19 }
0x2226   :  { %13504 = vmatmul.mubr.f32.vlgmr.msra.gmra.mrb[24].mxu1 %v8251_v54 }
0x2227   :  { %14450 = vmatpush3.bf16.msra.mxu1 %v16328_v5  ;;  %13580 = vmatprep.mubr.msk.f32.mxu1 %vm15402_vm2, %v15400_v0 }
0x2228   :  { %14451 = vmatprep.subr.bf16.mxu1 %v15401_v19 }
0x222b   :  { %14453 = vmatpush3.bf16.msra.mxu1 %v16337_v46 }
0x222c   :  { %14454 = vmatprep.subr.bf16.mxu1 %v15401_v19 }
0x22f9   :  { %v8663_v29 = vpop.f32.mrb[24].mxu1 }
0x22fa   :  { %v8667_v30 = vadd.f32 %v16491_v38, %v8663_v29  ;;  %v13505_v36 = vpop.f32.mrb[25].mxu1 }
0x22fc   :  { %15023 = vtanh.f32 %v8667_v30  ;;  %v11748_v48 = vmul.f32 -1.442695, %v8667_v30 }
0x22fe   :  { %15025 = vpow2.f32 %v11748_v48 }
0x2306   :  { %v15024_v44 = vpop.eup %15023 }
0x2307   :  { %8681 = vrot.lane.b32.xlu0 %v15024_v44, %s15403_s10 }
0x2308   :  { %v15026_v1 = vpop.eup %15025 }
0x2309   :  { %v8671_v18 = vadd.f32 1.0, %v15026_v1 }
0x230b   :  { %15027 = vrcp.f32 %v8671_v18 }
0x2315   :  { %v15028_v17 = vpop.eup %15027 }
0x2316   :  { %v8679_v15 = vmul.f32 %v15028_v17, %v8677_v32 }
0x2379   :  { %v8682_v24 = vpop.permute.xlu0 %8681 }
0x237a   :  { %v8684_v27 = vmul.f32 %v15028_v17, %v8682_v24 }
0x237c   :  { %8686 = vrot.lane.b32.xlu0 %v8684_v27, %s15404_s23 }
0x23ee   :  { %v8687_v35 = vpop.permute.xlu0 %8686 }
0x23ef   :  { %v8689_v37 = vadd.f32 %v8687_v35, %v8679_v15 }
0x23f1   :  { %15029 = vtanh.f32 %v8689_v37 }
0x23fb   :  { %v15030_v38 = vpop.eup %15029 }
0x23fc   :  { %8692 = vrot.lane.b32.xlu1 %v15030_v38, %s15403_s10 }
0x2400   :  { %8702 = vrot.lane.b32.xlu1 %v8689_v37, %s15405_s28 }
0x246e   :  { %v8693_v40 = vpop.permute.xlu1 %8692 }
0x246f   :  { %v8695_v42 = vmul.f32 %v15028_v17, %v8693_v40 }
0x2471   :  { %8697 = vrot.lane.b32.xlu0 %v8695_v42, %s15404_s23 }
0x2472   :  { %v8703_v20 = vpop.permute.xlu1 %8702 }
0x2473   :  { %8705 = vst.msk [vmem:[#allocation5] sm:$0xff] %vm1471_vm0, %v8703_v20 }
0x247a   :  { %v8708_v31 = vld [vmem:[#allocation5] sm:$0xff] }
0x247b   :  { %9207 = vrot.lane.b32.xlu1 %v8708_v31, %s15404_s23 }
0x24e3   :  { %v8698_v52 = vpop.permute.xlu0 %8697 }
0x24e4   :  { %8700 = vst.msk [vmem:[#allocation4] sm:$0xff] %vm1471_vm0, %v8698_v52  ;;  %8706 = vst.msk [vmem:[#allocation3 + $0x18] sm:$0xff] %vm1471_vm0, %v8698_v52 }
0x24eb   :  { %v8707_v62 = vld [vmem:[#allocation4] sm:$0xff] }
0x24ec   :  { %v8711_v3 = vsel %vm1471_vm0, %v8707_v62, 0 }
0x24ed   :  { %v8782_v11 = vand.u32 4294901760, %v8711_v3  ;;  %v9208_v41 = vpop.permute.xlu1 %9207 }
0x24ef   :  { %v8783_v39 = vsub.f32 %v8711_v3, %v8782_v11 }
0x24f1   :  { %v8784_v12 = vand.u32 4294901760, %v8783_v39 }
0x24f3   :  { %v8785_v13 = vsub.f32 %v8783_v39, %v8784_v12 }
0x24f5   :  { %v8786_v22 = vand.u32 4294901760, %v8785_v13 }
0x24f7   :  { %13515 = vmatmul.mubr.f32.vlgmr.msra.gmra.mrb[24].mxu0 %v8786_v22 }
0x24f8   :  { %14420 = vmatpush3.bf16.msra.mxu0 %v16341_v60  ;;  %13525 = vmatprep.mubr.msk.f32.mxu0 %vm15402_vm2, %v15400_v0 }
0x24f9   :  { %14421 = vmatprep.subr.bf16.mxu0 %v15401_v19 }
0x24fc   :  { %14423 = vmatpush3.bf16.msra.mxu0 %v16345_v14 }
0x24fd   :  { %14424 = vmatprep.subr.bf16.mxu0 %v15401_v19 }
0x24ff   :  { %13526 = vmatmul.mubr.f32.vlgmr.msra.gmra.mrb[24].mxu0 %v8782_v11 }
0x2500   :  { %14426 = vmatpush3.bf16.msra.mxu0 %v16347_v16  ;;  %13536 = vmatprep.mubr.msk.f32.mxu0 %vm15402_vm2, %v15400_v0 }
0x2501   :  { %14427 = vmatprep.subr.bf16.mxu0 %v15401_v19 }
0x2504   :  { %14429 = vmatpush3.bf16.msra.mxu0 %v16349_v21 }
0x2505   :  { %14430 = vmatprep.subr.bf16.mxu0 %v15401_v19 }
0x2507   :  { %13537 = vmatmul.mubr.f32.vlgmr.msra.gmra.mrb[24].mxu0 %v8783_v39 }
0x2508   :  { %14432 = vmatpush3.bf16.msra.mxu0 %v16328_v5  ;;  %13547 = vmatprep.mubr.msk.f32.mxu0 %vm15402_vm2, %v15400_v0 }
0x2509   :  { %14433 = vmatprep.subr.bf16.mxu0 %v15401_v19 }
0x250c   :  { %14435 = vmatpush3.bf16.msra.mxu0 %v16337_v46 }
0x250d   :  { %14436 = vmatprep.subr.bf16.mxu0 %v15401_v19 }
0x250f   :  { %13548 = vmatmul.mubr.f32.vlgmr.msra.gmra.mrb[24].mxu0 %v8784_v12 }
0x2510   :  { %14438 = vmatpush3.bf16.msra.mxu0 %v16351_v28  ;;  %13558 = vmatprep.mubr.msk.f32.mxu0 %vm15402_vm2, %v15400_v0 }
0x2511   :  { %14439 = vmatprep.subr.bf16.mxu0 %v15401_v19 }
0x2514   :  { %14441 = vmatpush3.bf16.msra.mxu0 %v16359_v43 }
0x2515   :  { %14442 = vmatprep.subr.bf16.mxu0 %v15401_v19 }
0x2517   :  { %13559 = vmatmul.mubr.f32.vlgmr.msra.gmra.mrb[24].mxu0 %v8782_v11 }
0x2518   :  { %14444 = vmatpush3.bf16.msra.mxu0 %v16328_v5  ;;  %13569 = vmatprep.mubr.msk.f32.mxu0 %vm15402_vm2, %v15400_v0 }
0x2519   :  { %14445 = vmatprep.subr.bf16.mxu0 %v15401_v19 }
0x251c   :  { %14447 = vmatpush3.bf16.msra.mxu0 %v16337_v46 }
0x251d   :  { %14484 = vmatprep.subr.bf16.mxu0 %v15401_v19 }
0x251f   :  { %13570 = vmatmul.mubr.f32.vlgmr.msra.gmra.mrb[24].mxu0 %v8782_v11 }
0x2520   :  { %14486 = vmatpush3.bf16.msra.mxu0 %v16328_v5  ;;  %13646 = vmatprep.mubr.msk.f32.mxu0 %vm15402_vm2, %v15400_v0 }
0x2521   :  { %14487 = vmatprep.subr.bf16.mxu0 %v15401_v19 }
0x2524   :  { %14489 = vmatpush3.bf16.msra.mxu0 %v16337_v46 }
0x2525   :  { %14490 = vmatprep.subr.bf16.mxu0 %v15401_v19 }
0x25f2   :  { %v9194_v25 = vpop.f32.mrb[24].mxu0 }
0x25f3   :  { %v9198_v33 = vadd.f32 %v16497_v10, %v9194_v25  ;;  %v13571_v59 = vpop.f32.mrb[25].mxu0 }
0x25f4   :  { %v10837_v59 = vld [vmem:[#allocation3] sm:$0xff] }
0x25f5   :  { %15031 = vtanh.f32 %v9198_v33  ;;  %v11749_v34 = vmul.f32 -1.442695, %v9198_v33 }
0x25f7   :  { %15033 = vpow2.f32 %v11749_v34 }
0x25ff   :  { %v15032_v26 = vpop.eup %15031 }
0x2600   :  { %9212 = vrot.lane.b32.xlu0 %v15032_v26, %s15403_s10  ;;  %v10857_v26 = vsel %vm1471_vm0, %v10837_v59, 0 }
0x2601   :  { %v15034_v61 = vpop.eup %15033  ;;  %v16771_v34 = vand.u32 4294901760, %v10857_v26 }
0x2602   :  { %v9202_v63 = vadd.f32 1.0, %v15034_v61  ;;  %v10838_v61 = vld [vmem:[#allocation3 + $0x8] sm:$0xff] }
0x2604   :  { %15035 = vrcp.f32 %v9202_v63  ;;  %v10839_v63 = vld [vmem:[#allocation3 + $0x10] sm:$0xff] }
0x260e   :  { %v15036_v4 = vpop.eup %15035 }
0x260f   :  { %v9210_v9 = vmul.f32 %v15036_v4, %v9208_v41  ;;  %v16783_v41 = vsub.f32 %v10857_v26, %v16771_v34 }
0x2672   :  { %v9213_v2 = vpop.permute.xlu0 %9212 }
0x2673   :  { %v9215_v8 = vmul.f32 %v15036_v4, %v9213_v2  ;;  %v16778_v2 = vld [vmem:[#allocation21] sm:$0xff] }
0x2675   :  { %9217 = vrot.lane.b32.xlu0 %v9215_v8, %s15404_s23  ;;  %v16780_v8 = vld [vmem:[#allocation21 + $0x8] sm:$0xff] }
0x26e7   :  { %v9218_v56 = vpop.permute.xlu0 %9217 }
0x26e8   :  { %v9220_v57 = vadd.f32 %v9218_v56, %v9210_v9  ;;  %v10863_v9 = vsel %vm1471_vm0, %v10839_v63, 0  ;;  %v10840_v56 = vld [vmem:[#allocation3 + $0x18] sm:$0xff] }
0x26ea   :  { %15037 = vtanh.f32 %v9220_v57 }
0x26f4   :  { %v15038_v10 = vpop.eup %15037 }
0x26f5   :  { %9223 = vrot.lane.b32.xlu1 %v15038_v10, %s15403_s10 }
0x26f9   :  { %9233 = vrot.lane.b32.xlu1 %v9220_v57, %s15405_s28 }
0x2767   :  { %v9224_v6 = vpop.permute.xlu1 %9223 }
0x2768   :  { %v9226_v49 = vmul.f32 %v15036_v4, %v9224_v6  ;;  %v10860_v4 = vsel %vm1471_vm0, %v10838_v61, 0  ;;  %v10881_v6 = vand.u32 4294901760, %v16778_v2 }
0x2769   :  { %v16787_v57 = vand.u32 4294901760, %v10860_v4 }
0x276a   :  { %9228 = vrot.lane.b32.xlu0 %v9226_v49, %s15404_s23  ;;  %v10884_v49 = vand.u32 4294901760, %v16780_v8 }
0x276b   :  { %v9234_v51 = vpop.permute.xlu1 %9233 }
0x276c   :  { %9236 = vst.msk [vmem:[#allocation5] sm:$0xff] %vm1471_vm0, %v9234_v51  ;;  %v10951_v51 = vand.u32 4294901760, %v16783_v41 }
0x2773   :  { %v9239_v53 = vld [vmem:[#allocation5] sm:$0xff] }
0x2774   :  { %9738 = vrot.lane.b32.xlu1 %v9239_v53, %s15404_s23  ;;  %v16793_v53 = vld [vmem:[#allocation21 + $0x10] sm:$0xff] }
0x27dc   :  { %v9229_v54 = vpop.permute.xlu0 %9228 }
0x27dd   :  { %9231 = vst.msk [vmem:[#allocation4] sm:$0xff] %vm1471_vm0, %v9229_v54  ;;  %9237 = vst.msk [vmem:[#allocation3 + $0x20] sm:$0xff] %vm1471_vm0, %v9229_v54  ;;  %v16795_v54 = vld [vmem:[#allocation21 + $0x18] sm:$0xff] }
0x27e4   :  { %v9238_v23 = vld [vmem:[#allocation4] sm:$0xff] }
0x27e5   :  { %v9242_v58 = vsel %vm1471_vm0, %v9238_v23, 0  ;;  %v10841_v10 = vld [vmem:[#allocation3 + $0x20] sm:$0xff]  ;;  %v16797_v23 = vand.u32 4294901760, %v10863_v9 }
0x27e6   :  { %v9313_v7 = vand.u32 4294901760, %v9242_v58  ;;  %v9739_v37 = vpop.permute.xlu1 %9738 }
0x27e8   :  { %v9314_v47 = vsub.f32 %v9242_v58, %v9313_v7  ;;  %v10866_v58 = vsel %vm1471_vm0, %v10840_v56, 0 }
0x27ea   :  { %v9315_v29 = vand.u32 4294901760, %v9314_v47 }
0x27ec   :  { %v9316_v30 = vsub.f32 %v9314_v47, %v9315_v29 }
0x27ee   :  { %v9317_v36 = vand.u32 4294901760, %v9316_v30  ;;  %v16813_v30 = vpack.c.bf16 %v10884_v49, %v10881_v6 }
0x27f0   :  { %13581 = vmatmul.mubr.f32.vlgmr.msra.gmra.mrb[26].mxu1 %v9317_v36  ;;  %v10887_v36 = vand.u32 4294901760, %v16793_v53 }
0x27f1   :  { %14456 = vmatpush3.bf16.msra.mxu1 %v16341_v60  ;;  %13591 = vmatprep.mubr.msk.f32.mxu1 %vm15402_vm2, %v15400_v0 }
0x27f2   :  { %14457 = vmatprep.subr.bf16.mxu1 %v15401_v19 }
0x27f5   :  { %14459 = vmatpush3.bf16.msra.mxu1 %v16345_v14 }
0x27f6   :  { %14460 = vmatprep.subr.bf16.mxu1 %v15401_v19 }
0x27f8   :  { %13592 = vmatmul.mubr.f32.vlgmr.msra.gmra.mrb[26].mxu1 %v9313_v7 }
0x27f9   :  { %14462 = vmatpush3.bf16.msra.mxu1 %v16347_v16  ;;  %13602 = vmatprep.mubr.msk.f32.mxu1 %vm15402_vm2, %v15400_v0 }
0x27fa   :  { %14463 = vmatprep.subr.bf16.mxu1 %v15401_v19 }
0x27fd   :  { %14465 = vmatpush3.bf16.msra.mxu1 %v16349_v21 }
0x27fe   :  { %14466 = vmatprep.subr.bf16.mxu1 %v15401_v19 }
0x2800   :  { %13603 = vmatmul.mubr.f32.vlgmr.msra.gmra.mrb[26].mxu1 %v9314_v47 }
0x2801   :  { %14468 = vmatpush3.bf16.msra.mxu1 %v16328_v5  ;;  %13613 = vmatprep.mubr.msk.f32.mxu1 %vm15402_vm2, %v15400_v0 }
0x2802   :  { %14469 = vmatprep.subr.bf16.mxu1 %v15401_v19 }
0x2805   :  { %14471 = vmatpush3.bf16.msra.mxu1 %v16337_v46 }
0x2806   :  { %14472 = vmatprep.subr.bf16.mxu1 %v15401_v19 }
0x2808   :  { %13614 = vmatmul.mubr.f32.vlgmr.msra.gmra.mrb[26].mxu1 %v9315_v29  ;;  %v16806_v29 = vsub.f32 %v10860_v4, %v16787_v57 }
0x2809   :  { %14474 = vmatpush3.bf16.msra.mxu1 %v16351_v28  ;;  %13624 = vmatprep.mubr.msk.f32.mxu1 %vm15402_vm2, %v15400_v0 }
0x280a   :  { %14475 = vmatprep.subr.bf16.mxu1 %v15401_v19 }
0x280d   :  { %14477 = vmatpush3.bf16.msra.mxu1 %v16359_v43 }
0x280e   :  { %14478 = vmatprep.subr.bf16.mxu1 %v15401_v19 }
0x2810   :  { %13625 = vmatmul.mubr.f32.vlgmr.msra.gmra.mrb[26].mxu1 %v9313_v7 }
0x2811   :  { %14480 = vmatpush3.bf16.msra.mxu1 %v16328_v5  ;;  %13635 = vmatprep.mubr.msk.f32.mxu1 %vm15402_vm2, %v15400_v0 }
0x2812   :  { %14481 = vmatprep.subr.bf16.mxu1 %v15401_v19 }
0x2815   :  { %14483 = vmatpush3.bf16.msra.mxu1 %v16337_v46 }
0x2816   :  { %14520 = vmatprep.subr.bf16.mxu1 %v15401_v19 }
0x2818   :  { %13636 = vmatmul.mubr.f32.vlgmr.msra.gmra.mrb[26].mxu1 %v9313_v7  ;;  %v10869_v7 = vsel %vm1471_vm0, %v10841_v10, 0 }
0x2819   :  { %14522 = vmatpush3.bf16.msra.mxu1 %v16328_v5  ;;  %13712 = vmatprep.mubr.msk.f32.mxu1 %vm15402_vm2, %v15400_v0 }
0x281a   :  { %14523 = vmatprep.subr.bf16.mxu1 %v15401_v19 }
0x281d   :  { %14525 = vmatpush3.bf16.msra.mxu1 %v16337_v46 }
0x281e   :  { %14526 = vmatprep.subr.bf16.mxu1 %v15401_v19 }
0x28eb   :  { %v9725_v44 = vpop.f32.mrb[26].mxu1 }
0x28ec   :  { %v9729_v48 = vadd.f32 %v16495_v45, %v9725_v44  ;;  %v13637_v1 = vpop.f32.mrb[27].mxu1  ;;  %v10890_v44 = vand.u32 4294901760, %v16795_v54 }
0x28ed   :  { %v10952_v1 = vsub.f32 %v16783_v41, %v10951_v51 }
0x28ee   :  { %15039 = vtanh.f32 %v9729_v48  ;;  %v11750_v17 = vmul.f32 -1.442695, %v9729_v48  ;;  %v16817_v48 = vand.u32 4294901760, %v10866_v58 }
0x28f0   :  { %15041 = vpow2.f32 %v11750_v17  ;;  %v16825_v17 = vand.u32 4294901760, %v10869_v7 }
0x28f8   :  { %v15040_v18 = vpop.eup %15039 }
0x28f9   :  { %9743 = vrot.lane.b32.xlu0 %v15040_v18, %s15403_s10  ;;  %v16823_v18 = vsub.f32 %v10863_v9, %v16797_v23 }
0x28fa   :  { %v15042_v24 = vpop.eup %15041 }
0x28fb   :  { %v9733_v27 = vadd.f32 1.0, %v15042_v24 }
0x28fd   :  { %15043 = vrcp.f32 %v9733_v27  ;;  %v16834_v27 = vpack.c.bf16 %v10890_v44, %v10887_v36 }
0x2907   :  { %v15044_v32 = vpop.eup %15043 }
0x2908   :  { %v9741_v38 = vmul.f32 %v15044_v32, %v9739_v37  ;;  %v10953_v37 = vand.u32 4294901760, %v10952_v1 }
0x296b   :  { %v9744_v15 = vpop.permute.xlu0 %9743 }
0x296c   :  { %v9746_v35 = vmul.f32 %v15044_v32, %v9744_v15  ;;  %v16838_v15 = vsub.f32 %v10866_v58, %v16817_v48 }
0x296e   :  { %9748 = vrot.lane.b32.xlu0 %v9746_v35, %s15404_s23 }
0x29e0   :  { %v9749_v40 = vpop.permute.xlu0 %9748 }
0x29e1   :  { %v9751_v42 = vadd.f32 %v9749_v40, %v9741_v38  ;;  %v10971_v38 = vand.u32 4294901760, %v16823_v18  ;;  %v16844_v40 = vsub.f32 %v10869_v7, %v16825_v17 }
0x29e3   :  { %15045 = vtanh.f32 %v9751_v42 }
0x29ed   :  { %v15046_v45 = vpop.eup %15045 }
0x29ee   :  { %9754 = vrot.lane.b32.xlu1 %v15046_v45, %s15403_s10  ;;  %v10981_v45 = vand.u32 4294901760, %v16838_v15 }
0x29f2   :  { %9764 = vrot.lane.b32.xlu1 %v9751_v42, %s15405_s28 }
0x2a60   :  { %v9755_v20 = vpop.permute.xlu1 %9754 }
0x2a61   :  { %v9757_v31 = vmul.f32 %v15044_v32, %v9755_v20  ;;  %v10961_v32 = vand.u32 4294901760, %v16806_v29 }
0x2a63   :  { %9759 = vrot.lane.b32.xlu0 %v9757_v31, %s15404_s23  ;;  %v10962_v42 = vsub.f32 %v16806_v29, %v10961_v32  ;;  %v10972_v31 = vsub.f32 %v16823_v18, %v10971_v38 }
0x2a64   :  { %v9765_v52 = vpop.permute.xlu1 %9764 }
0x2a65   :  { %9767 = vst.msk [vmem:[#allocation5] sm:$0xff] %vm1471_vm0, %v9765_v52  ;;  %v10991_v52 = vand.u32 4294901760, %v16844_v40 }
0x2a6c   :  { %v9770_v62 = vld [vmem:[#allocation5] sm:$0xff] }
0x2a6d   :  { %10269 = vrot.lane.b32.xlu1 %v9770_v62, %s15404_s23  ;;  %v10963_v62 = vand.u32 4294901760, %v10962_v42 }
0x2ad5   :  { %v9760_v3 = vpop.permute.xlu0 %9759 }
0x2ad6   :  { %9762 = vst.msk [vmem:[#allocation4] sm:$0xff] %vm1471_vm0, %v9760_v3  ;;  %9768 = vst.msk [vmem:[#allocation3 + $0x28] sm:$0xff] %vm1471_vm0, %v9760_v3  ;;  %v10982_v3 = vsub.f32 %v16838_v15, %v10981_v45 }
0x2add   :  { %v9769_v11 = vld [vmem:[#allocation4] sm:$0xff]  ;;  %v10842_v47 = vld [vmem:[#allocation3 + $0x28] sm:$0xff] }
0x2ade   :  { %v9773_v39 = vsel %vm1471_vm0, %v9769_v11, 0  ;;  %v10872_v24 = vsel %vm1471_vm0, %v10842_v47, 0 }
0x2adf   :  { %v16748_v12 = vand.u32 4294901760, %v9773_v39  ;;  %v16840_v35 = vand.u32 4294901760, %v10872_v24  ;;  %v10270_v47 = vpop.permute.xlu1 %10269 }
0x2ae1   :  { %v9845_v13 = vsub.f32 %v9773_v39, %v16748_v12  ;;  %v16854_v20 = vsub.f32 %v10872_v24, %v16840_v35  ;;  %v10973_v39 = vand.u32 4294901760, %v10972_v31 }
0x2ae3   :  { %v9846_v22 = vand.u32 4294901760, %v9845_v13  ;;  %v11001_v11 = vand.u32 4294901760, %v16854_v20 }
0x2ae5   :  { %v9847_v25 = vsub.f32 %v9845_v13, %v9846_v22 }
0x2ae7   :  { %v9848_v33 = vand.u32 4294901760, %v9847_v25 }
0x2ae9   :  { %13647 = vmatmul.mubr.f32.vlgmr.msra.gmra.mrb[26].mxu0 %v9848_v33 }
0x2aea   :  { %14492 = vmatpush3.bf16.msra.mxu0 %v16341_v60  ;;  %13657 = vmatprep.mubr.msk.f32.mxu0 %vm15402_vm2, %v15400_v0 }
0x2aeb   :  { %14493 = vmatprep.subr.bf16.mxu0 %v15401_v19 }
0x2aee   :  { %14495 = vmatpush3.bf16.msra.mxu0 %v16345_v14 }
0x2aef   :  { %14496 = vmatprep.subr.bf16.mxu0 %v15401_v19 }
0x2af1   :  { %13658 = vmatmul.mubr.f32.vlgmr.msra.gmra.mrb[26].mxu0 %v16748_v12 }
0x2af2   :  { %14498 = vmatpush3.bf16.msra.mxu0 %v16347_v16  ;;  %13668 = vmatprep.mubr.msk.f32.mxu0 %vm15402_vm2, %v15400_v0 }
0x2af3   :  { %14499 = vmatprep.subr.bf16.mxu0 %v15401_v19 }
0x2af6   :  { %14501 = vmatpush3.bf16.msra.mxu0 %v16349_v21 }
0x2af7   :  { %14502 = vmatprep.subr.bf16.mxu0 %v15401_v19 }
0x2af9   :  { %13669 = vmatmul.mubr.f32.vlgmr.msra.gmra.mrb[26].mxu0 %v9845_v13  ;;  %v10983_v13 = vand.u32 4294901760, %v10982_v3 }
0x2afa   :  { %14504 = vmatpush3.bf16.msra.mxu0 %v16328_v5  ;;  %13679 = vmatprep.mubr.msk.f32.mxu0 %vm15402_vm2, %v15400_v0 }
0x2afb   :  { %14505 = vmatprep.subr.bf16.mxu0 %v15401_v19 }
0x2afe   :  { %14507 = vmatpush3.bf16.msra.mxu0 %v16337_v46 }
0x2aff   :  { %14508 = vmatprep.subr.bf16.mxu0 %v15401_v19 }
0x2b01   :  { %13680 = vmatmul.mubr.f32.vlgmr.msra.gmra.mrb[26].mxu0 %v9846_v22  ;;  %v11002_v22 = vsub.f32 %v16854_v20, %v11001_v11 }
0x2b02   :  { %14510 = vmatpush3.bf16.msra.mxu0 %v16351_v28  ;;  %13690 = vmatprep.mubr.msk.f32.mxu0 %vm15402_vm2, %v15400_v0 }
0x2b03   :  { %14511 = vmatprep.subr.bf16.mxu0 %v15401_v19  ;;  %v11003_v33 = vand.u32 4294901760, %v11002_v22 }
0x2b06   :  { %14513 = vmatpush3.bf16.msra.mxu0 %v16359_v43 }
0x2b07   :  { %14514 = vmatprep.subr.bf16.mxu0 %v15401_v19 }
0x2b09   :  { %13691 = vmatmul.mubr.f32.vlgmr.msra.gmra.mrb[26].mxu0 %v16748_v12 }
0x2b0a   :  { %14516 = vmatpush3.bf16.msra.mxu0 %v16328_v5  ;;  %13701 = vmatprep.mubr.msk.f32.mxu0 %vm15402_vm2, %v15400_v0 }
0x2b0b   :  { %14517 = vmatprep.subr.bf16.mxu0 %v15401_v19 }
0x2b0e   :  { %14519 = vmatpush3.bf16.msra.mxu0 %v16337_v46 }
0x2b0f   :  { %14557 = vmatprep.subr.bf16.mxu0 %v16813_v30 }
0x2b11   :  { %13702 = vmatmul.mubr.f32.vlgmr.msra.gmra.mrb[26].mxu0 %v16748_v12  ;;  %v10992_v12 = vsub.f32 %v16844_v40, %v10991_v52 }
0x2b12   :  { %14559 = vmatpush3.bf16.msra.mxu0 %v16813_v30  ;;  %13778 = vmatprep.mubr.f32.mxu0 %v10953_v37 }
0x2b13   :  { %14561 = vmatprep.subr.bf16.mxu0 %v16834_v27  ;;  %v10993_v25 = vand.u32 4294901760, %v10992_v12 }
0x2b16   :  { %14563 = vmatpush3.bf16.msra.mxu0 %v16834_v27 }
0x2b19   :  { %13779 = vmatmul.mubr.f32.vlgmr.msra.gmra.mrb[28].mxu0 %v10963_v62 }
0x2b1a   :  { %13781 = vmatprep.mubr.f32.mxu0 %v10973_v39 }
0x2b1d   :  { %13782 = vmatmul.mubr.f32.gmra.mrb[30].mxu0 %v10983_v13 }
0x2b1e   :  { %13784 = vmatprep.mubr.f32.mxu0 %v10993_v25 }
0x2b21   :  { %13785 = vmatmul.mubr.f32.gmra.mrb[32].mxu0 %v11003_v33 }
0x2be4   :  { %v10256_v59 = vpop.f32.mrb[26].mxu0 }
0x2be5   :  { %v10260_v26 = vadd.f32 %v16501_v55, %v10256_v59  ;;  %v13703_v61 = vpop.f32.mrb[27].mxu0 }
0x2be7   :  { %15047 = vtanh.f32 %v10260_v26  ;;  %v11751_v4 = vmul.f32 -1.442695, %v10260_v26 }
0x2be9   :  { %15049 = vpow2.f32 %v11751_v4 }
0x2bf1   :  { %v15048_v63 = vpop.eup %15047 }
0x2bf2   :  { %10274 = vrot.lane.b32.xlu0 %v15048_v63, %s15403_s10 }
0x2bf3   :  { %v15050_v9 = vpop.eup %15049 }
0x2bf4   :  { %v10264_v56 = vadd.f32 1.0, %v15050_v9 }
0x2bf6   :  { %15051 = vrcp.f32 %v10264_v56 }
0x2c00   :  { %v15052_v10 = vpop.eup %15051 }
0x2c01   :  { %v10272_v1 = vmul.f32 %v15052_v10, %v10270_v47 }
0x2c64   :  { %v10275_v58 = vpop.permute.xlu0 %10274 }
0x2c65   :  { %v10277_v7 = vmul.f32 %v15052_v10, %v10275_v58 }
0x2c67   :  { %10279 = vrot.lane.b32.xlu0 %v10277_v7, %s15404_s23 }
0x2cd9   :  { %v10280_v24 = vpop.permute.xlu0 %10279 }
0x2cda   :  { %v10282_v37 = vadd.f32 %v10280_v24, %v10272_v1 }
0x2cdc   :  { %15053 = vtanh.f32 %v10282_v37 }
0x2ce6   :  { %v15054_v55 = vpop.eup %15053 }
0x2ce7   :  { %10285 = vrot.lane.b32.xlu1 %v15054_v55, %s15403_s10  ;;  %v11038_v55 = vsub.f32 %v16780_v8, %v10884_v49 }
0x2ceb   :  { %10295 = vrot.lane.b32.xlu1 %v10282_v37, %s15405_s28  ;;  %v11031_v37 = vsub.f32 %v16778_v2, %v10881_v6 }
0x2d59   :  { %v10286_v42 = vpop.permute.xlu1 %10285 }
0x2d5a   :  { %v10288_v31 = vmul.f32 %v15052_v10, %v10286_v42  ;;  %v11045_v42 = vsub.f32 %v16793_v53, %v10887_v36 }
0x2d5c   :  { %10290 = vrot.lane.b32.xlu0 %v10288_v31, %s15404_s23  ;;  %v11052_v31 = vsub.f32 %v16795_v54, %v10890_v44  ;;  %v14572_v44 = vpack.c.bf16 %v11038_v55, %v11031_v37 }
0x2d5d   :  { %v10296_v62 = vpop.permute.xlu1 %10295 }
0x2d5e   :  { %10298 = vst.msk [vmem:[#allocation5] sm:$0xff] %vm1471_vm0, %v10296_v62  ;;  %v11032_v62 = vand.u32 4294901760, %v11031_v37 }
0x2d65   :  { %v10301_v3 = vld [vmem:[#allocation5] sm:$0xff] }
0x2d66   :  { %10800 = vrot.lane.b32.xlu1 %v10301_v3, %s15404_s23  ;;  %v11039_v3 = vand.u32 4294901760, %v11038_v55 }
0x2dce   :  { %v10291_v39 = vpop.permute.xlu0 %10290 }
0x2dcf   :  { %10293 = vst.msk [vmem:[#allocation4] sm:$0xff] %vm1471_vm0, %v10291_v39  ;;  %10299 = vst.msk [vmem:[#allocation3 + $0x30] sm:$0xff] %vm1471_vm0, %v10291_v39  ;;  %v11046_v39 = vand.u32 4294901760, %v11045_v42 }
0x2dd6   :  { %v10300_v12 = vld [vmem:[#allocation4] sm:$0xff]  ;;  %v10843_v13 = vld [vmem:[#allocation3 + $0x30] sm:$0xff] }
0x2dd7   :  { %v10304_v22 = vsel %vm1471_vm0, %v10300_v12, 0  ;;  %v10875_v25 = vsel %vm1471_vm0, %v10843_v13, 0  ;;  %v11053_v12 = vand.u32 4294901760, %v11052_v31  ;;  %v11033_v13 = vsub.f32 %v11031_v37, %v11032_v62 }
0x2dd8   :  { %v10375_v33 = vand.u32 4294901760, %v10304_v22  ;;  %v16883_v59 = vand.u32 4294901760, %v10875_v25 }
0x2dd9   :  { %v11054_v2 = vsub.f32 %v11052_v31, %v11053_v12  ;;  %v11034_v6 = vand.u32 4294901760, %v11033_v13 }
0x2dda   :  { %v10376_v26 = vsub.f32 %v10304_v22, %v10375_v33  ;;  %v16886_v61 = vsub.f32 %v10875_v25, %v16883_v59  ;;  %v11040_v22 = vsub.f32 %v11038_v55, %v11039_v3  ;;  %v11047_v25 = vsub.f32 %v11045_v42, %v11046_v39 }
0x2ddb   :  { %v11055_v8 = vand.u32 4294901760, %v11054_v2 }
0x2ddc   :  { %v10377_v63 = vand.u32 4294901760, %v10376_v26  ;;  %v11011_v4 = vand.u32 4294901760, %v16886_v61 }
0x2dde   :  { %v10378_v9 = vsub.f32 %v10376_v26, %v10377_v63  ;;  %v11012_v56 = vsub.f32 %v16886_v61, %v11011_v4 }
0x2de0   :  { %v10379_v10 = vand.u32 4294901760, %v10378_v9  ;;  %v11013_v58 = vand.u32 4294901760, %v11012_v56  ;;  %v14576_v56 = vpack.c.bf16 %v11052_v31, %v11045_v42 }
0x2de2   :  { %13713 = vmatmul.mubr.f32.vlgmr.msra.gmra.mrb[28].mxu1 %v10379_v10  ;;  %13787 = vmatprep.mubr.f32.mxu0 %v11013_v58  ;;  %v14588_v10 = vpack.c.bf16 %v11039_v3, %v11032_v62  ;;  %v14592_v58 = vpack.c.bf16 %v11053_v12, %v11046_v39 }
0x2de3   :  { %14528 = vmatpush3.bf16.msra.mxu1 %v16341_v60  ;;  %13723 = vmatprep.mubr.msk.f32.mxu1 %vm15402_vm2, %v15400_v0 }
0x2de4   :  { %14529 = vmatprep.subr.bf16.mxu1 %v15401_v19 }
0x2de7   :  { %14531 = vmatpush3.bf16.msra.mxu1 %v16345_v14 }
0x2de8   :  { %14532 = vmatprep.subr.bf16.mxu1 %v15401_v19 }
0x2dea   :  { %13724 = vmatmul.mubr.f32.vlgmr.msra.gmra.mrb[28].mxu1 %v10375_v33 }
0x2deb   :  { %14534 = vmatpush3.bf16.msra.mxu1 %v16347_v16  ;;  %13734 = vmatprep.mubr.msk.f32.mxu1 %vm15402_vm2, %v15400_v0 }
0x2dec   :  { %14535 = vmatprep.subr.bf16.mxu1 %v15401_v19 }
0x2def   :  { %14537 = vmatpush3.bf16.msra.mxu1 %v16349_v21 }
0x2df0   :  { %14538 = vmatprep.subr.bf16.mxu1 %v15401_v19 }
0x2df2   :  { %13735 = vmatmul.mubr.f32.vlgmr.msra.gmra.mrb[28].mxu1 %v10376_v26  ;;  %v11048_v26 = vand.u32 4294901760, %v11047_v25 }
0x2df3   :  { %14540 = vmatpush3.bf16.msra.mxu1 %v16328_v5  ;;  %13745 = vmatprep.mubr.msk.f32.mxu1 %vm15402_vm2, %v15400_v0 }
0x2df4   :  { %14541 = vmatprep.subr.bf16.mxu1 %v15401_v19 }
0x2df7   :  { %14543 = vmatpush3.bf16.msra.mxu1 %v16337_v46 }
0x2df8   :  { %14544 = vmatprep.subr.bf16.mxu1 %v15401_v19 }
0x2dfa   :  { %13746 = vmatmul.mubr.f32.vlgmr.msra.gmra.mrb[28].mxu1 %v10377_v63  ;;  %v14568_v63 = vpack.c.bf16 %v11055_v8, %v11048_v26 }
0x2dfb   :  { %14546 = vmatpush3.bf16.msra.mxu1 %v16351_v28  ;;  %13756 = vmatprep.mubr.msk.f32.mxu1 %vm15402_vm2, %v15400_v0 }
0x2dfc   :  { %14547 = vmatprep.subr.bf16.mxu1 %v15401_v19 }
0x2dff   :  { %14549 = vmatpush3.bf16.msra.mxu1 %v16359_v43 }
0x2e00   :  { %14550 = vmatprep.subr.bf16.mxu1 %v15401_v19 }
0x2e02   :  { %13757 = vmatmul.mubr.f32.vlgmr.msra.gmra.mrb[28].mxu1 %v10375_v33 }
0x2e03   :  { %14552 = vmatpush3.bf16.msra.mxu1 %v16328_v5  ;;  %13767 = vmatprep.mubr.msk.f32.mxu1 %vm15402_vm2, %v15400_v0 }
0x2e04   :  { %14553 = vmatprep.subr.bf16.mxu1 %v15401_v19  ;;  %v10801_v19 = vpop.permute.xlu1 %10800 }
0x2e07   :  { %14555 = vmatpush3.bf16.msra.mxu1 %v16337_v46 }
0x2e0a   :  { %13768 = vmatmul.mubr.f32.vlgmr.msra.gmra.mrb[28].mxu1 %v10375_v33  ;;  %v11041_v33 = vand.u32 4294901760, %v11040_v22 }
0x2e0c   :  { %v14564_v49 = vpack.c.bf16 %v11041_v33, %v11034_v6 }
0x2e0e   :  { %14565 = vmatprep.subr.bf16.mxu0 %v14564_v49 }
0x2e0f   :  { %14567 = vmatpush3.bf16.msra.mxu0 %v14564_v49 }
0x2e10   :  { %14569 = vmatprep.subr.bf16.mxu0 %v14568_v63 }
0x2e13   :  { %14571 = vmatpush3.bf16.msra.mxu0 %v14568_v63 }
0x2e14   :  { %14573 = vmatprep.subr.bf16.mxu0 %v14572_v44 }
0x2edd   :  { %v10787_v60 = vpop.f32.mrb[28].mxu1 }
0x2ede   :  { %v10791_v14 = vadd.f32 %v16499_v50, %v10787_v60  ;;  %v13769_v16 = vpop.f32.mrb[29].mxu1 }
0x2ee0   :  { %15055 = vtanh.f32 %v10791_v14  ;;  %v11752_v28 = vmul.f32 -1.442695, %v10791_v14 }
0x2ee2   :  { %15057 = vpow2.f32 %v11752_v28 }
0x2eea   :  { %v15056_v21 = vpop.eup %15055 }
0x2eeb   :  { %10805 = vrot.lane.b32.xlu0 %v15056_v21, %s15403_s10 }
0x2eec   :  { %v15058_v43 = vpop.eup %15057 }
0x2eed   :  { %v10795_v5 = vadd.f32 1.0, %v15058_v43 }
0x2eef   :  { %15059 = vrcp.f32 %v10795_v5 }
0x2ef9   :  { %v15060_v7 = vpop.eup %15059 }
0x2efa   :  { %v10803_v46 = vmul.f32 %v15060_v7, %v10801_v19 }
0x2f5d   :  { %v10806_v0 = vpop.permute.xlu0 %10805 }
0x2f5e   :  { %v10808_v47 = vmul.f32 %v15060_v7, %v10806_v0 }
0x2f60   :  { %10810 = vrot.lane.b32.xlu0 %v10808_v47, %s15404_s23 }
0x2fd2   :  { %v10811_v1 = vpop.permute.xlu0 %10810 }
0x2fd3   :  { %v10813_v24 = vadd.f32 %v10811_v1, %v10803_v46 }
0x2fd5   :  { %15061 = vtanh.f32 %v10813_v24 }
0x2fdf   :  { %v15062_v50 = vpop.eup %15061 }
0x2fe0   :  { %10816 = vrot.lane.b32.xlu1 %v15062_v50, %s15403_s10 }
0x2fe4   :  { %10826 = vrot.lane.b32.xlu1 %v10813_v24, %s15405_s28 }
0x3052   :  { %v10817_v9 = vpop.permute.xlu1 %10816 }
0x3053   :  { %v10819_v53 = vmul.f32 %v15060_v7, %v10817_v9 }
0x3055   :  { %10821 = vrot.lane.b32.xlu0 %v10819_v53, %s15404_s23 }
0x3056   :  { %v10827_v54 = vpop.permute.xlu1 %10826 }
0x3057   :  { %10829 = vst.msk [vmem:[#allocation5] sm:$0xff] %vm1471_vm0, %v10827_v54 }
0x305e   :  { %v10834_v36 = vld [vmem:[#allocation5] sm:$0xff] }
0x305f   :  { %10836 = vst.msk [vmem:[#allocation27 + $0x8] sm:$0xff] %vm1471_vm0, %v10834_v36 }
0x30c7   :  { %v10822_v60 = vpop.permute.xlu0 %10821 }
0x30c8   :  { %10824 = vst.msk [vmem:[#allocation4] sm:$0xff] %vm1471_vm0, %v10822_v60  ;;  %10830 = vst.msk [vmem:[#allocation3 + $0x38] sm:$0xff] %vm1471_vm0, %v10822_v60 }
0x30cf   :  { %v10844_v14 = vld [vmem:[#allocation3 + $0x38] sm:$0xff]  ;;  %v10831_v16 = vld [vmem:[#allocation4] sm:$0xff] }
0x30d0   :  { %v10878_v21 = vsel %vm1471_vm0, %v10844_v14, 0  ;;  %10833 = vst.msk [vmem:[#allocation25 + $0x8] sm:$0xff] %vm1471_vm0, %v10831_v16 }
0x30d1   :  { %v11019_v28 = vand.u32 4294901760, %v10878_v21 }
0x30d3   :  { %v11020_v43 = vsub.f32 %v10878_v21, %v11019_v28 }
0x30d5   :  { %v11021_v5 = vand.u32 4294901760, %v11020_v43 }
0x30d7   :  { %v11022_v7 = vsub.f32 %v11020_v43, %v11021_v5 }
0x30d9   :  { %v11023_v0 = vand.u32 4294901760, %v11022_v7 }
0x30db   :  { %13788 = vmatmul.mubr.f32.gmra.mrb[34].mxu0 %v11023_v0 }
0x30dc   :  { %13798 = vmatprep.mubr.f32.mxu0 %v16771_v34 }
0x30df   :  { %13799 = vmatmul.mubr.f32.vlgmr.msra.gmra.mrb[28].mxu0 %v16787_v57 }
0x30e0   :  { %13801 = vmatprep.mubr.f32.mxu0 %v16797_v23  ;;  %14575 = vmatpush3.bf16.msra.mxu0 %v14572_v44 }
0x30e1   :  { %14577 = vmatprep.subr.bf16.mxu0 %v14576_v56 }
0x30e3   :  { %13802 = vmatmul.mubr.f32.gmra.mrb[30].mxu0 %v16817_v48 }
0x30e4   :  { %13804 = vmatprep.mubr.f32.mxu0 %v16825_v17  ;;  %14579 = vmatpush3.bf16.msra.mxu0 %v14576_v56 }
0x30e5   :  { %14581 = vmatprep.subr.bf16.mxu0 %v16813_v30 }
0x30e7   :  { %13805 = vmatmul.mubr.f32.gmra.mrb[32].mxu0 %v16840_v35 }
0x30e8   :  { %13807 = vmatprep.mubr.f32.mxu0 %v16883_v59 }
0x30eb   :  { %13808 = vmatmul.mubr.f32.gmra.mrb[34].mxu0 %v11019_v28 }
0x30ec   :  { %13818 = vmatprep.mubr.f32.mxu0 %v16783_v41 }
0x30ef   :  { %13819 = vmatmul.mubr.f32.vlgmr.msra.gmra.mrb[28].mxu0 %v16806_v29 }
0x30f0   :  { %13821 = vmatprep.mubr.f32.mxu0 %v16823_v18  ;;  %14583 = vmatpush3.bf16.msra.mxu0 %v16813_v30 }
0x30f1   :  { %14585 = vmatprep.subr.bf16.mxu0 %v16834_v27 }
0x30f3   :  { %13822 = vmatmul.mubr.f32.gmra.mrb[30].mxu0 %v16838_v15 }
0x30f4   :  { %13824 = vmatprep.mubr.f32.mxu0 %v16844_v40  ;;  %14587 = vmatpush3.bf16.msra.mxu0 %v16834_v27 }
0x30f5   :  { %14589 = vmatprep.subr.bf16.mxu0 %v14588_v10 }
0x30f7   :  { %13825 = vmatmul.mubr.f32.gmra.mrb[32].mxu0 %v16854_v20 }
0x30f8   :  { %13827 = vmatprep.mubr.f32.mxu0 %v16886_v61 }
0x30fb   :  { %13828 = vmatmul.mubr.f32.gmra.mrb[34].mxu0 %v11020_v43 }
0x30fc   :  { %13838 = vmatprep.mubr.f32.mxu0 %v10951_v51 }
0x30ff   :  { %13839 = vmatmul.mubr.f32.vlgmr.msra.gmra.mrb[28].mxu0 %v10961_v32 }
0x3100   :  { %13841 = vmatprep.mubr.f32.mxu0 %v10971_v38  ;;  %14591 = vmatpush3.bf16.msra.mxu0 %v14588_v10 }
0x3101   :  { %14593 = vmatprep.subr.bf16.mxu0 %v14592_v58 }
0x3103   :  { %13842 = vmatmul.mubr.f32.gmra.mrb[30].mxu0 %v10981_v45 }
0x3104   :  { %13844 = vmatprep.mubr.f32.mxu0 %v10991_v52  ;;  %14595 = vmatpush3.bf16.msra.mxu0 %v14592_v58 }
0x3105   :  { %14597 = vmatprep.subr.bf16.mxu0 %v16813_v30 }
0x3107   :  { %13845 = vmatmul.mubr.f32.gmra.mrb[32].mxu0 %v11001_v11 }
0x3108   :  { %13847 = vmatprep.mubr.f32.mxu0 %v11011_v4 }
0x310b   :  { %13848 = vmatmul.mubr.f32.gmra.mrb[34].mxu0 %v11021_v5 }
0x310c   :  { %13858 = vmatprep.mubr.f32.mxu0 %v16771_v34 }
0x310f   :  { %13859 = vmatmul.mubr.f32.vlgmr.msra.gmra.mrb[28].mxu0 %v16787_v57 }
0x3110   :  { %13861 = vmatprep.mubr.f32.mxu0 %v16797_v23  ;;  %14599 = vmatpush3.bf16.msra.mxu0 %v16813_v30 }
0x3111   :  { %14601 = vmatprep.subr.bf16.mxu0 %v16834_v27 }
0x3113   :  { %13862 = vmatmul.mubr.f32.gmra.mrb[30].mxu0 %v16817_v48 }
0x3114   :  { %13864 = vmatprep.mubr.f32.mxu0 %v16825_v17  ;;  %14603 = vmatpush3.bf16.msra.mxu0 %v16834_v27 }
0x3117   :  { %13865 = vmatmul.mubr.f32.gmra.mrb[32].mxu0 %v16840_v35 }
0x3118   :  { %13867 = vmatprep.mubr.f32.mxu0 %v16883_v59 }
0x311b   :  { %13868 = vmatmul.mubr.f32.gmra.mrb[34].mxu0 %v11019_v28 }
0x311c   :  { %13878 = vmatprep.mubr.f32.mxu0 %v16771_v34 }
0x311f   :  { %13879 = vmatmul.mubr.f32.vlgmr.msra.gmra.mrb[28].mxu0 %v16787_v57 }
0x3120   :  { %13881 = vmatprep.mubr.f32.mxu0 %v16797_v23 }
0x3123   :  { %13882 = vmatmul.mubr.f32.gmra.mrb[30].mxu0 %v16817_v48 }
0x3124   :  { %13884 = vmatprep.mubr.f32.mxu0 %v16825_v17 }
0x3127   :  { %13885 = vmatmul.mubr.f32.gmra.mrb[32].mxu0 %v16840_v35 }
0x3128   :  { %13887 = vmatprep.mubr.f32.mxu0 %v16883_v59 }
0x312b   :  { %13888 = vmatmul.mubr.f32.gmra.mrb[34].mxu0 %v11019_v28 }
0x312c   :  { %15316 = shalt.err (!%p15313_p8)
}
0x312d   :  { %s15317_s30 = scalar_lea.hbm %s17060_s12, 256 }
0x312e   :  { %p15318_p9 = scmp.ne.s32.totalorder %s17060_s12, %s15317_s30  ;;  %p15321_p10 = scmp.lt.u32.totalorder %s15317_s30, %s17060_s12 }
0x3130   :  { %p15323_p11 = pnand %p15321_p10, %p15318_p9 }
0x3132   :  { %15326 = shalt.err (!%p15323_p11)
}
0x3133   :  { %11705 = dma.vmem_to_hbm [thread:$0]  %s11700_s3, 256, %s17060_s12, [#allocation26], %s15390_s26, %s15390_s26, %s15391_s15  }
0x3134   :  { %s15407_s18 = smov [#allocation27]  }
0x3135   :  { %s11711_s7 = sshll.u32 %s15407_s18, 4  ;;  %s11712_s7 = int_to_ptr.vmem [resolvable:$true] %s11711_s7 }
0x3136   :  { %s15327_s14 = scalar_lea.vmem %s11712_s7, 256  ;;  %p15332_p13 = scmp.lt.s32.totalorder %s11712_s7, %s11712_s7 }
0x3137   :  { %p15328_p12 = scmp.ne.s32.totalorder %s11712_s7, %s15327_s14  ;;  %p15333_p0 = scmp.lt.s32.totalorder %s15327_s14, %s15327_s14 }
0x3139   :  { %p15334_p1 = por %p15333_p0, %p15332_p13 }
0x313b   :  { %p15335_p2 = pnand %p15334_p1, %p15328_p12 }
0x313d   :  { %15338 = shalt.err (!%p15335_p2)
}
0x313e   :  { %s15339_s0 = scalar_lea.hbm %s17061_s13, 256 }
0x313f   :  { %p15340_p3 = scmp.ne.s32.totalorder %s17061_s13, %s15339_s0  ;;  %p15343_p4 = scmp.lt.u32.totalorder %s15339_s0, %s17061_s13 }
0x3141   :  { %p15345_p5 = pnand %p15343_p4, %p15340_p3 }
0x3143   :  { %15348 = shalt.err (!%p15345_p5)
}
0x3144   :  { %11717 = dma.vmem_to_hbm [thread:$0]  %s11712_s7, 256, %s17061_s13, [#allocation26], %s15390_s26, %s15390_s26, %s15391_s15   ;;  %v11753_v34 = vld [vmem:[#allocation23] ss:$0 sm:$0xff] }
0x3145   :  { %s15408_s13 = smov [#allocation24]  }
0x3146   :  { %s11687_s10 = sshll.u32 %s15408_s13, 4  ;;  %s11688_s10 = int_to_ptr.vmem [resolvable:$true] %s11687_s10 }
0x3147   :  { %s15349_s23 = scalar_lea.vmem %s11688_s10, 1024  ;;  %p15354_p7 = scmp.lt.s32.totalorder %s11688_s10, %s11688_s10 }
0x3148   :  { %p15350_p6 = scmp.ne.s32.totalorder %s11688_s10, %s15349_s23  ;;  %p15355_p8 = scmp.lt.s32.totalorder %s15349_s23, %s15349_s23 }
0x314a   :  { %p15356_p9 = por %p15355_p8, %p15354_p7 }
0x314c   :  { %p15357_p10 = pnand %p15356_p9, %p15350_p6 }
0x31f2   :  { %v13880_v41 = vpop.f32.mrb[28].mxu0 }
0x31f3   :  { %v14623_v57 = vadd.f32 %v13880_v41, %v11753_v34  ;;  %v11620_v51 = vpop.f32.mrb[29].mxu0 }
0x31f4   :  { %v14624_v23 = vadd.f32 %v11753_v34, %v11620_v51 }
0x31f5   :  { %v11667_v29 = vmax.f32 %v14623_v57, 0.0 }
0x31f6   :  { %v11666_v30 = vmax.f32 %v14624_v23, 0.0  ;;  %v13883_v48 = vpop.f32.mrb[30].mxu0 }
0x31f7   :  { %11675 = vst.msk [vmem:[#allocation24 + $0x8] sm:$0xff] %vm1471_vm0, %v11667_v29  ;;  %v14625_v18 = vadd.f32 %v13883_v48, %v11753_v34  ;;  %v11632_v17 = vpop.f32.mrb[31].mxu0 }
0x31f8   :  { %11674 = vst.msk [vmem:[#allocation24] sm:$0xff] %vm1471_vm0, %v11666_v30  ;;  %v14626_v27 = vadd.f32 %v11753_v34, %v11632_v17 }
0x31f9   :  { %v11669_v32 = vmax.f32 %v14625_v18, 0.0 }
0x31fa   :  { %v11668_v15 = vmax.f32 %v14626_v27, 0.0  ;;  %v13886_v35 = vpop.f32.mrb[32].mxu0 }
0x31fb   :  { %11677 = vst.msk [vmem:[#allocation24 + $0x18] sm:$0xff] %vm1471_vm0, %v11669_v32  ;;  %v14627_v38 = vadd.f32 %v13886_v35, %v11753_v34  ;;  %v11644_v40 = vpop.f32.mrb[33].mxu0 }
0x31fc   :  { %11676 = vst.msk [vmem:[#allocation24 + $0x10] sm:$0xff] %vm1471_vm0, %v11668_v15  ;;  %v14628_v45 = vadd.f32 %v11753_v34, %v11644_v40 }
0x31fd   :  { %v11671_v20 = vmax.f32 %v14627_v38, 0.0 }
0x31fe   :  { %v11670_v52 = vmax.f32 %v14628_v45, 0.0  ;;  %v13889_v11 = vpop.f32.mrb[34].mxu0 }
0x31ff   :  { %11679 = vst.msk [vmem:[#allocation24 + $0x28] sm:$0xff] %vm1471_vm0, %v11671_v20  ;;  %v14629_v59 = vadd.f32 %v13889_v11, %v11753_v34  ;;  %v11656_v61 = vpop.f32.mrb[35].mxu0 }
0x3200   :  { %11678 = vst.msk [vmem:[#allocation24 + $0x20] sm:$0xff] %vm1471_vm0, %v11670_v52  ;;  %v14630_v4 = vadd.f32 %v11753_v34, %v11656_v61 }
0x3201   :  { %v11673_v47 = vmax.f32 %v14629_v59, 0.0 }
0x3202   :  { %v11672_v19 = vmax.f32 %v14630_v4, 0.0 }
0x3203   :  { %11681 = vst.msk [vmem:[#allocation24 + $0x38] sm:$0xff] %vm1471_vm0, %v11673_v47 }
0x3204   :  { %11680 = vst.msk [vmem:[#allocation24 + $0x30] sm:$0xff] %vm1471_vm0, %v11672_v19 }
0x3205   :  { %15360 = shalt.err (!%p15357_p10)
}
0x3206   :  { %s15361_s3 = scalar_lea.hbm %s17059_s11, 1024 }
0x3207   :  { %p15362_p11 = scmp.ne.s32.totalorder %s17059_s11, %s15361_s3  ;;  %p15365_p12 = scmp.lt.u32.totalorder %s15361_s3, %s17059_s11 }
0x3209   :  { %p15367_p13 = pnand %p15365_p12, %p15362_p11 }
0x320b   :  { %15370 = shalt.err (!%p15367_p13)
}
0x320c   :  { %11693 = dma.vmem_to_hbm [thread:$0]  %s11688_s10, 1024, %s17059_s11, [#allocation8], %s15390_s26, %s15390_s26, %s15391_s15  }
0x320d   :  { %15383 = dma.done.wait [#allocation8], 1024  }
0x320e   :  { %15384 = vsyncadd [#allocation8], 4294966272 }
0x320f   :  { %15385 = dma.done.wait [#allocation26], 512  }
0x3210   :  { %15386 = vsyncadd [#allocation26], 4294966784 }
0x3211   :  { %11727 = vsyncpa [#allocation7], 1 }
0x3212   :  { %11728 = vsyncpa [#allocation10], 1 }
0x3213   :  { %11729 = vsyncpa [#allocation13], 1 }
0x3214   :  { %11730 = vsyncpa [#allocation16], 1 }
0x3215   :  { %11731 = vsyncpa [#allocation19], 1 }
0x3216   :  { %11732 = vsyncpa [#allocation22], 1 }
0x3217   :  { %11733 = vsyncpa [#allocation8], 1 }
0x3218   :  { %11734 = vsyncpa [#allocation26], 1 }

</bundles_post_ra>
